<compile_context>
chip_gen: v7x
topology: tpu7x:2x2x1
jax: 0.10.0
libtpu: 0.0.40
codegen_flags: <defaults>
</compile_context>

<pallas_src>
import jax
import jax.numpy as jnp
import numpy as np
from jax.experimental import pallas as pl
from jax.experimental.pallas import tpu as pltpu


# ------------------------------ GRU cell math --------------------------------
def _gru_cell(gx_r, gx_z, gx_n, h_prev, whh_ref, b_hn_ref):
    """One GRU step given input-side gate pre-activations (biases folded in).

    Matches PyTorch nn.GRU:
      r = sigmoid(W_ir x + b_ir + W_hr h + b_hr)
      z = sigmoid(W_iz x + b_iz + W_hz h + b_hz)
      n = tanh  (W_in x + b_in + r * (W_hn h + b_hn))
      h' = (1 - z) * n + z * h
    gx_r / gx_z already contain (b_ih + b_hh); gx_n contains b_ih_n only.
    whh_ref: (3, H, H) stacked hidden->gate weights (gate order r, z, n).
    b_hn_ref: (1, H) == b_hh_n.
    """
    gh_r = jnp.dot(h_prev, whh_ref[0], preferred_element_type=jnp.float32)
    gh_z = jnp.dot(h_prev, whh_ref[1], preferred_element_type=jnp.float32)
    gh_n = (jnp.dot(h_prev, whh_ref[2], preferred_element_type=jnp.float32)
            + b_hn_ref[...])
    r = jax.nn.sigmoid(gx_r + gh_r)
    z = jax.nn.sigmoid(gx_z + gh_z)
    n = jnp.tanh(gx_n + r * gh_n)
    return (1.0 - z) * n + z * h_prev


# ------------------------------ Fused kernel ----------------------------------
def _make_fused_kernel(num_layers, T, B, H):
    """Kernel over the whole sequence: x is time-major flat (T*B, I)."""

    def kernel(*refs):
        x_ref = refs[0]
        lrefs = refs[1:1 + 4 * num_layers]
        wproj_ref = refs[1 + 4 * num_layers]     # (H, O)
        bproj_ref = refs[2 + 4 * num_layers]     # (1, O)
        y_ref = refs[3 + 4 * num_layers]         # (T*B, O)
        hseq = refs[4 + 4 * num_layers]          # VMEM scratch (T*B, H)

        # Per layer: w_ih (3,K,H), w_hh (3,H,H), b_g (3,1,H), b_hn (1,H)
        layers = [tuple(lrefs[4 * l:4 * l + 4]) for l in range(num_layers)]

        # ---- hoisted layer-0 input-side matmuls over ALL timesteps ----
        x_all = x_ref[...]                                   # (T*B, I)
        wih0, whh0, bg0, bhn0 = layers[0]
        gx0 = [jnp.dot(x_all, wih0[g], preferred_element_type=jnp.float32)
               + bg0[g] for g in range(3)]                   # 3 x (T*B, H)

        # Hidden states carried as values through the fully-unrolled time loop.
        h = [jnp.zeros((B, H), jnp.float32) for _ in range(num_layers)]

        for t in range(T):                                   # static unroll
            lo = t * B
            # layer 0 uses the hoisted gx
            h[0] = _gru_cell(gx0[0][lo:lo + B], gx0[1][lo:lo + B],
                             gx0[2][lo:lo + B], h[0], whh0, bhn0)
            inp = h[0]
            # deeper layers: input-side matmul computed in-loop (input is h_{l-1,t})
            for l in range(1, num_layers):
                wih, whh, bg, bhn = layers[l]
                gx = [jnp.dot(inp, wih[g], preferred_element_type=jnp.float32)
                      + bg[g] for g in range(3)]
                h[l] = _gru_cell(gx[0], gx[1], gx[2], h[l], whh, bhn)
                inp = h[l]
            hseq[pl.ds(lo, B), :] = inp                      # last layer's h_t

        # ---- hoisted output projection over the full sequence ----
        y_ref[...] = (jnp.dot(hseq[...], wproj_ref[...],
                              preferred_element_type=jnp.float32)
                      + bproj_ref[...]).astype(y_ref.dtype)

    return kernel


# ------------------------------- GRUNet wrapper --------------------------------
def init_params(key, hidden_size, num_layers, n_input_channel, n_output_channel):
    """PyTorch-style uniform(-1/sqrt(H), 1/sqrt(H)); gate-split, bias-combined."""
    H = hidden_size
    bound = 1.0 / np.sqrt(H)
    params = {"layers": []}
    for l in range(num_layers):
        in_size = n_input_channel if l == 0 else H
        key, k1, k2, k3, k4 = jax.random.split(key, 5)
        w_ih = jax.random.uniform(k1, (3, in_size, H), jnp.float32, -bound, bound)
        w_hh = jax.random.uniform(k2, (3, H, H), jnp.float32, -bound, bound)
        b_ih = jax.random.uniform(k3, (3, 1, H), jnp.float32, -bound, bound)
        b_hh = jax.random.uniform(k4, (3, 1, H), jnp.float32, -bound, bound)
        # r/z: fold b_ih+b_hh together; n: keep b_hh_n separate (inside r*(...)).
        b_g = jnp.concatenate([b_ih[0:1] + b_hh[0:1],
                               b_ih[1:2] + b_hh[1:2],
                               b_ih[2:3]], axis=0)            # (3, 1, H)
        b_hn = b_hh[2]                                        # (1, H)
        params["layers"].append({"w_ih": w_ih, "w_hh": w_hh,
                                 "b_g": b_g, "b_hn": b_hn})
    key, k5, k6 = jax.random.split(key, 3)
    params["proj_w"] = jax.random.uniform(k5, (H, n_output_channel),
                                          jnp.float32, -bound, bound)
    params["proj_b"] = jax.random.uniform(k6, (1, n_output_channel),
                                          jnp.float32, -bound, bound)
    return params


@jax.jit
def grunet_forward(params, x):
    """x: (B, T, I) float32 -> (B, T, O) float32 (matches GRUNet.forward)."""
    B, T, I = x.shape
    H = params["layers"][0]["w_hh"].shape[-1]
    O = params["proj_w"].shape[-1]
    L = len(params["layers"])

    # Time-major, flattened so timestep t is a contiguous (B, :) row block.
    # (Tiny tensors here; layout plumbing stays outside the kernel.)
    x_tm = jnp.transpose(x, (1, 0, 2)).reshape(T * B, I)

    args = [x_tm]
    for lp in params["layers"]:
        args += [lp["w_ih"], lp["w_hh"], lp["b_g"], lp["b_hn"]]
    args += [params["proj_w"], params["proj_b"]]

    y_flat = pl.pallas_call(
        _make_fused_kernel(L, T, B, H),
        out_shape=jax.ShapeDtypeStruct((T * B, O), jnp.float32),
        scratch_shapes=[pltpu.VMEM((T * B, H), jnp.float32)],
    )(*args)

    return jnp.transpose(y_flat.reshape(T, B, O), (1, 0, 2))   # (B, T, O)


# ------------------------------ Pure-JAX reference -----------------------------
def grunet_reference(params, x):
    B, T, I = x.shape
    h_seq = jnp.transpose(x, (1, 0, 2))   # (T, B, I)
    for lp in params["layers"]:
        H = lp["w_hh"].shape[-1]

        def step(h_prev, x_t, lp=lp):
            gx = [x_t @ lp["w_ih"][g] + lp["b_g"][g] for g in range(3)]
            gh_r = h_prev @ lp["w_hh"][0]
            gh_z = h_prev @ lp["w_hh"][1]
            gh_n = h_prev @ lp["w_hh"][2] + lp["b_hn"]
            r = jax.nn.sigmoid(gx[0] + gh_r)
            z = jax.nn.sigmoid(gx[1] + gh_z)
            n = jnp.tanh(gx[2] + r * gh_n)
            h_new = (1.0 - z) * n + z * h_prev
            return h_new, h_new

        h0 = jnp.zeros((B, H), jnp.float32)
        _, h_seq = jax.lax.scan(step, h0, h_seq)
    y = h_seq @ params["proj_w"] + params["proj_b"]
    return jnp.transpose(y, (1, 0, 2))


if __name__ == "__main__":
    # Small shapes consistent with GRUNet: batch=2, seq=8, input_channels=4,
    # hidden=32, num_layers=2, output_channels=3 (dof / nD unused in forward).
    hidden_size, num_layers = 32, 2
    n_input_channel, n_output_channel = 4, 3
    B, T = 2, 8

    key = jax.random.PRNGKey(0)
    key, kx = jax.random.split(key)
    x = jax.random.normal(kx, (B, T, n_input_channel), jnp.float32)
    params = init_params(key, hidden_size, num_layers,
                         n_input_channel, n_output_channel)

    out = jax.block_until_ready(grunet_forward(params, x))
    ref = jax.block_until_ready(grunet_reference(params, x))
    assert out.shape == (B, T, n_output_channel)
    np.testing.assert_allclose(np.asarray(out), np.asarray(ref),
                               rtol=1e-5, atol=1e-5)
    print("KERNEL_OK")
</pallas_src>

<mosaic_0001>
module attributes {stable_mosaic.version = 11 : i64} {
  func.func @kernel(%arg0: memref<16x4xf32, #tpu.memory_space<vmem>>, %arg1: memref<3x4x32xf32, #tpu.memory_space<vmem>>, %arg2: memref<3x32x32xf32, #tpu.memory_space<vmem>>, %arg3: memref<3x1x32xf32, #tpu.memory_space<vmem>>, %arg4: memref<1x32xf32, #tpu.memory_space<vmem>>, %arg5: memref<3x32x32xf32, #tpu.memory_space<vmem>>, %arg6: memref<3x32x32xf32, #tpu.memory_space<vmem>>, %arg7: memref<3x1x32xf32, #tpu.memory_space<vmem>>, %arg8: memref<1x32xf32, #tpu.memory_space<vmem>>, %arg9: memref<32x3xf32, #tpu.memory_space<vmem>>, %arg10: memref<1x3xf32, #tpu.memory_space<vmem>>, %arg11: memref<16x3xf32, #tpu.memory_space<vmem>>, %arg12: memref<16x32xf32, #tpu.memory_space<vmem>>) attributes {dimension_semantics = [], scalar_prefetch = 0 : i64, scratch_operands = 1 : i64, tpu.core_type = #tpu.core_type<tc>} {
    %c0 = arith.constant 0 : index
    %c0_0 = arith.constant 0 : index
    %0 = vector.load %arg0[%c0, %c0_0] : memref<16x4xf32, #tpu.memory_space<vmem>>, vector<16x4xf32>
    %c0_1 = arith.constant 0 : index
    %c0_2 = arith.constant 0 : index
    %c0_3 = arith.constant 0 : index
    %1 = vector.load %arg1[%c0_1, %c0_2, %c0_3] : memref<3x4x32xf32, #tpu.memory_space<vmem>>, vector<1x4x32xf32>
    %2 = vector.shape_cast %1 : vector<1x4x32xf32> to vector<4x32xf32>
    %cst = arith.constant dense<0.000000e+00> : vector<16x32xf32>
    %3 = tpu.matmul %0, %2, %cst {dimension_numbers = #tpu.dot_dimension_numbers<[1], [0], [0], [1], [0, 0, 1, 1], [], []>} : vector<16x4xf32>, vector<4x32xf32>, vector<16x32xf32> -> vector<16x32xf32>
    %c0_4 = arith.constant 0 : index
    %c0_5 = arith.constant 0 : index
    %c0_6 = arith.constant 0 : index
    %4 = vector.load %arg3[%c0_4, %c0_5, %c0_6] : memref<3x1x32xf32, #tpu.memory_space<vmem>>, vector<1x1x32xf32>
    %5 = vector.shape_cast %4 : vector<1x1x32xf32> to vector<1x32xf32>
    %6 = vector.broadcast %5 : vector<1x32xf32> to vector<16x32xf32>
    %7 = arith.addf %3, %6 : vector<16x32xf32>
    %c1 = arith.constant 1 : index
    %c0_7 = arith.constant 0 : index
    %c0_8 = arith.constant 0 : index
    %8 = vector.load %arg1[%c1, %c0_7, %c0_8] : memref<3x4x32xf32, #tpu.memory_space<vmem>>, vector<1x4x32xf32>
    %9 = vector.shape_cast %8 : vector<1x4x32xf32> to vector<4x32xf32>
    %cst_9 = arith.constant dense<0.000000e+00> : vector<16x32xf32>
    %10 = tpu.matmul %0, %9, %cst_9 {dimension_numbers = #tpu.dot_dimension_numbers<[1], [0], [0], [1], [0, 0, 1, 1], [], []>} : vector<16x4xf32>, vector<4x32xf32>, vector<16x32xf32> -> vector<16x32xf32>
    %c1_10 = arith.constant 1 : index
    %c0_11 = arith.constant 0 : index
    %c0_12 = arith.constant 0 : index
    %11 = vector.load %arg3[%c1_10, %c0_11, %c0_12] : memref<3x1x32xf32, #tpu.memory_space<vmem>>, vector<1x1x32xf32>
    %12 = vector.shape_cast %11 : vector<1x1x32xf32> to vector<1x32xf32>
    %13 = vector.broadcast %12 : vector<1x32xf32> to vector<16x32xf32>
    %14 = arith.addf %10, %13 : vector<16x32xf32>
    %c2 = arith.constant 2 : index
    %c0_13 = arith.constant 0 : index
    %c0_14 = arith.constant 0 : index
    %15 = vector.load %arg1[%c2, %c0_13, %c0_14] : memref<3x4x32xf32, #tpu.memory_space<vmem>>, vector<1x4x32xf32>
    %16 = vector.shape_cast %15 : vector<1x4x32xf32> to vector<4x32xf32>
    %cst_15 = arith.constant dense<0.000000e+00> : vector<16x32xf32>
    %17 = tpu.matmul %0, %16, %cst_15 {dimension_numbers = #tpu.dot_dimension_numbers<[1], [0], [0], [1], [0, 0, 1, 1], [], []>} : vector<16x4xf32>, vector<4x32xf32>, vector<16x32xf32> -> vector<16x32xf32>
    %c2_16 = arith.constant 2 : index
    %c0_17 = arith.constant 0 : index
    %c0_18 = arith.constant 0 : index
    %18 = vector.load %arg3[%c2_16, %c0_17, %c0_18] : memref<3x1x32xf32, #tpu.memory_space<vmem>>, vector<1x1x32xf32>
    %19 = vector.shape_cast %18 : vector<1x1x32xf32> to vector<1x32xf32>
    %20 = vector.broadcast %19 : vector<1x32xf32> to vector<16x32xf32>
    %21 = arith.addf %17, %20 : vector<16x32xf32>
    %cst_19 = arith.constant 0.000000e+00 : f32
    %22 = vector.broadcast %cst_19 : f32 to vector<2x32xf32>
    %cst_20 = arith.constant 0.000000e+00 : f32
    %23 = vector.broadcast %cst_20 : f32 to vector<2x32xf32>
    %24 = vector.extract_strided_slice %7 {offsets = [0, 0], sizes = [2, 32], strides = [1, 1]} : vector<16x32xf32> to vector<2x32xf32>
    %25 = vector.extract_strided_slice %14 {offsets = [0, 0], sizes = [2, 32], strides = [1, 1]} : vector<16x32xf32> to vector<2x32xf32>
    %26 = vector.extract_strided_slice %21 {offsets = [0, 0], sizes = [2, 32], strides = [1, 1]} : vector<16x32xf32> to vector<2x32xf32>
    %c0_21 = arith.constant 0 : index
    %c0_22 = arith.constant 0 : index
    %c0_23 = arith.constant 0 : index
    %27 = vector.load %arg2[%c0_21, %c0_22, %c0_23] : memref<3x32x32xf32, #tpu.memory_space<vmem>>, vector<1x32x32xf32>
    %28 = vector.shape_cast %27 : vector<1x32x32xf32> to vector<32x32xf32>
    %cst_24 = arith.constant dense<0.000000e+00> : vector<2x32xf32>
    %29 = tpu.matmul %22, %28, %cst_24 {dimension_numbers = #tpu.dot_dimension_numbers<[1], [0], [0], [1], [0, 0, 1, 1], [], []>} : vector<2x32xf32>, vector<32x32xf32>, vector<2x32xf32> -> vector<2x32xf32>
    %c1_25 = arith.constant 1 : index
    %c0_26 = arith.constant 0 : index
    %c0_27 = arith.constant 0 : index
    %30 = vector.load %arg2[%c1_25, %c0_26, %c0_27] : memref<3x32x32xf32, #tpu.memory_space<vmem>>, vector<1x32x32xf32>
    %31 = vector.shape_cast %30 : vector<1x32x32xf32> to vector<32x32xf32>
    %cst_28 = arith.constant dense<0.000000e+00> : vector<2x32xf32>
    %32 = tpu.matmul %22, %31, %cst_28 {dimension_numbers = #tpu.dot_dimension_numbers<[1], [0], [0], [1], [0, 0, 1, 1], [], []>} : vector<2x32xf32>, vector<32x32xf32>, vector<2x32xf32> -> vector<2x32xf32>
    %c2_29 = arith.constant 2 : index
    %c0_30 = arith.constant 0 : index
    %c0_31 = arith.constant 0 : index
    %33 = vector.load %arg2[%c2_29, %c0_30, %c0_31] : memref<3x32x32xf32, #tpu.memory_space<vmem>>, vector<1x32x32xf32>
    %34 = vector.shape_cast %33 : vector<1x32x32xf32> to vector<32x32xf32>
    %cst_32 = arith.constant dense<0.000000e+00> : vector<2x32xf32>
    %35 = tpu.matmul %22, %34, %cst_32 {dimension_numbers = #tpu.dot_dimension_numbers<[1], [0], [0], [1], [0, 0, 1, 1], [], []>} : vector<2x32xf32>, vector<32x32xf32>, vector<2x32xf32> -> vector<2x32xf32>
    %c0_33 = arith.constant 0 : index
    %c0_34 = arith.constant 0 : index
    %36 = vector.load %arg4[%c0_33, %c0_34] : memref<1x32xf32, #tpu.memory_space<vmem>>, vector<1x32xf32>
    %37 = vector.broadcast %36 : vector<1x32xf32> to vector<2x32xf32>
    %38 = arith.addf %35, %37 : vector<2x32xf32>
    %39 = arith.addf %24, %29 : vector<2x32xf32>
    %40 = arith.negf %39 : vector<2x32xf32>
    %41 = math.exp %40 : vector<2x32xf32>
    %cst_35 = arith.constant 1.000000e+00 : f32
    %42 = vector.broadcast %cst_35 : f32 to vector<2x32xf32>
    %43 = arith.addf %42, %41 : vector<2x32xf32>
    %44 = arith.divf %42, %43 : vector<2x32xf32>
    %45 = arith.addf %25, %32 : vector<2x32xf32>
    %46 = arith.negf %45 : vector<2x32xf32>
    %47 = math.exp %46 : vector<2x32xf32>
    %cst_36 = arith.constant 1.000000e+00 : f32
    %48 = vector.broadcast %cst_36 : f32 to vector<2x32xf32>
    %49 = arith.addf %48, %47 : vector<2x32xf32>
    %50 = arith.divf %48, %49 : vector<2x32xf32>
    %51 = arith.mulf %44, %38 : vector<2x32xf32>
    %52 = arith.addf %26, %51 : vector<2x32xf32>
    %53 = math.tanh %52 : vector<2x32xf32>
    %cst_37 = arith.constant 1.000000e+00 : f32
    %54 = vector.broadcast %cst_37 : f32 to vector<2x32xf32>
    %55 = arith.subf %54, %50 : vector<2x32xf32>
    %56 = arith.mulf %55, %53 : vector<2x32xf32>
    %57 = arith.mulf %50, %22 : vector<2x32xf32>
    %58 = arith.addf %56, %57 : vector<2x32xf32>
    %c0_38 = arith.constant 0 : index
    %c0_39 = arith.constant 0 : index
    %c0_40 = arith.constant 0 : index
    %59 = vector.load %arg5[%c0_38, %c0_39, %c0_40] : memref<3x32x32xf32, #tpu.memory_space<vmem>>, vector<1x32x32xf32>
    %60 = vector.shape_cast %59 : vector<1x32x32xf32> to vector<32x32xf32>
    %cst_41 = arith.constant dense<0.000000e+00> : vector<2x32xf32>
    %61 = tpu.matmul %58, %60, %cst_41 {dimension_numbers = #tpu.dot_dimension_numbers<[1], [0], [0], [1], [0, 0, 1, 1], [], []>} : vector<2x32xf32>, vector<32x32xf32>, vector<2x32xf32> -> vector<2x32xf32>
    %c0_42 = arith.constant 0 : index
    %c0_43 = arith.constant 0 : index
    %c0_44 = arith.constant 0 : index
    %62 = vector.load %arg7[%c0_42, %c0_43, %c0_44] : memref<3x1x32xf32, #tpu.memory_space<vmem>>, vector<1x1x32xf32>
    %63 = vector.shape_cast %62 : vector<1x1x32xf32> to vector<1x32xf32>
    %64 = vector.broadcast %63 : vector<1x32xf32> to vector<2x32xf32>
    %65 = arith.addf %61, %64 : vector<2x32xf32>
    %c1_45 = arith.constant 1 : index
    %c0_46 = arith.constant 0 : index
    %c0_47 = arith.constant 0 : index
    %66 = vector.load %arg5[%c1_45, %c0_46, %c0_47] : memref<3x32x32xf32, #tpu.memory_space<vmem>>, vector<1x32x32xf32>
    %67 = vector.shape_cast %66 : vector<1x32x32xf32> to vector<32x32xf32>
    %cst_48 = arith.constant dense<0.000000e+00> : vector<2x32xf32>
    %68 = tpu.matmul %58, %67, %cst_48 {dimension_numbers = #tpu.dot_dimension_numbers<[1], [0], [0], [1], [0, 0, 1, 1], [], []>} : vector<2x32xf32>, vector<32x32xf32>, vector<2x32xf32> -> vector<2x32xf32>
    %c1_49 = arith.constant 1 : index
    %c0_50 = arith.constant 0 : index
    %c0_51 = arith.constant 0 : index
    %69 = vector.load %arg7[%c1_49, %c0_50, %c0_51] : memref<3x1x32xf32, #tpu.memory_space<vmem>>, vector<1x1x32xf32>
    %70 = vector.shape_cast %69 : vector<1x1x32xf32> to vector<1x32xf32>
    %71 = vector.broadcast %70 : vector<1x32xf32> to vector<2x32xf32>
    %72 = arith.addf %68, %71 : vector<2x32xf32>
    %c2_52 = arith.constant 2 : index
    %c0_53 = arith.constant 0 : index
    %c0_54 = arith.constant 0 : index
    %73 = vector.load %arg5[%c2_52, %c0_53, %c0_54] : memref<3x32x32xf32, #tpu.memory_space<vmem>>, vector<1x32x32xf32>
    %74 = vector.shape_cast %73 : vector<1x32x32xf32> to vector<32x32xf32>
    %cst_55 = arith.constant dense<0.000000e+00> : vector<2x32xf32>
    %75 = tpu.matmul %58, %74, %cst_55 {dimension_numbers = #tpu.dot_dimension_numbers<[1], [0], [0], [1], [0, 0, 1, 1], [], []>} : vector<2x32xf32>, vector<32x32xf32>, vector<2x32xf32> -> vector<2x32xf32>
    %c2_56 = arith.constant 2 : index
    %c0_57 = arith.constant 0 : index
    %c0_58 = arith.constant 0 : index
    %76 = vector.load %arg7[%c2_56, %c0_57, %c0_58] : memref<3x1x32xf32, #tpu.memory_space<vmem>>, vector<1x1x32xf32>
    %77 = vector.shape_cast %76 : vector<1x1x32xf32> to vector<1x32xf32>
    %78 = vector.broadcast %77 : vector<1x32xf32> to vector<2x32xf32>
    %79 = arith.addf %75, %78 : vector<2x32xf32>
    %c0_59 = arith.constant 0 : index
    %c0_60 = arith.constant 0 : index
    %c0_61 = arith.constant 0 : index
    %80 = vector.load %arg6[%c0_59, %c0_60, %c0_61] : memref<3x32x32xf32, #tpu.memory_space<vmem>>, vector<1x32x32xf32>
    %81 = vector.shape_cast %80 : vector<1x32x32xf32> to vector<32x32xf32>
    %cst_62 = arith.constant dense<0.000000e+00> : vector<2x32xf32>
    %82 = tpu.matmul %23, %81, %cst_62 {dimension_numbers = #tpu.dot_dimension_numbers<[1], [0], [0], [1], [0, 0, 1, 1], [], []>} : vector<2x32xf32>, vector<32x32xf32>, vector<2x32xf32> -> vector<2x32xf32>
    %c1_63 = arith.constant 1 : index
    %c0_64 = arith.constant 0 : index
    %c0_65 = arith.constant 0 : index
    %83 = vector.load %arg6[%c1_63, %c0_64, %c0_65] : memref<3x32x32xf32, #tpu.memory_space<vmem>>, vector<1x32x32xf32>
    %84 = vector.shape_cast %83 : vector<1x32x32xf32> to vector<32x32xf32>
    %cst_66 = arith.constant dense<0.000000e+00> : vector<2x32xf32>
    %85 = tpu.matmul %23, %84, %cst_66 {dimension_numbers = #tpu.dot_dimension_numbers<[1], [0], [0], [1], [0, 0, 1, 1], [], []>} : vector<2x32xf32>, vector<32x32xf32>, vector<2x32xf32> -> vector<2x32xf32>
    %c2_67 = arith.constant 2 : index
    %c0_68 = arith.constant 0 : index
    %c0_69 = arith.constant 0 : index
    %86 = vector.load %arg6[%c2_67, %c0_68, %c0_69] : memref<3x32x32xf32, #tpu.memory_space<vmem>>, vector<1x32x32xf32>
    %87 = vector.shape_cast %86 : vector<1x32x32xf32> to vector<32x32xf32>
    %cst_70 = arith.constant dense<0.000000e+00> : vector<2x32xf32>
    %88 = tpu.matmul %23, %87, %cst_70 {dimension_numbers = #tpu.dot_dimension_numbers<[1], [0], [0], [1], [0, 0, 1, 1], [], []>} : vector<2x32xf32>, vector<32x32xf32>, vector<2x32xf32> -> vector<2x32xf32>
    %c0_71 = arith.constant 0 : index
    %c0_72 = arith.constant 0 : index
    %89 = vector.load %arg8[%c0_71, %c0_72] : memref<1x32xf32, #tpu.memory_space<vmem>>, vector<1x32xf32>
    %90 = vector.broadcast %89 : vector<1x32xf32> to vector<2x32xf32>
    %91 = arith.addf %88, %90 : vector<2x32xf32>
    %92 = arith.addf %65, %82 : vector<2x32xf32>
    %93 = arith.negf %92 : vector<2x32xf32>
    %94 = math.exp %93 : vector<2x32xf32>
    %cst_73 = arith.constant 1.000000e+00 : f32
    %95 = vector.broadcast %cst_73 : f32 to vector<2x32xf32>
    %96 = arith.addf %95, %94 : vector<2x32xf32>
    %97 = arith.divf %95, %96 : vector<2x32xf32>
    %98 = arith.addf %72, %85 : vector<2x32xf32>
    %99 = arith.negf %98 : vector<2x32xf32>
    %100 = math.exp %99 : vector<2x32xf32>
    %cst_74 = arith.constant 1.000000e+00 : f32
    %101 = vector.broadcast %cst_74 : f32 to vector<2x32xf32>
    %102 = arith.addf %101, %100 : vector<2x32xf32>
    %103 = arith.divf %101, %102 : vector<2x32xf32>
    %104 = arith.mulf %97, %91 : vector<2x32xf32>
    %105 = arith.addf %79, %104 : vector<2x32xf32>
    %106 = math.tanh %105 : vector<2x32xf32>
    %cst_75 = arith.constant 1.000000e+00 : f32
    %107 = vector.broadcast %cst_75 : f32 to vector<2x32xf32>
    %108 = arith.subf %107, %103 : vector<2x32xf32>
    %109 = arith.mulf %108, %106 : vector<2x32xf32>
    %110 = arith.mulf %103, %23 : vector<2x32xf32>
    %111 = arith.addf %109, %110 : vector<2x32xf32>
    %c0_76 = arith.constant 0 : index
    %c0_77 = arith.constant 0 : index
    %112 = vector.load %arg12[%c0_76, %c0_77] : memref<16x32xf32, #tpu.memory_space<vmem>>, vector<2x32xf32>
    tpu.vector_store %arg12[%c0_76, %c0_77], %111 {strides = array<i32>} : memref<16x32xf32, #tpu.memory_space<vmem>>, vector<2x32xf32>,
    %113 = vector.extract_strided_slice %7 {offsets = [2, 0], sizes = [2, 32], strides = [1, 1]} : vector<16x32xf32> to vector<2x32xf32>
    %114 = vector.extract_strided_slice %14 {offsets = [2, 0], sizes = [2, 32], strides = [1, 1]} : vector<16x32xf32> to vector<2x32xf32>
    %115 = vector.extract_strided_slice %21 {offsets = [2, 0], sizes = [2, 32], strides = [1, 1]} : vector<16x32xf32> to vector<2x32xf32>
    %c0_78 = arith.constant 0 : index
    %c0_79 = arith.constant 0 : index
    %c0_80 = arith.constant 0 : index
    %116 = vector.load %arg2[%c0_78, %c0_79, %c0_80] : memref<3x32x32xf32, #tpu.memory_space<vmem>>, vector<1x32x32xf32>
    %117 = vector.shape_cast %116 : vector<1x32x32xf32> to vector<32x32xf32>
    %cst_81 = arith.constant dense<0.000000e+00> : vector<2x32xf32>
    %118 = tpu.matmul %58, %117, %cst_81 {dimension_numbers = #tpu.dot_dimension_numbers<[1], [0], [0], [1], [0, 0, 1, 1], [], []>} : vector<2x32xf32>, vector<32x32xf32>, vector<2x32xf32> -> vector<2x32xf32>
    %c1_82 = arith.constant 1 : index
    %c0_83 = arith.constant 0 : index
    %c0_84 = arith.constant 0 : index
    %119 = vector.load %arg2[%c1_82, %c0_83, %c0_84] : memref<3x32x32xf32, #tpu.memory_space<vmem>>, vector<1x32x32xf32>
    %120 = vector.shape_cast %119 : vector<1x32x32xf32> to vector<32x32xf32>
    %cst_85 = arith.constant dense<0.000000e+00> : vector<2x32xf32>
    %121 = tpu.matmul %58, %120, %cst_85 {dimension_numbers = #tpu.dot_dimension_numbers<[1], [0], [0], [1], [0, 0, 1, 1], [], []>} : vector<2x32xf32>, vector<32x32xf32>, vector<2x32xf32> -> vector<2x32xf32>
    %c2_86 = arith.constant 2 : index
    %c0_87 = arith.constant 0 : index
    %c0_88 = arith.constant 0 : index
    %122 = vector.load %arg2[%c2_86, %c0_87, %c0_88] : memref<3x32x32xf32, #tpu.memory_space<vmem>>, vector<1x32x32xf32>
    %123 = vector.shape_cast %122 : vector<1x32x32xf32> to vector<32x32xf32>
    %cst_89 = arith.constant dense<0.000000e+00> : vector<2x32xf32>
    %124 = tpu.matmul %58, %123, %cst_89 {dimension_numbers = #tpu.dot_dimension_numbers<[1], [0], [0], [1], [0, 0, 1, 1], [], []>} : vector<2x32xf32>, vector<32x32xf32>, vector<2x32xf32> -> vector<2x32xf32>
    %c0_90 = arith.constant 0 : index
    %c0_91 = arith.constant 0 : index
    %125 = vector.load %arg4[%c0_90, %c0_91] : memref<1x32xf32, #tpu.memory_space<vmem>>, vector<1x32xf32>
    %126 = vector.broadcast %125 : vector<1x32xf32> to vector<2x32xf32>
    %127 = arith.addf %124, %126 : vector<2x32xf32>
    %128 = arith.addf %113, %118 : vector<2x32xf32>
    %129 = arith.negf %128 : vector<2x32xf32>
    %130 = math.exp %129 : vector<2x32xf32>
    %cst_92 = arith.constant 1.000000e+00 : f32
    %131 = vector.broadcast %cst_92 : f32 to vector<2x32xf32>
    %132 = arith.addf %131, %130 : vector<2x32xf32>
    %133 = arith.divf %131, %132 : vector<2x32xf32>
    %134 = arith.addf %114, %121 : vector<2x32xf32>
    %135 = arith.negf %134 : vector<2x32xf32>
    %136 = math.exp %135 : vector<2x32xf32>
    %cst_93 = arith.constant 1.000000e+00 : f32
    %137 = vector.broadcast %cst_93 : f32 to vector<2x32xf32>
    %138 = arith.addf %137, %136 : vector<2x32xf32>
    %139 = arith.divf %137, %138 : vector<2x32xf32>
    %140 = arith.mulf %133, %127 : vector<2x32xf32>
    %141 = arith.addf %115, %140 : vector<2x32xf32>
    %142 = math.tanh %141 : vector<2x32xf32>
    %cst_94 = arith.constant 1.000000e+00 : f32
    %143 = vector.broadcast %cst_94 : f32 to vector<2x32xf32>
    %144 = arith.subf %143, %139 : vector<2x32xf32>
    %145 = arith.mulf %144, %142 : vector<2x32xf32>
    %146 = arith.mulf %139, %58 : vector<2x32xf32>
    %147 = arith.addf %145, %146 : vector<2x32xf32>
    %c0_95 = arith.constant 0 : index
    %c0_96 = arith.constant 0 : index
    %c0_97 = arith.constant 0 : index
    %148 = vector.load %arg5[%c0_95, %c0_96, %c0_97] : memref<3x32x32xf32, #tpu.memory_space<vmem>>, vector<1x32x32xf32>
    %149 = vector.shape_cast %148 : vector<1x32x32xf32> to vector<32x32xf32>
    %cst_98 = arith.constant dense<0.000000e+00> : vector<2x32xf32>
    %150 = tpu.matmul %147, %149, %cst_98 {dimension_numbers = #tpu.dot_dimension_numbers<[1], [0], [0], [1], [0, 0, 1, 1], [], []>} : vector<2x32xf32>, vector<32x32xf32>, vector<2x32xf32> -> vector<2x32xf32>
    %c0_99 = arith.constant 0 : index
    %c0_100 = arith.constant 0 : index
    %c0_101 = arith.constant 0 : index
    %151 = vector.load %arg7[%c0_99, %c0_100, %c0_101] : memref<3x1x32xf32, #tpu.memory_space<vmem>>, vector<1x1x32xf32>
    %152 = vector.shape_cast %151 : vector<1x1x32xf32> to vector<1x32xf32>
    %153 = vector.broadcast %152 : vector<1x32xf32> to vector<2x32xf32>
    %154 = arith.addf %150, %153 : vector<2x32xf32>
    %c1_102 = arith.constant 1 : index
    %c0_103 = arith.constant 0 : index
    %c0_104 = arith.constant 0 : index
    %155 = vector.load %arg5[%c1_102, %c0_103, %c0_104] : memref<3x32x32xf32, #tpu.memory_space<vmem>>, vector<1x32x32xf32>
    %156 = vector.shape_cast %155 : vector<1x32x32xf32> to vector<32x32xf32>
    %cst_105 = arith.constant dense<0.000000e+00> : vector<2x32xf32>
    %157 = tpu.matmul %147, %156, %cst_105 {dimension_numbers = #tpu.dot_dimension_numbers<[1], [0], [0], [1], [0, 0, 1, 1], [], []>} : vector<2x32xf32>, vector<32x32xf32>, vector<2x32xf32> -> vector<2x32xf32>
    %c1_106 = arith.constant 1 : index
    %c0_107 = arith.constant 0 : index
    %c0_108 = arith.constant 0 : index
    %158 = vector.load %arg7[%c1_106, %c0_107, %c0_108] : memref<3x1x32xf32, #tpu.memory_space<vmem>>, vector<1x1x32xf32>
    %159 = vector.shape_cast %158 : vector<1x1x32xf32> to vector<1x32xf32>
    %160 = vector.broadcast %159 : vector<1x32xf32> to vector<2x32xf32>
    %161 = arith.addf %157, %160 : vector<2x32xf32>
    %c2_109 = arith.constant 2 : index
    %c0_110 = arith.constant 0 : index
    %c0_111 = arith.constant 0 : index
    %162 = vector.load %arg5[%c2_109, %c0_110, %c0_111] : memref<3x32x32xf32, #tpu.memory_space<vmem>>, vector<1x32x32xf32>
    %163 = vector.shape_cast %162 : vector<1x32x32xf32> to vector<32x32xf32>
    %cst_112 = arith.constant dense<0.000000e+00> : vector<2x32xf32>
    %164 = tpu.matmul %147, %163, %cst_112 {dimension_numbers = #tpu.dot_dimension_numbers<[1], [0], [0], [1], [0, 0, 1, 1], [], []>} : vector<2x32xf32>, vector<32x32xf32>, vector<2x32xf32> -> vector<2x32xf32>
    %c2_113 = arith.constant 2 : index
    %c0_114 = arith.constant 0 : index
    %c0_115 = arith.constant 0 : index
    %165 = vector.load %arg7[%c2_113, %c0_114, %c0_115] : memref<3x1x32xf32, #tpu.memory_space<vmem>>, vector<1x1x32xf32>
    %166 = vector.shape_cast %165 : vector<1x1x32xf32> to vector<1x32xf32>
    %167 = vector.broadcast %166 : vector<1x32xf32> to vector<2x32xf32>
    %168 = arith.addf %164, %167 : vector<2x32xf32>
    %c0_116 = arith.constant 0 : index
    %c0_117 = arith.constant 0 : index
    %c0_118 = arith.constant 0 : index
    %169 = vector.load %arg6[%c0_116, %c0_117, %c0_118] : memref<3x32x32xf32, #tpu.memory_space<vmem>>, vector<1x32x32xf32>
    %170 = vector.shape_cast %169 : vector<1x32x32xf32> to vector<32x32xf32>
    %cst_119 = arith.constant dense<0.000000e+00> : vector<2x32xf32>
    %171 = tpu.matmul %111, %170, %cst_119 {dimension_numbers = #tpu.dot_dimension_numbers<[1], [0], [0], [1], [0, 0, 1, 1], [], []>} : vector<2x32xf32>, vector<32x32xf32>, vector<2x32xf32> -> vector<2x32xf32>
    %c1_120 = arith.constant 1 : index
    %c0_121 = arith.constant 0 : index
    %c0_122 = arith.constant 0 : index
    %172 = vector.load %arg6[%c1_120, %c0_121, %c0_122] : memref<3x32x32xf32, #tpu.memory_space<vmem>>, vector<1x32x32xf32>
    %173 = vector.shape_cast %172 : vector<1x32x32xf32> to vector<32x32xf32>
    %cst_123 = arith.constant dense<0.000000e+00> : vector<2x32xf32>
    %174 = tpu.matmul %111, %173, %cst_123 {dimension_numbers = #tpu.dot_dimension_numbers<[1], [0], [0], [1], [0, 0, 1, 1], [], []>} : vector<2x32xf32>, vector<32x32xf32>, vector<2x32xf32> -> vector<2x32xf32>
    %c2_124 = arith.constant 2 : index
    %c0_125 = arith.constant 0 : index
    %c0_126 = arith.constant 0 : index
    %175 = vector.load %arg6[%c2_124, %c0_125, %c0_126] : memref<3x32x32xf32, #tpu.memory_space<vmem>>, vector<1x32x32xf32>
    %176 = vector.shape_cast %175 : vector<1x32x32xf32> to vector<32x32xf32>
    %cst_127 = arith.constant dense<0.000000e+00> : vector<2x32xf32>
    %177 = tpu.matmul %111, %176, %cst_127 {dimension_numbers = #tpu.dot_dimension_numbers<[1], [0], [0], [1], [0, 0, 1, 1], [], []>} : vector<2x32xf32>, vector<32x32xf32>, vector<2x32xf32> -> vector<2x32xf32>
    %c0_128 = arith.constant 0 : index
    %c0_129 = arith.constant 0 : index
    %178 = vector.load %arg8[%c0_128, %c0_129] : memref<1x32xf32, #tpu.memory_space<vmem>>, vector<1x32xf32>
    %179 = vector.broadcast %178 : vector<1x32xf32> to vector<2x32xf32>
    %180 = arith.addf %177, %179 : vector<2x32xf32>
    %181 = arith.addf %154, %171 : vector<2x32xf32>
    %182 = arith.negf %181 : vector<2x32xf32>
    %183 = math.exp %182 : vector<2x32xf32>
    %cst_130 = arith.constant 1.000000e+00 : f32
    %184 = vector.broadcast %cst_130 : f32 to vector<2x32xf32>
    %185 = arith.addf %184, %183 : vector<2x32xf32>
    %186 = arith.divf %184, %185 : vector<2x32xf32>
    %187 = arith.addf %161, %174 : vector<2x32xf32>
    %188 = arith.negf %187 : vector<2x32xf32>
    %189 = math.exp %188 : vector<2x32xf32>
    %cst_131 = arith.constant 1.000000e+00 : f32
    %190 = vector.broadcast %cst_131 : f32 to vector<2x32xf32>
    %191 = arith.addf %190, %189 : vector<2x32xf32>
    %192 = arith.divf %190, %191 : vector<2x32xf32>
    %193 = arith.mulf %186, %180 : vector<2x32xf32>
    %194 = arith.addf %168, %193 : vector<2x32xf32>
    %195 = math.tanh %194 : vector<2x32xf32>
    %cst_132 = arith.constant 1.000000e+00 : f32
    %196 = vector.broadcast %cst_132 : f32 to vector<2x32xf32>
    %197 = arith.subf %196, %192 : vector<2x32xf32>
    %198 = arith.mulf %197, %195 : vector<2x32xf32>
    %199 = arith.mulf %192, %111 : vector<2x32xf32>
    %200 = arith.addf %198, %199 : vector<2x32xf32>
    %c2_133 = arith.constant 2 : index
    %c0_134 = arith.constant 0 : index
    %201 = vector.load %arg12[%c2_133, %c0_134] : memref<16x32xf32, #tpu.memory_space<vmem>>, vector<2x32xf32>
    tpu.vector_store %arg12[%c2_133, %c0_134], %200 {strides = array<i32>} : memref<16x32xf32, #tpu.memory_space<vmem>>, vector<2x32xf32>,
    %202 = vector.extract_strided_slice %7 {offsets = [4, 0], sizes = [2, 32], strides = [1, 1]} : vector<16x32xf32> to vector<2x32xf32>
    %203 = vector.extract_strided_slice %14 {offsets = [4, 0], sizes = [2, 32], strides = [1, 1]} : vector<16x32xf32> to vector<2x32xf32>
    %204 = vector.extract_strided_slice %21 {offsets = [4, 0], sizes = [2, 32], strides = [1, 1]} : vector<16x32xf32> to vector<2x32xf32>
    %c0_135 = arith.constant 0 : index
    %c0_136 = arith.constant 0 : index
    %c0_137 = arith.constant 0 : index
    %205 = vector.load %arg2[%c0_135, %c0_136, %c0_137] : memref<3x32x32xf32, #tpu.memory_space<vmem>>, vector<1x32x32xf32>
    %206 = vector.shape_cast %205 : vector<1x32x32xf32> to vector<32x32xf32>
    %cst_138 = arith.constant dense<0.000000e+00> : vector<2x32xf32>
    %207 = tpu.matmul %147, %206, %cst_138 {dimension_numbers = #tpu.dot_dimension_numbers<[1], [0], [0], [1], [0, 0, 1, 1], [], []>} : vector<2x32xf32>, vector<32x32xf32>, vector<2x32xf32> -> vector<2x32xf32>
    %c1_139 = arith.constant 1 : index
    %c0_140 = arith.constant 0 : index
    %c0_141 = arith.constant 0 : index
    %208 = vector.load %arg2[%c1_139, %c0_140, %c0_141] : memref<3x32x32xf32, #tpu.memory_space<vmem>>, vector<1x32x32xf32>
    %209 = vector.shape_cast %208 : vector<1x32x32xf32> to vector<32x32xf32>
    %cst_142 = arith.constant dense<0.000000e+00> : vector<2x32xf32>
    %210 = tpu.matmul %147, %209, %cst_142 {dimension_numbers = #tpu.dot_dimension_numbers<[1], [0], [0], [1], [0, 0, 1, 1], [], []>} : vector<2x32xf32>, vector<32x32xf32>, vector<2x32xf32> -> vector<2x32xf32>
    %c2_143 = arith.constant 2 : index
    %c0_144 = arith.constant 0 : index
    %c0_145 = arith.constant 0 : index
    %211 = vector.load %arg2[%c2_143, %c0_144, %c0_145] : memref<3x32x32xf32, #tpu.memory_space<vmem>>, vector<1x32x32xf32>
    %212 = vector.shape_cast %211 : vector<1x32x32xf32> to vector<32x32xf32>
    %cst_146 = arith.constant dense<0.000000e+00> : vector<2x32xf32>
    %213 = tpu.matmul %147, %212, %cst_146 {dimension_numbers = #tpu.dot_dimension_numbers<[1], [0], [0], [1], [0, 0, 1, 1], [], []>} : vector<2x32xf32>, vector<32x32xf32>, vector<2x32xf32> -> vector<2x32xf32>
    %c0_147 = arith.constant 0 : index
    %c0_148 = arith.constant 0 : index
    %214 = vector.load %arg4[%c0_147, %c0_148] : memref<1x32xf32, #tpu.memory_space<vmem>>, vector<1x32xf32>
    %215 = vector.broadcast %214 : vector<1x32xf32> to vector<2x32xf32>
    %216 = arith.addf %213, %215 : vector<2x32xf32>
    %217 = arith.addf %202, %207 : vector<2x32xf32>
    %218 = arith.negf %217 : vector<2x32xf32>
    %219 = math.exp %218 : vector<2x32xf32>
    %cst_149 = arith.constant 1.000000e+00 : f32
    %220 = vector.broadcast %cst_149 : f32 to vector<2x32xf32>
    %221 = arith.addf %220, %219 : vector<2x32xf32>
    %222 = arith.divf %220, %221 : vector<2x32xf32>
    %223 = arith.addf %203, %210 : vector<2x32xf32>
    %224 = arith.negf %223 : vector<2x32xf32>
    %225 = math.exp %224 : vector<2x32xf32>
    %cst_150 = arith.constant 1.000000e+00 : f32
    %226 = vector.broadcast %cst_150 : f32 to vector<2x32xf32>
    %227 = arith.addf %226, %225 : vector<2x32xf32>
    %228 = arith.divf %226, %227 : vector<2x32xf32>
    %229 = arith.mulf %222, %216 : vector<2x32xf32>
    %230 = arith.addf %204, %229 : vector<2x32xf32>
    %231 = math.tanh %230 : vector<2x32xf32>
    %cst_151 = arith.constant 1.000000e+00 : f32
    %232 = vector.broadcast %cst_151 : f32 to vector<2x32xf32>
    %233 = arith.subf %232, %228 : vector<2x32xf32>
    %234 = arith.mulf %233, %231 : vector<2x32xf32>
    %235 = arith.mulf %228, %147 : vector<2x32xf32>
    %236 = arith.addf %234, %235 : vector<2x32xf32>
    %c0_152 = arith.constant 0 : index
    %c0_153 = arith.constant 0 : index
    %c0_154 = arith.constant 0 : index
    %237 = vector.load %arg5[%c0_152, %c0_153, %c0_154] : memref<3x32x32xf32, #tpu.memory_space<vmem>>, vector<1x32x32xf32>
    %238 = vector.shape_cast %237 : vector<1x32x32xf32> to vector<32x32xf32>
    %cst_155 = arith.constant dense<0.000000e+00> : vector<2x32xf32>
    %239 = tpu.matmul %236, %238, %cst_155 {dimension_numbers = #tpu.dot_dimension_numbers<[1], [0], [0], [1], [0, 0, 1, 1], [], []>} : vector<2x32xf32>, vector<32x32xf32>, vector<2x32xf32> -> vector<2x32xf32>
    %c0_156 = arith.constant 0 : index
    %c0_157 = arith.constant 0 : index
    %c0_158 = arith.constant 0 : index
    %240 = vector.load %arg7[%c0_156, %c0_157, %c0_158] : memref<3x1x32xf32, #tpu.memory_space<vmem>>, vector<1x1x32xf32>
    %241 = vector.shape_cast %240 : vector<1x1x32xf32> to vector<1x32xf32>
    %242 = vector.broadcast %241 : vector<1x32xf32> to vector<2x32xf32>
    %243 = arith.addf %239, %242 : vector<2x32xf32>
    %c1_159 = arith.constant 1 : index
    %c0_160 = arith.constant 0 : index
    %c0_161 = arith.constant 0 : index
    %244 = vector.load %arg5[%c1_159, %c0_160, %c0_161] : memref<3x32x32xf32, #tpu.memory_space<vmem>>, vector<1x32x32xf32>
    %245 = vector.shape_cast %244 : vector<1x32x32xf32> to vector<32x32xf32>
    %cst_162 = arith.constant dense<0.000000e+00> : vector<2x32xf32>
    %246 = tpu.matmul %236, %245, %cst_162 {dimension_numbers = #tpu.dot_dimension_numbers<[1], [0], [0], [1], [0, 0, 1, 1], [], []>} : vector<2x32xf32>, vector<32x32xf32>, vector<2x32xf32> -> vector<2x32xf32>
    %c1_163 = arith.constant 1 : index
    %c0_164 = arith.constant 0 : index
    %c0_165 = arith.constant 0 : index
    %247 = vector.load %arg7[%c1_163, %c0_164, %c0_165] : memref<3x1x32xf32, #tpu.memory_space<vmem>>, vector<1x1x32xf32>
    %248 = vector.shape_cast %247 : vector<1x1x32xf32> to vector<1x32xf32>
    %249 = vector.broadcast %248 : vector<1x32xf32> to vector<2x32xf32>
    %250 = arith.addf %246, %249 : vector<2x32xf32>
    %c2_166 = arith.constant 2 : index
    %c0_167 = arith.constant 0 : index
    %c0_168 = arith.constant 0 : index
    %251 = vector.load %arg5[%c2_166, %c0_167, %c0_168] : memref<3x32x32xf32, #tpu.memory_space<vmem>>, vector<1x32x32xf32>
    %252 = vector.shape_cast %251 : vector<1x32x32xf32> to vector<32x32xf32>
    %cst_169 = arith.constant dense<0.000000e+00> : vector<2x32xf32>
    %253 = tpu.matmul %236, %252, %cst_169 {dimension_numbers = #tpu.dot_dimension_numbers<[1], [0], [0], [1], [0, 0, 1, 1], [], []>} : vector<2x32xf32>, vector<32x32xf32>, vector<2x32xf32> -> vector<2x32xf32>
    %c2_170 = arith.constant 2 : index
    %c0_171 = arith.constant 0 : index
    %c0_172 = arith.constant 0 : index
    %254 = vector.load %arg7[%c2_170, %c0_171, %c0_172] : memref<3x1x32xf32, #tpu.memory_space<vmem>>, vector<1x1x32xf32>
    %255 = vector.shape_cast %254 : vector<1x1x32xf32> to vector<1x32xf32>
    %256 = vector.broadcast %255 : vector<1x32xf32> to vector<2x32xf32>
    %257 = arith.addf %253, %256 : vector<2x32xf32>
    %c0_173 = arith.constant 0 : index
    %c0_174 = arith.constant 0 : index
    %c0_175 = arith.constant 0 : index
    %258 = vector.load %arg6[%c0_173, %c0_174, %c0_175] : memref<3x32x32xf32, #tpu.memory_space<vmem>>, vector<1x32x32xf32>
    %259 = vector.shape_cast %258 : vector<1x32x32xf32> to vector<32x32xf32>
    %cst_176 = arith.constant dense<0.000000e+00> : vector<2x32xf32>
    %260 = tpu.matmul %200, %259, %cst_176 {dimension_numbers = #tpu.dot_dimension_numbers<[1], [0], [0], [1], [0, 0, 1, 1], [], []>} : vector<2x32xf32>, vector<32x32xf32>, vector<2x32xf32> -> vector<2x32xf32>
    %c1_177 = arith.constant 1 : index
    %c0_178 = arith.constant 0 : index
    %c0_179 = arith.constant 0 : index
    %261 = vector.load %arg6[%c1_177, %c0_178, %c0_179] : memref<3x32x32xf32, #tpu.memory_space<vmem>>, vector<1x32x32xf32>
    %262 = vector.shape_cast %261 : vector<1x32x32xf32> to vector<32x32xf32>
    %cst_180 = arith.constant dense<0.000000e+00> : vector<2x32xf32>
    %263 = tpu.matmul %200, %262, %cst_180 {dimension_numbers = #tpu.dot_dimension_numbers<[1], [0], [0], [1], [0, 0, 1, 1], [], []>} : vector<2x32xf32>, vector<32x32xf32>, vector<2x32xf32> -> vector<2x32xf32>
    %c2_181 = arith.constant 2 : index
    %c0_182 = arith.constant 0 : index
    %c0_183 = arith.constant 0 : index
    %264 = vector.load %arg6[%c2_181, %c0_182, %c0_183] : memref<3x32x32xf32, #tpu.memory_space<vmem>>, vector<1x32x32xf32>
    %265 = vector.shape_cast %264 : vector<1x32x32xf32> to vector<32x32xf32>
    %cst_184 = arith.constant dense<0.000000e+00> : vector<2x32xf32>
    %266 = tpu.matmul %200, %265, %cst_184 {dimension_numbers = #tpu.dot_dimension_numbers<[1], [0], [0], [1], [0, 0, 1, 1], [], []>} : vector<2x32xf32>, vector<32x32xf32>, vector<2x32xf32> -> vector<2x32xf32>
    %c0_185 = arith.constant 0 : index
    %c0_186 = arith.constant 0 : index
    %267 = vector.load %arg8[%c0_185, %c0_186] : memref<1x32xf32, #tpu.memory_space<vmem>>, vector<1x32xf32>
    %268 = vector.broadcast %267 : vector<1x32xf32> to vector<2x32xf32>
    %269 = arith.addf %266, %268 : vector<2x32xf32>
    %270 = arith.addf %243, %260 : vector<2x32xf32>
    %271 = arith.negf %270 : vector<2x32xf32>
    %272 = math.exp %271 : vector<2x32xf32>
    %cst_187 = arith.constant 1.000000e+00 : f32
    %273 = vector.broadcast %cst_187 : f32 to vector<2x32xf32>
    %274 = arith.addf %273, %272 : vector<2x32xf32>
    %275 = arith.divf %273, %274 : vector<2x32xf32>
    %276 = arith.addf %250, %263 : vector<2x32xf32>
    %277 = arith.negf %276 : vector<2x32xf32>
    %278 = math.exp %277 : vector<2x32xf32>
    %cst_188 = arith.constant 1.000000e+00 : f32
    %279 = vector.broadcast %cst_188 : f32 to vector<2x32xf32>
    %280 = arith.addf %279, %278 : vector<2x32xf32>
    %281 = arith.divf %279, %280 : vector<2x32xf32>
    %282 = arith.mulf %275, %269 : vector<2x32xf32>
    %283 = arith.addf %257, %282 : vector<2x32xf32>
    %284 = math.tanh %283 : vector<2x32xf32>
    %cst_189 = arith.constant 1.000000e+00 : f32
    %285 = vector.broadcast %cst_189 : f32 to vector<2x32xf32>
    %286 = arith.subf %285, %281 : vector<2x32xf32>
    %287 = arith.mulf %286, %284 : vector<2x32xf32>
    %288 = arith.mulf %281, %200 : vector<2x32xf32>
    %289 = arith.addf %287, %288 : vector<2x32xf32>
    %c4 = arith.constant 4 : index
    %c0_190 = arith.constant 0 : index
    %290 = vector.load %arg12[%c4, %c0_190] : memref<16x32xf32, #tpu.memory_space<vmem>>, vector<2x32xf32>
    tpu.vector_store %arg12[%c4, %c0_190], %289 {strides = array<i32>} : memref<16x32xf32, #tpu.memory_space<vmem>>, vector<2x32xf32>,
    %291 = vector.extract_strided_slice %7 {offsets = [6, 0], sizes = [2, 32], strides = [1, 1]} : vector<16x32xf32> to vector<2x32xf32>
    %292 = vector.extract_strided_slice %14 {offsets = [6, 0], sizes = [2, 32], strides = [1, 1]} : vector<16x32xf32> to vector<2x32xf32>
    %293 = vector.extract_strided_slice %21 {offsets = [6, 0], sizes = [2, 32], strides = [1, 1]} : vector<16x32xf32> to vector<2x32xf32>
    %c0_191 = arith.constant 0 : index
    %c0_192 = arith.constant 0 : index
    %c0_193 = arith.constant 0 : index
    %294 = vector.load %arg2[%c0_191, %c0_192, %c0_193] : memref<3x32x32xf32, #tpu.memory_space<vmem>>, vector<1x32x32xf32>
    %295 = vector.shape_cast %294 : vector<1x32x32xf32> to vector<32x32xf32>
    %cst_194 = arith.constant dense<0.000000e+00> : vector<2x32xf32>
    %296 = tpu.matmul %236, %295, %cst_194 {dimension_numbers = #tpu.dot_dimension_numbers<[1], [0], [0], [1], [0, 0, 1, 1], [], []>} : vector<2x32xf32>, vector<32x32xf32>, vector<2x32xf32> -> vector<2x32xf32>
    %c1_195 = arith.constant 1 : index
    %c0_196 = arith.constant 0 : index
    %c0_197 = arith.constant 0 : index
    %297 = vector.load %arg2[%c1_195, %c0_196, %c0_197] : memref<3x32x32xf32, #tpu.memory_space<vmem>>, vector<1x32x32xf32>
    %298 = vector.shape_cast %297 : vector<1x32x32xf32> to vector<32x32xf32>
    %cst_198 = arith.constant dense<0.000000e+00> : vector<2x32xf32>
    %299 = tpu.matmul %236, %298, %cst_198 {dimension_numbers = #tpu.dot_dimension_numbers<[1], [0], [0], [1], [0, 0, 1, 1], [], []>} : vector<2x32xf32>, vector<32x32xf32>, vector<2x32xf32> -> vector<2x32xf32>
    %c2_199 = arith.constant 2 : index
    %c0_200 = arith.constant 0 : index
    %c0_201 = arith.constant 0 : index
    %300 = vector.load %arg2[%c2_199, %c0_200, %c0_201] : memref<3x32x32xf32, #tpu.memory_space<vmem>>, vector<1x32x32xf32>
    %301 = vector.shape_cast %300 : vector<1x32x32xf32> to vector<32x32xf32>
    %cst_202 = arith.constant dense<0.000000e+00> : vector<2x32xf32>
    %302 = tpu.matmul %236, %301, %cst_202 {dimension_numbers = #tpu.dot_dimension_numbers<[1], [0], [0], [1], [0, 0, 1, 1], [], []>} : vector<2x32xf32>, vector<32x32xf32>, vector<2x32xf32> -> vector<2x32xf32>
    %c0_203 = arith.constant 0 : index
    %c0_204 = arith.constant 0 : index
    %303 = vector.load %arg4[%c0_203, %c0_204] : memref<1x32xf32, #tpu.memory_space<vmem>>, vector<1x32xf32>
    %304 = vector.broadcast %303 : vector<1x32xf32> to vector<2x32xf32>
    %305 = arith.addf %302, %304 : vector<2x32xf32>
    %306 = arith.addf %291, %296 : vector<2x32xf32>
    %307 = arith.negf %306 : vector<2x32xf32>
    %308 = math.exp %307 : vector<2x32xf32>
    %cst_205 = arith.constant 1.000000e+00 : f32
    %309 = vector.broadcast %cst_205 : f32 to vector<2x32xf32>
    %310 = arith.addf %309, %308 : vector<2x32xf32>
    %311 = arith.divf %309, %310 : vector<2x32xf32>
    %312 = arith.addf %292, %299 : vector<2x32xf32>
    %313 = arith.negf %312 : vector<2x32xf32>
    %314 = math.exp %313 : vector<2x32xf32>
    %cst_206 = arith.constant 1.000000e+00 : f32
    %315 = vector.broadcast %cst_206 : f32 to vector<2x32xf32>
    %316 = arith.addf %315, %314 : vector<2x32xf32>
    %317 = arith.divf %315, %316 : vector<2x32xf32>
    %318 = arith.mulf %311, %305 : vector<2x32xf32>
    %319 = arith.addf %293, %318 : vector<2x32xf32>
    %320 = math.tanh %319 : vector<2x32xf32>
    %cst_207 = arith.constant 1.000000e+00 : f32
    %321 = vector.broadcast %cst_207 : f32 to vector<2x32xf32>
    %322 = arith.subf %321, %317 : vector<2x32xf32>
    %323 = arith.mulf %322, %320 : vector<2x32xf32>
    %324 = arith.mulf %317, %236 : vector<2x32xf32>
    %325 = arith.addf %323, %324 : vector<2x32xf32>
    %c0_208 = arith.constant 0 : index
    %c0_209 = arith.constant 0 : index
    %c0_210 = arith.constant 0 : index
    %326 = vector.load %arg5[%c0_208, %c0_209, %c0_210] : memref<3x32x32xf32, #tpu.memory_space<vmem>>, vector<1x32x32xf32>
    %327 = vector.shape_cast %326 : vector<1x32x32xf32> to vector<32x32xf32>
    %cst_211 = arith.constant dense<0.000000e+00> : vector<2x32xf32>
    %328 = tpu.matmul %325, %327, %cst_211 {dimension_numbers = #tpu.dot_dimension_numbers<[1], [0], [0], [1], [0, 0, 1, 1], [], []>} : vector<2x32xf32>, vector<32x32xf32>, vector<2x32xf32> -> vector<2x32xf32>
    %c0_212 = arith.constant 0 : index
    %c0_213 = arith.constant 0 : index
    %c0_214 = arith.constant 0 : index
    %329 = vector.load %arg7[%c0_212, %c0_213, %c0_214] : memref<3x1x32xf32, #tpu.memory_space<vmem>>, vector<1x1x32xf32>
    %330 = vector.shape_cast %329 : vector<1x1x32xf32> to vector<1x32xf32>
    %331 = vector.broadcast %330 : vector<1x32xf32> to vector<2x32xf32>
    %332 = arith.addf %328, %331 : vector<2x32xf32>
    %c1_215 = arith.constant 1 : index
    %c0_216 = arith.constant 0 : index
    %c0_217 = arith.constant 0 : index
    %333 = vector.load %arg5[%c1_215, %c0_216, %c0_217] : memref<3x32x32xf32, #tpu.memory_space<vmem>>, vector<1x32x32xf32>
    %334 = vector.shape_cast %333 : vector<1x32x32xf32> to vector<32x32xf32>
    %cst_218 = arith.constant dense<0.000000e+00> : vector<2x32xf32>
    %335 = tpu.matmul %325, %334, %cst_218 {dimension_numbers = #tpu.dot_dimension_numbers<[1], [0], [0], [1], [0, 0, 1, 1], [], []>} : vector<2x32xf32>, vector<32x32xf32>, vector<2x32xf32> -> vector<2x32xf32>
    %c1_219 = arith.constant 1 : index
    %c0_220 = arith.constant 0 : index
    %c0_221 = arith.constant 0 : index
    %336 = vector.load %arg7[%c1_219, %c0_220, %c0_221] : memref<3x1x32xf32, #tpu.memory_space<vmem>>, vector<1x1x32xf32>
    %337 = vector.shape_cast %336 : vector<1x1x32xf32> to vector<1x32xf32>
    %338 = vector.broadcast %337 : vector<1x32xf32> to vector<2x32xf32>
    %339 = arith.addf %335, %338 : vector<2x32xf32>
    %c2_222 = arith.constant 2 : index
    %c0_223 = arith.constant 0 : index
    %c0_224 = arith.constant 0 : index
    %340 = vector.load %arg5[%c2_222, %c0_223, %c0_224] : memref<3x32x32xf32, #tpu.memory_space<vmem>>, vector<1x32x32xf32>
    %341 = vector.shape_cast %340 : vector<1x32x32xf32> to vector<32x32xf32>
    %cst_225 = arith.constant dense<0.000000e+00> : vector<2x32xf32>
    %342 = tpu.matmul %325, %341, %cst_225 {dimension_numbers = #tpu.dot_dimension_numbers<[1], [0], [0], [1], [0, 0, 1, 1], [], []>} : vector<2x32xf32>, vector<32x32xf32>, vector<2x32xf32> -> vector<2x32xf32>
    %c2_226 = arith.constant 2 : index
    %c0_227 = arith.constant 0 : index
    %c0_228 = arith.constant 0 : index
    %343 = vector.load %arg7[%c2_226, %c0_227, %c0_228] : memref<3x1x32xf32, #tpu.memory_space<vmem>>, vector<1x1x32xf32>
    %344 = vector.shape_cast %343 : vector<1x1x32xf32> to vector<1x32xf32>
    %345 = vector.broadcast %344 : vector<1x32xf32> to vector<2x32xf32>
    %346 = arith.addf %342, %345 : vector<2x32xf32>
    %c0_229 = arith.constant 0 : index
    %c0_230 = arith.constant 0 : index
    %c0_231 = arith.constant 0 : index
    %347 = vector.load %arg6[%c0_229, %c0_230, %c0_231] : memref<3x32x32xf32, #tpu.memory_space<vmem>>, vector<1x32x32xf32>
    %348 = vector.shape_cast %347 : vector<1x32x32xf32> to vector<32x32xf32>
    %cst_232 = arith.constant dense<0.000000e+00> : vector<2x32xf32>
    %349 = tpu.matmul %289, %348, %cst_232 {dimension_numbers = #tpu.dot_dimension_numbers<[1], [0], [0], [1], [0, 0, 1, 1], [], []>} : vector<2x32xf32>, vector<32x32xf32>, vector<2x32xf32> -> vector<2x32xf32>
    %c1_233 = arith.constant 1 : index
    %c0_234 = arith.constant 0 : index
    %c0_235 = arith.constant 0 : index
    %350 = vector.load %arg6[%c1_233, %c0_234, %c0_235] : memref<3x32x32xf32, #tpu.memory_space<vmem>>, vector<1x32x32xf32>
    %351 = vector.shape_cast %350 : vector<1x32x32xf32> to vector<32x32xf32>
    %cst_236 = arith.constant dense<0.000000e+00> : vector<2x32xf32>
    %352 = tpu.matmul %289, %351, %cst_236 {dimension_numbers = #tpu.dot_dimension_numbers<[1], [0], [0], [1], [0, 0, 1, 1], [], []>} : vector<2x32xf32>, vector<32x32xf32>, vector<2x32xf32> -> vector<2x32xf32>
    %c2_237 = arith.constant 2 : index
    %c0_238 = arith.constant 0 : index
    %c0_239 = arith.constant 0 : index
    %353 = vector.load %arg6[%c2_237, %c0_238, %c0_239] : memref<3x32x32xf32, #tpu.memory_space<vmem>>, vector<1x32x32xf32>
    %354 = vector.shape_cast %353 : vector<1x32x32xf32> to vector<32x32xf32>
    %cst_240 = arith.constant dense<0.000000e+00> : vector<2x32xf32>
    %355 = tpu.matmul %289, %354, %cst_240 {dimension_numbers = #tpu.dot_dimension_numbers<[1], [0], [0], [1], [0, 0, 1, 1], [], []>} : vector<2x32xf32>, vector<32x32xf32>, vector<2x32xf32> -> vector<2x32xf32>
    %c0_241 = arith.constant 0 : index
    %c0_242 = arith.constant 0 : index
    %356 = vector.load %arg8[%c0_241, %c0_242] : memref<1x32xf32, #tpu.memory_space<vmem>>, vector<1x32xf32>
    %357 = vector.broadcast %356 : vector<1x32xf32> to vector<2x32xf32>
    %358 = arith.addf %355, %357 : vector<2x32xf32>
    %359 = arith.addf %332, %349 : vector<2x32xf32>
    %360 = arith.negf %359 : vector<2x32xf32>
    %361 = math.exp %360 : vector<2x32xf32>
    %cst_243 = arith.constant 1.000000e+00 : f32
    %362 = vector.broadcast %cst_243 : f32 to vector<2x32xf32>
    %363 = arith.addf %362, %361 : vector<2x32xf32>
    %364 = arith.divf %362, %363 : vector<2x32xf32>
    %365 = arith.addf %339, %352 : vector<2x32xf32>
    %366 = arith.negf %365 : vector<2x32xf32>
    %367 = math.exp %366 : vector<2x32xf32>
    %cst_244 = arith.constant 1.000000e+00 : f32
    %368 = vector.broadcast %cst_244 : f32 to vector<2x32xf32>
    %369 = arith.addf %368, %367 : vector<2x32xf32>
    %370 = arith.divf %368, %369 : vector<2x32xf32>
    %371 = arith.mulf %364, %358 : vector<2x32xf32>
    %372 = arith.addf %346, %371 : vector<2x32xf32>
    %373 = math.tanh %372 : vector<2x32xf32>
    %cst_245 = arith.constant 1.000000e+00 : f32
    %374 = vector.broadcast %cst_245 : f32 to vector<2x32xf32>
    %375 = arith.subf %374, %370 : vector<2x32xf32>
    %376 = arith.mulf %375, %373 : vector<2x32xf32>
    %377 = arith.mulf %370, %289 : vector<2x32xf32>
    %378 = arith.addf %376, %377 : vector<2x32xf32>
    %c6 = arith.constant 6 : index
    %c0_246 = arith.constant 0 : index
    %379 = vector.load %arg12[%c6, %c0_246] : memref<16x32xf32, #tpu.memory_space<vmem>>, vector<2x32xf32>
    tpu.vector_store %arg12[%c6, %c0_246], %378 {strides = array<i32>} : memref<16x32xf32, #tpu.memory_space<vmem>>, vector<2x32xf32>,
    %380 = vector.extract_strided_slice %7 {offsets = [8, 0], sizes = [2, 32], strides = [1, 1]} : vector<16x32xf32> to vector<2x32xf32>
    %381 = vector.extract_strided_slice %14 {offsets = [8, 0], sizes = [2, 32], strides = [1, 1]} : vector<16x32xf32> to vector<2x32xf32>
    %382 = vector.extract_strided_slice %21 {offsets = [8, 0], sizes = [2, 32], strides = [1, 1]} : vector<16x32xf32> to vector<2x32xf32>
    %c0_247 = arith.constant 0 : index
    %c0_248 = arith.constant 0 : index
    %c0_249 = arith.constant 0 : index
    %383 = vector.load %arg2[%c0_247, %c0_248, %c0_249] : memref<3x32x32xf32, #tpu.memory_space<vmem>>, vector<1x32x32xf32>
    %384 = vector.shape_cast %383 : vector<1x32x32xf32> to vector<32x32xf32>
    %cst_250 = arith.constant dense<0.000000e+00> : vector<2x32xf32>
    %385 = tpu.matmul %325, %384, %cst_250 {dimension_numbers = #tpu.dot_dimension_numbers<[1], [0], [0], [1], [0, 0, 1, 1], [], []>} : vector<2x32xf32>, vector<32x32xf32>, vector<2x32xf32> -> vector<2x32xf32>
    %c1_251 = arith.constant 1 : index
    %c0_252 = arith.constant 0 : index
    %c0_253 = arith.constant 0 : index
    %386 = vector.load %arg2[%c1_251, %c0_252, %c0_253] : memref<3x32x32xf32, #tpu.memory_space<vmem>>, vector<1x32x32xf32>
    %387 = vector.shape_cast %386 : vector<1x32x32xf32> to vector<32x32xf32>
    %cst_254 = arith.constant dense<0.000000e+00> : vector<2x32xf32>
    %388 = tpu.matmul %325, %387, %cst_254 {dimension_numbers = #tpu.dot_dimension_numbers<[1], [0], [0], [1], [0, 0, 1, 1], [], []>} : vector<2x32xf32>, vector<32x32xf32>, vector<2x32xf32> -> vector<2x32xf32>
    %c2_255 = arith.constant 2 : index
    %c0_256 = arith.constant 0 : index
    %c0_257 = arith.constant 0 : index
    %389 = vector.load %arg2[%c2_255, %c0_256, %c0_257] : memref<3x32x32xf32, #tpu.memory_space<vmem>>, vector<1x32x32xf32>
    %390 = vector.shape_cast %389 : vector<1x32x32xf32> to vector<32x32xf32>
    %cst_258 = arith.constant dense<0.000000e+00> : vector<2x32xf32>
    %391 = tpu.matmul %325, %390, %cst_258 {dimension_numbers = #tpu.dot_dimension_numbers<[1], [0], [0], [1], [0, 0, 1, 1], [], []>} : vector<2x32xf32>, vector<32x32xf32>, vector<2x32xf32> -> vector<2x32xf32>
    %c0_259 = arith.constant 0 : index
    %c0_260 = arith.constant 0 : index
    %392 = vector.load %arg4[%c0_259, %c0_260] : memref<1x32xf32, #tpu.memory_space<vmem>>, vector<1x32xf32>
    %393 = vector.broadcast %392 : vector<1x32xf32> to vector<2x32xf32>
    %394 = arith.addf %391, %393 : vector<2x32xf32>
    %395 = arith.addf %380, %385 : vector<2x32xf32>
    %396 = arith.negf %395 : vector<2x32xf32>
    %397 = math.exp %396 : vector<2x32xf32>
    %cst_261 = arith.constant 1.000000e+00 : f32
    %398 = vector.broadcast %cst_261 : f32 to vector<2x32xf32>
    %399 = arith.addf %398, %397 : vector<2x32xf32>
    %400 = arith.divf %398, %399 : vector<2x32xf32>
    %401 = arith.addf %381, %388 : vector<2x32xf32>
    %402 = arith.negf %401 : vector<2x32xf32>
    %403 = math.exp %402 : vector<2x32xf32>
    %cst_262 = arith.constant 1.000000e+00 : f32
    %404 = vector.broadcast %cst_262 : f32 to vector<2x32xf32>
    %405 = arith.addf %404, %403 : vector<2x32xf32>
    %406 = arith.divf %404, %405 : vector<2x32xf32>
    %407 = arith.mulf %400, %394 : vector<2x32xf32>
    %408 = arith.addf %382, %407 : vector<2x32xf32>
    %409 = math.tanh %408 : vector<2x32xf32>
    %cst_263 = arith.constant 1.000000e+00 : f32
    %410 = vector.broadcast %cst_263 : f32 to vector<2x32xf32>
    %411 = arith.subf %410, %406 : vector<2x32xf32>
    %412 = arith.mulf %411, %409 : vector<2x32xf32>
    %413 = arith.mulf %406, %325 : vector<2x32xf32>
    %414 = arith.addf %412, %413 : vector<2x32xf32>
    %c0_264 = arith.constant 0 : index
    %c0_265 = arith.constant 0 : index
    %c0_266 = arith.constant 0 : index
    %415 = vector.load %arg5[%c0_264, %c0_265, %c0_266] : memref<3x32x32xf32, #tpu.memory_space<vmem>>, vector<1x32x32xf32>
    %416 = vector.shape_cast %415 : vector<1x32x32xf32> to vector<32x32xf32>
    %cst_267 = arith.constant dense<0.000000e+00> : vector<2x32xf32>
    %417 = tpu.matmul %414, %416, %cst_267 {dimension_numbers = #tpu.dot_dimension_numbers<[1], [0], [0], [1], [0, 0, 1, 1], [], []>} : vector<2x32xf32>, vector<32x32xf32>, vector<2x32xf32> -> vector<2x32xf32>
    %c0_268 = arith.constant 0 : index
    %c0_269 = arith.constant 0 : index
    %c0_270 = arith.constant 0 : index
    %418 = vector.load %arg7[%c0_268, %c0_269, %c0_270] : memref<3x1x32xf32, #tpu.memory_space<vmem>>, vector<1x1x32xf32>
    %419 = vector.shape_cast %418 : vector<1x1x32xf32> to vector<1x32xf32>
    %420 = vector.broadcast %419 : vector<1x32xf32> to vector<2x32xf32>
    %421 = arith.addf %417, %420 : vector<2x32xf32>
    %c1_271 = arith.constant 1 : index
    %c0_272 = arith.constant 0 : index
    %c0_273 = arith.constant 0 : index
    %422 = vector.load %arg5[%c1_271, %c0_272, %c0_273] : memref<3x32x32xf32, #tpu.memory_space<vmem>>, vector<1x32x32xf32>
    %423 = vector.shape_cast %422 : vector<1x32x32xf32> to vector<32x32xf32>
    %cst_274 = arith.constant dense<0.000000e+00> : vector<2x32xf32>
    %424 = tpu.matmul %414, %423, %cst_274 {dimension_numbers = #tpu.dot_dimension_numbers<[1], [0], [0], [1], [0, 0, 1, 1], [], []>} : vector<2x32xf32>, vector<32x32xf32>, vector<2x32xf32> -> vector<2x32xf32>
    %c1_275 = arith.constant 1 : index
    %c0_276 = arith.constant 0 : index
    %c0_277 = arith.constant 0 : index
    %425 = vector.load %arg7[%c1_275, %c0_276, %c0_277] : memref<3x1x32xf32, #tpu.memory_space<vmem>>, vector<1x1x32xf32>
    %426 = vector.shape_cast %425 : vector<1x1x32xf32> to vector<1x32xf32>
    %427 = vector.broadcast %426 : vector<1x32xf32> to vector<2x32xf32>
    %428 = arith.addf %424, %427 : vector<2x32xf32>
    %c2_278 = arith.constant 2 : index
    %c0_279 = arith.constant 0 : index
    %c0_280 = arith.constant 0 : index
    %429 = vector.load %arg5[%c2_278, %c0_279, %c0_280] : memref<3x32x32xf32, #tpu.memory_space<vmem>>, vector<1x32x32xf32>
    %430 = vector.shape_cast %429 : vector<1x32x32xf32> to vector<32x32xf32>
    %cst_281 = arith.constant dense<0.000000e+00> : vector<2x32xf32>
    %431 = tpu.matmul %414, %430, %cst_281 {dimension_numbers = #tpu.dot_dimension_numbers<[1], [0], [0], [1], [0, 0, 1, 1], [], []>} : vector<2x32xf32>, vector<32x32xf32>, vector<2x32xf32> -> vector<2x32xf32>
    %c2_282 = arith.constant 2 : index
    %c0_283 = arith.constant 0 : index
    %c0_284 = arith.constant 0 : index
    %432 = vector.load %arg7[%c2_282, %c0_283, %c0_284] : memref<3x1x32xf32, #tpu.memory_space<vmem>>, vector<1x1x32xf32>
    %433 = vector.shape_cast %432 : vector<1x1x32xf32> to vector<1x32xf32>
    %434 = vector.broadcast %433 : vector<1x32xf32> to vector<2x32xf32>
    %435 = arith.addf %431, %434 : vector<2x32xf32>
    %c0_285 = arith.constant 0 : index
    %c0_286 = arith.constant 0 : index
    %c0_287 = arith.constant 0 : index
    %436 = vector.load %arg6[%c0_285, %c0_286, %c0_287] : memref<3x32x32xf32, #tpu.memory_space<vmem>>, vector<1x32x32xf32>
    %437 = vector.shape_cast %436 : vector<1x32x32xf32> to vector<32x32xf32>
    %cst_288 = arith.constant dense<0.000000e+00> : vector<2x32xf32>
    %438 = tpu.matmul %378, %437, %cst_288 {dimension_numbers = #tpu.dot_dimension_numbers<[1], [0], [0], [1], [0, 0, 1, 1], [], []>} : vector<2x32xf32>, vector<32x32xf32>, vector<2x32xf32> -> vector<2x32xf32>
    %c1_289 = arith.constant 1 : index
    %c0_290 = arith.constant 0 : index
    %c0_291 = arith.constant 0 : index
    %439 = vector.load %arg6[%c1_289, %c0_290, %c0_291] : memref<3x32x32xf32, #tpu.memory_space<vmem>>, vector<1x32x32xf32>
    %440 = vector.shape_cast %439 : vector<1x32x32xf32> to vector<32x32xf32>
    %cst_292 = arith.constant dense<0.000000e+00> : vector<2x32xf32>
    %441 = tpu.matmul %378, %440, %cst_292 {dimension_numbers = #tpu.dot_dimension_numbers<[1], [0], [0], [1], [0, 0, 1, 1], [], []>} : vector<2x32xf32>, vector<32x32xf32>, vector<2x32xf32> -> vector<2x32xf32>
    %c2_293 = arith.constant 2 : index
    %c0_294 = arith.constant 0 : index
    %c0_295 = arith.constant 0 : index
    %442 = vector.load %arg6[%c2_293, %c0_294, %c0_295] : memref<3x32x32xf32, #tpu.memory_space<vmem>>, vector<1x32x32xf32>
    %443 = vector.shape_cast %442 : vector<1x32x32xf32> to vector<32x32xf32>
    %cst_296 = arith.constant dense<0.000000e+00> : vector<2x32xf32>
    %444 = tpu.matmul %378, %443, %cst_296 {dimension_numbers = #tpu.dot_dimension_numbers<[1], [0], [0], [1], [0, 0, 1, 1], [], []>} : vector<2x32xf32>, vector<32x32xf32>, vector<2x32xf32> -> vector<2x32xf32>
    %c0_297 = arith.constant 0 : index
    %c0_298 = arith.constant 0 : index
    %445 = vector.load %arg8[%c0_297, %c0_298] : memref<1x32xf32, #tpu.memory_space<vmem>>, vector<1x32xf32>
    %446 = vector.broadcast %445 : vector<1x32xf32> to vector<2x32xf32>
    %447 = arith.addf %444, %446 : vector<2x32xf32>
    %448 = arith.addf %421, %438 : vector<2x32xf32>
    %449 = arith.negf %448 : vector<2x32xf32>
    %450 = math.exp %449 : vector<2x32xf32>
    %cst_299 = arith.constant 1.000000e+00 : f32
    %451 = vector.broadcast %cst_299 : f32 to vector<2x32xf32>
    %452 = arith.addf %451, %450 : vector<2x32xf32>
    %453 = arith.divf %451, %452 : vector<2x32xf32>
    %454 = arith.addf %428, %441 : vector<2x32xf32>
    %455 = arith.negf %454 : vector<2x32xf32>
    %456 = math.exp %455 : vector<2x32xf32>
    %cst_300 = arith.constant 1.000000e+00 : f32
    %457 = vector.broadcast %cst_300 : f32 to vector<2x32xf32>
    %458 = arith.addf %457, %456 : vector<2x32xf32>
    %459 = arith.divf %457, %458 : vector<2x32xf32>
    %460 = arith.mulf %453, %447 : vector<2x32xf32>
    %461 = arith.addf %435, %460 : vector<2x32xf32>
    %462 = math.tanh %461 : vector<2x32xf32>
    %cst_301 = arith.constant 1.000000e+00 : f32
    %463 = vector.broadcast %cst_301 : f32 to vector<2x32xf32>
    %464 = arith.subf %463, %459 : vector<2x32xf32>
    %465 = arith.mulf %464, %462 : vector<2x32xf32>
    %466 = arith.mulf %459, %378 : vector<2x32xf32>
    %467 = arith.addf %465, %466 : vector<2x32xf32>
    %c8 = arith.constant 8 : index
    %c0_302 = arith.constant 0 : index
    %468 = vector.load %arg12[%c8, %c0_302] : memref<16x32xf32, #tpu.memory_space<vmem>>, vector<2x32xf32>
    tpu.vector_store %arg12[%c8, %c0_302], %467 {strides = array<i32>} : memref<16x32xf32, #tpu.memory_space<vmem>>, vector<2x32xf32>,
    %469 = vector.extract_strided_slice %7 {offsets = [10, 0], sizes = [2, 32], strides = [1, 1]} : vector<16x32xf32> to vector<2x32xf32>
    %470 = vector.extract_strided_slice %14 {offsets = [10, 0], sizes = [2, 32], strides = [1, 1]} : vector<16x32xf32> to vector<2x32xf32>
    %471 = vector.extract_strided_slice %21 {offsets = [10, 0], sizes = [2, 32], strides = [1, 1]} : vector<16x32xf32> to vector<2x32xf32>
    %c0_303 = arith.constant 0 : index
    %c0_304 = arith.constant 0 : index
    %c0_305 = arith.constant 0 : index
    %472 = vector.load %arg2[%c0_303, %c0_304, %c0_305] : memref<3x32x32xf32, #tpu.memory_space<vmem>>, vector<1x32x32xf32>
    %473 = vector.shape_cast %472 : vector<1x32x32xf32> to vector<32x32xf32>
    %cst_306 = arith.constant dense<0.000000e+00> : vector<2x32xf32>
    %474 = tpu.matmul %414, %473, %cst_306 {dimension_numbers = #tpu.dot_dimension_numbers<[1], [0], [0], [1], [0, 0, 1, 1], [], []>} : vector<2x32xf32>, vector<32x32xf32>, vector<2x32xf32> -> vector<2x32xf32>
    %c1_307 = arith.constant 1 : index
    %c0_308 = arith.constant 0 : index
    %c0_309 = arith.constant 0 : index
    %475 = vector.load %arg2[%c1_307, %c0_308, %c0_309] : memref<3x32x32xf32, #tpu.memory_space<vmem>>, vector<1x32x32xf32>
    %476 = vector.shape_cast %475 : vector<1x32x32xf32> to vector<32x32xf32>
    %cst_310 = arith.constant dense<0.000000e+00> : vector<2x32xf32>
    %477 = tpu.matmul %414, %476, %cst_310 {dimension_numbers = #tpu.dot_dimension_numbers<[1], [0], [0], [1], [0, 0, 1, 1], [], []>} : vector<2x32xf32>, vector<32x32xf32>, vector<2x32xf32> -> vector<2x32xf32>
    %c2_311 = arith.constant 2 : index
    %c0_312 = arith.constant 0 : index
    %c0_313 = arith.constant 0 : index
    %478 = vector.load %arg2[%c2_311, %c0_312, %c0_313] : memref<3x32x32xf32, #tpu.memory_space<vmem>>, vector<1x32x32xf32>
    %479 = vector.shape_cast %478 : vector<1x32x32xf32> to vector<32x32xf32>
    %cst_314 = arith.constant dense<0.000000e+00> : vector<2x32xf32>
    %480 = tpu.matmul %414, %479, %cst_314 {dimension_numbers = #tpu.dot_dimension_numbers<[1], [0], [0], [1], [0, 0, 1, 1], [], []>} : vector<2x32xf32>, vector<32x32xf32>, vector<2x32xf32> -> vector<2x32xf32>
    %c0_315 = arith.constant 0 : index
    %c0_316 = arith.constant 0 : index
    %481 = vector.load %arg4[%c0_315, %c0_316] : memref<1x32xf32, #tpu.memory_space<vmem>>, vector<1x32xf32>
    %482 = vector.broadcast %481 : vector<1x32xf32> to vector<2x32xf32>
    %483 = arith.addf %480, %482 : vector<2x32xf32>
    %484 = arith.addf %469, %474 : vector<2x32xf32>
    %485 = arith.negf %484 : vector<2x32xf32>
    %486 = math.exp %485 : vector<2x32xf32>
    %cst_317 = arith.constant 1.000000e+00 : f32
    %487 = vector.broadcast %cst_317 : f32 to vector<2x32xf32>
    %488 = arith.addf %487, %486 : vector<2x32xf32>
    %489 = arith.divf %487, %488 : vector<2x32xf32>
    %490 = arith.addf %470, %477 : vector<2x32xf32>
    %491 = arith.negf %490 : vector<2x32xf32>
    %492 = math.exp %491 : vector<2x32xf32>
    %cst_318 = arith.constant 1.000000e+00 : f32
    %493 = vector.broadcast %cst_318 : f32 to vector<2x32xf32>
    %494 = arith.addf %493, %492 : vector<2x32xf32>
    %495 = arith.divf %493, %494 : vector<2x32xf32>
    %496 = arith.mulf %489, %483 : vector<2x32xf32>
    %497 = arith.addf %471, %496 : vector<2x32xf32>
    %498 = math.tanh %497 : vector<2x32xf32>
    %cst_319 = arith.constant 1.000000e+00 : f32
    %499 = vector.broadcast %cst_319 : f32 to vector<2x32xf32>
    %500 = arith.subf %499, %495 : vector<2x32xf32>
    %501 = arith.mulf %500, %498 : vector<2x32xf32>
    %502 = arith.mulf %495, %414 : vector<2x32xf32>
    %503 = arith.addf %501, %502 : vector<2x32xf32>
    %c0_320 = arith.constant 0 : index
    %c0_321 = arith.constant 0 : index
    %c0_322 = arith.constant 0 : index
    %504 = vector.load %arg5[%c0_320, %c0_321, %c0_322] : memref<3x32x32xf32, #tpu.memory_space<vmem>>, vector<1x32x32xf32>
    %505 = vector.shape_cast %504 : vector<1x32x32xf32> to vector<32x32xf32>
    %cst_323 = arith.constant dense<0.000000e+00> : vector<2x32xf32>
    %506 = tpu.matmul %503, %505, %cst_323 {dimension_numbers = #tpu.dot_dimension_numbers<[1], [0], [0], [1], [0, 0, 1, 1], [], []>} : vector<2x32xf32>, vector<32x32xf32>, vector<2x32xf32> -> vector<2x32xf32>
    %c0_324 = arith.constant 0 : index
    %c0_325 = arith.constant 0 : index
    %c0_326 = arith.constant 0 : index
    %507 = vector.load %arg7[%c0_324, %c0_325, %c0_326] : memref<3x1x32xf32, #tpu.memory_space<vmem>>, vector<1x1x32xf32>
    %508 = vector.shape_cast %507 : vector<1x1x32xf32> to vector<1x32xf32>
    %509 = vector.broadcast %508 : vector<1x32xf32> to vector<2x32xf32>
    %510 = arith.addf %506, %509 : vector<2x32xf32>
    %c1_327 = arith.constant 1 : index
    %c0_328 = arith.constant 0 : index
    %c0_329 = arith.constant 0 : index
    %511 = vector.load %arg5[%c1_327, %c0_328, %c0_329] : memref<3x32x32xf32, #tpu.memory_space<vmem>>, vector<1x32x32xf32>
    %512 = vector.shape_cast %511 : vector<1x32x32xf32> to vector<32x32xf32>
    %cst_330 = arith.constant dense<0.000000e+00> : vector<2x32xf32>
    %513 = tpu.matmul %503, %512, %cst_330 {dimension_numbers = #tpu.dot_dimension_numbers<[1], [0], [0], [1], [0, 0, 1, 1], [], []>} : vector<2x32xf32>, vector<32x32xf32>, vector<2x32xf32> -> vector<2x32xf32>
    %c1_331 = arith.constant 1 : index
    %c0_332 = arith.constant 0 : index
    %c0_333 = arith.constant 0 : index
    %514 = vector.load %arg7[%c1_331, %c0_332, %c0_333] : memref<3x1x32xf32, #tpu.memory_space<vmem>>, vector<1x1x32xf32>
    %515 = vector.shape_cast %514 : vector<1x1x32xf32> to vector<1x32xf32>
    %516 = vector.broadcast %515 : vector<1x32xf32> to vector<2x32xf32>
    %517 = arith.addf %513, %516 : vector<2x32xf32>
    %c2_334 = arith.constant 2 : index
    %c0_335 = arith.constant 0 : index
    %c0_336 = arith.constant 0 : index
    %518 = vector.load %arg5[%c2_334, %c0_335, %c0_336] : memref<3x32x32xf32, #tpu.memory_space<vmem>>, vector<1x32x32xf32>
    %519 = vector.shape_cast %518 : vector<1x32x32xf32> to vector<32x32xf32>
    %cst_337 = arith.constant dense<0.000000e+00> : vector<2x32xf32>
    %520 = tpu.matmul %503, %519, %cst_337 {dimension_numbers = #tpu.dot_dimension_numbers<[1], [0], [0], [1], [0, 0, 1, 1], [], []>} : vector<2x32xf32>, vector<32x32xf32>, vector<2x32xf32> -> vector<2x32xf32>
    %c2_338 = arith.constant 2 : index
    %c0_339 = arith.constant 0 : index
    %c0_340 = arith.constant 0 : index
    %521 = vector.load %arg7[%c2_338, %c0_339, %c0_340] : memref<3x1x32xf32, #tpu.memory_space<vmem>>, vector<1x1x32xf32>
    %522 = vector.shape_cast %521 : vector<1x1x32xf32> to vector<1x32xf32>
    %523 = vector.broadcast %522 : vector<1x32xf32> to vector<2x32xf32>
    %524 = arith.addf %520, %523 : vector<2x32xf32>
    %c0_341 = arith.constant 0 : index
    %c0_342 = arith.constant 0 : index
    %c0_343 = arith.constant 0 : index
    %525 = vector.load %arg6[%c0_341, %c0_342, %c0_343] : memref<3x32x32xf32, #tpu.memory_space<vmem>>, vector<1x32x32xf32>
    %526 = vector.shape_cast %525 : vector<1x32x32xf32> to vector<32x32xf32>
    %cst_344 = arith.constant dense<0.000000e+00> : vector<2x32xf32>
    %527 = tpu.matmul %467, %526, %cst_344 {dimension_numbers = #tpu.dot_dimension_numbers<[1], [0], [0], [1], [0, 0, 1, 1], [], []>} : vector<2x32xf32>, vector<32x32xf32>, vector<2x32xf32> -> vector<2x32xf32>
    %c1_345 = arith.constant 1 : index
    %c0_346 = arith.constant 0 : index
    %c0_347 = arith.constant 0 : index
    %528 = vector.load %arg6[%c1_345, %c0_346, %c0_347] : memref<3x32x32xf32, #tpu.memory_space<vmem>>, vector<1x32x32xf32>
    %529 = vector.shape_cast %528 : vector<1x32x32xf32> to vector<32x32xf32>
    %cst_348 = arith.constant dense<0.000000e+00> : vector<2x32xf32>
    %530 = tpu.matmul %467, %529, %cst_348 {dimension_numbers = #tpu.dot_dimension_numbers<[1], [0], [0], [1], [0, 0, 1, 1], [], []>} : vector<2x32xf32>, vector<32x32xf32>, vector<2x32xf32> -> vector<2x32xf32>
    %c2_349 = arith.constant 2 : index
    %c0_350 = arith.constant 0 : index
    %c0_351 = arith.constant 0 : index
    %531 = vector.load %arg6[%c2_349, %c0_350, %c0_351] : memref<3x32x32xf32, #tpu.memory_space<vmem>>, vector<1x32x32xf32>
    %532 = vector.shape_cast %531 : vector<1x32x32xf32> to vector<32x32xf32>
    %cst_352 = arith.constant dense<0.000000e+00> : vector<2x32xf32>
    %533 = tpu.matmul %467, %532, %cst_352 {dimension_numbers = #tpu.dot_dimension_numbers<[1], [0], [0], [1], [0, 0, 1, 1], [], []>} : vector<2x32xf32>, vector<32x32xf32>, vector<2x32xf32> -> vector<2x32xf32>
    %c0_353 = arith.constant 0 : index
    %c0_354 = arith.constant 0 : index
    %534 = vector.load %arg8[%c0_353, %c0_354] : memref<1x32xf32, #tpu.memory_space<vmem>>, vector<1x32xf32>
    %535 = vector.broadcast %534 : vector<1x32xf32> to vector<2x32xf32>
    %536 = arith.addf %533, %535 : vector<2x32xf32>
    %537 = arith.addf %510, %527 : vector<2x32xf32>
    %538 = arith.negf %537 : vector<2x32xf32>
    %539 = math.exp %538 : vector<2x32xf32>
    %cst_355 = arith.constant 1.000000e+00 : f32
    %540 = vector.broadcast %cst_355 : f32 to vector<2x32xf32>
    %541 = arith.addf %540, %539 : vector<2x32xf32>
    %542 = arith.divf %540, %541 : vector<2x32xf32>
    %543 = arith.addf %517, %530 : vector<2x32xf32>
    %544 = arith.negf %543 : vector<2x32xf32>
    %545 = math.exp %544 : vector<2x32xf32>
    %cst_356 = arith.constant 1.000000e+00 : f32
    %546 = vector.broadcast %cst_356 : f32 to vector<2x32xf32>
    %547 = arith.addf %546, %545 : vector<2x32xf32>
    %548 = arith.divf %546, %547 : vector<2x32xf32>
    %549 = arith.mulf %542, %536 : vector<2x32xf32>
    %550 = arith.addf %524, %549 : vector<2x32xf32>
    %551 = math.tanh %550 : vector<2x32xf32>
    %cst_357 = arith.constant 1.000000e+00 : f32
    %552 = vector.broadcast %cst_357 : f32 to vector<2x32xf32>
    %553 = arith.subf %552, %548 : vector<2x32xf32>
    %554 = arith.mulf %553, %551 : vector<2x32xf32>
    %555 = arith.mulf %548, %467 : vector<2x32xf32>
    %556 = arith.addf %554, %555 : vector<2x32xf32>
    %c10 = arith.constant 10 : index
    %c0_358 = arith.constant 0 : index
    %557 = vector.load %arg12[%c10, %c0_358] : memref<16x32xf32, #tpu.memory_space<vmem>>, vector<2x32xf32>
    tpu.vector_store %arg12[%c10, %c0_358], %556 {strides = array<i32>} : memref<16x32xf32, #tpu.memory_space<vmem>>, vector<2x32xf32>,
    %558 = vector.extract_strided_slice %7 {offsets = [12, 0], sizes = [2, 32], strides = [1, 1]} : vector<16x32xf32> to vector<2x32xf32>
    %559 = vector.extract_strided_slice %14 {offsets = [12, 0], sizes = [2, 32], strides = [1, 1]} : vector<16x32xf32> to vector<2x32xf32>
    %560 = vector.extract_strided_slice %21 {offsets = [12, 0], sizes = [2, 32], strides = [1, 1]} : vector<16x32xf32> to vector<2x32xf32>
    %c0_359 = arith.constant 0 : index
    %c0_360 = arith.constant 0 : index
    %c0_361 = arith.constant 0 : index
    %561 = vector.load %arg2[%c0_359, %c0_360, %c0_361] : memref<3x32x32xf32, #tpu.memory_space<vmem>>, vector<1x32x32xf32>
    %562 = vector.shape_cast %561 : vector<1x32x32xf32> to vector<32x32xf32>
    %cst_362 = arith.constant dense<0.000000e+00> : vector<2x32xf32>
    %563 = tpu.matmul %503, %562, %cst_362 {dimension_numbers = #tpu.dot_dimension_numbers<[1], [0], [0], [1], [0, 0, 1, 1], [], []>} : vector<2x32xf32>, vector<32x32xf32>, vector<2x32xf32> -> vector<2x32xf32>
    %c1_363 = arith.constant 1 : index
    %c0_364 = arith.constant 0 : index
    %c0_365 = arith.constant 0 : index
    %564 = vector.load %arg2[%c1_363, %c0_364, %c0_365] : memref<3x32x32xf32, #tpu.memory_space<vmem>>, vector<1x32x32xf32>
    %565 = vector.shape_cast %564 : vector<1x32x32xf32> to vector<32x32xf32>
    %cst_366 = arith.constant dense<0.000000e+00> : vector<2x32xf32>
    %566 = tpu.matmul %503, %565, %cst_366 {dimension_numbers = #tpu.dot_dimension_numbers<[1], [0], [0], [1], [0, 0, 1, 1], [], []>} : vector<2x32xf32>, vector<32x32xf32>, vector<2x32xf32> -> vector<2x32xf32>
    %c2_367 = arith.constant 2 : index
    %c0_368 = arith.constant 0 : index
    %c0_369 = arith.constant 0 : index
    %567 = vector.load %arg2[%c2_367, %c0_368, %c0_369] : memref<3x32x32xf32, #tpu.memory_space<vmem>>, vector<1x32x32xf32>
    %568 = vector.shape_cast %567 : vector<1x32x32xf32> to vector<32x32xf32>
    %cst_370 = arith.constant dense<0.000000e+00> : vector<2x32xf32>
    %569 = tpu.matmul %503, %568, %cst_370 {dimension_numbers = #tpu.dot_dimension_numbers<[1], [0], [0], [1], [0, 0, 1, 1], [], []>} : vector<2x32xf32>, vector<32x32xf32>, vector<2x32xf32> -> vector<2x32xf32>
    %c0_371 = arith.constant 0 : index
    %c0_372 = arith.constant 0 : index
    %570 = vector.load %arg4[%c0_371, %c0_372] : memref<1x32xf32, #tpu.memory_space<vmem>>, vector<1x32xf32>
    %571 = vector.broadcast %570 : vector<1x32xf32> to vector<2x32xf32>
    %572 = arith.addf %569, %571 : vector<2x32xf32>
    %573 = arith.addf %558, %563 : vector<2x32xf32>
    %574 = arith.negf %573 : vector<2x32xf32>
    %575 = math.exp %574 : vector<2x32xf32>
    %cst_373 = arith.constant 1.000000e+00 : f32
    %576 = vector.broadcast %cst_373 : f32 to vector<2x32xf32>
    %577 = arith.addf %576, %575 : vector<2x32xf32>
    %578 = arith.divf %576, %577 : vector<2x32xf32>
    %579 = arith.addf %559, %566 : vector<2x32xf32>
    %580 = arith.negf %579 : vector<2x32xf32>
    %581 = math.exp %580 : vector<2x32xf32>
    %cst_374 = arith.constant 1.000000e+00 : f32
    %582 = vector.broadcast %cst_374 : f32 to vector<2x32xf32>
    %583 = arith.addf %582, %581 : vector<2x32xf32>
    %584 = arith.divf %582, %583 : vector<2x32xf32>
    %585 = arith.mulf %578, %572 : vector<2x32xf32>
    %586 = arith.addf %560, %585 : vector<2x32xf32>
    %587 = math.tanh %586 : vector<2x32xf32>
    %cst_375 = arith.constant 1.000000e+00 : f32
    %588 = vector.broadcast %cst_375 : f32 to vector<2x32xf32>
    %589 = arith.subf %588, %584 : vector<2x32xf32>
    %590 = arith.mulf %589, %587 : vector<2x32xf32>
    %591 = arith.mulf %584, %503 : vector<2x32xf32>
    %592 = arith.addf %590, %591 : vector<2x32xf32>
    %c0_376 = arith.constant 0 : index
    %c0_377 = arith.constant 0 : index
    %c0_378 = arith.constant 0 : index
    %593 = vector.load %arg5[%c0_376, %c0_377, %c0_378] : memref<3x32x32xf32, #tpu.memory_space<vmem>>, vector<1x32x32xf32>
    %594 = vector.shape_cast %593 : vector<1x32x32xf32> to vector<32x32xf32>
    %cst_379 = arith.constant dense<0.000000e+00> : vector<2x32xf32>
    %595 = tpu.matmul %592, %594, %cst_379 {dimension_numbers = #tpu.dot_dimension_numbers<[1], [0], [0], [1], [0, 0, 1, 1], [], []>} : vector<2x32xf32>, vector<32x32xf32>, vector<2x32xf32> -> vector<2x32xf32>
    %c0_380 = arith.constant 0 : index
    %c0_381 = arith.constant 0 : index
    %c0_382 = arith.constant 0 : index
    %596 = vector.load %arg7[%c0_380, %c0_381, %c0_382] : memref<3x1x32xf32, #tpu.memory_space<vmem>>, vector<1x1x32xf32>
    %597 = vector.shape_cast %596 : vector<1x1x32xf32> to vector<1x32xf32>
    %598 = vector.broadcast %597 : vector<1x32xf32> to vector<2x32xf32>
    %599 = arith.addf %595, %598 : vector<2x32xf32>
    %c1_383 = arith.constant 1 : index
    %c0_384 = arith.constant 0 : index
    %c0_385 = arith.constant 0 : index
    %600 = vector.load %arg5[%c1_383, %c0_384, %c0_385] : memref<3x32x32xf32, #tpu.memory_space<vmem>>, vector<1x32x32xf32>
    %601 = vector.shape_cast %600 : vector<1x32x32xf32> to vector<32x32xf32>
    %cst_386 = arith.constant dense<0.000000e+00> : vector<2x32xf32>
    %602 = tpu.matmul %592, %601, %cst_386 {dimension_numbers = #tpu.dot_dimension_numbers<[1], [0], [0], [1], [0, 0, 1, 1], [], []>} : vector<2x32xf32>, vector<32x32xf32>, vector<2x32xf32> -> vector<2x32xf32>
    %c1_387 = arith.constant 1 : index
    %c0_388 = arith.constant 0 : index
    %c0_389 = arith.constant 0 : index
    %603 = vector.load %arg7[%c1_387, %c0_388, %c0_389] : memref<3x1x32xf32, #tpu.memory_space<vmem>>, vector<1x1x32xf32>
    %604 = vector.shape_cast %603 : vector<1x1x32xf32> to vector<1x32xf32>
    %605 = vector.broadcast %604 : vector<1x32xf32> to vector<2x32xf32>
    %606 = arith.addf %602, %605 : vector<2x32xf32>
    %c2_390 = arith.constant 2 : index
    %c0_391 = arith.constant 0 : index
    %c0_392 = arith.constant 0 : index
    %607 = vector.load %arg5[%c2_390, %c0_391, %c0_392] : memref<3x32x32xf32, #tpu.memory_space<vmem>>, vector<1x32x32xf32>
    %608 = vector.shape_cast %607 : vector<1x32x32xf32> to vector<32x32xf32>
    %cst_393 = arith.constant dense<0.000000e+00> : vector<2x32xf32>
    %609 = tpu.matmul %592, %608, %cst_393 {dimension_numbers = #tpu.dot_dimension_numbers<[1], [0], [0], [1], [0, 0, 1, 1], [], []>} : vector<2x32xf32>, vector<32x32xf32>, vector<2x32xf32> -> vector<2x32xf32>
    %c2_394 = arith.constant 2 : index
    %c0_395 = arith.constant 0 : index
    %c0_396 = arith.constant 0 : index
    %610 = vector.load %arg7[%c2_394, %c0_395, %c0_396] : memref<3x1x32xf32, #tpu.memory_space<vmem>>, vector<1x1x32xf32>
    %611 = vector.shape_cast %610 : vector<1x1x32xf32> to vector<1x32xf32>
    %612 = vector.broadcast %611 : vector<1x32xf32> to vector<2x32xf32>
    %613 = arith.addf %609, %612 : vector<2x32xf32>
    %c0_397 = arith.constant 0 : index
    %c0_398 = arith.constant 0 : index
    %c0_399 = arith.constant 0 : index
    %614 = vector.load %arg6[%c0_397, %c0_398, %c0_399] : memref<3x32x32xf32, #tpu.memory_space<vmem>>, vector<1x32x32xf32>
    %615 = vector.shape_cast %614 : vector<1x32x32xf32> to vector<32x32xf32>
    %cst_400 = arith.constant dense<0.000000e+00> : vector<2x32xf32>
    %616 = tpu.matmul %556, %615, %cst_400 {dimension_numbers = #tpu.dot_dimension_numbers<[1], [0], [0], [1], [0, 0, 1, 1], [], []>} : vector<2x32xf32>, vector<32x32xf32>, vector<2x32xf32> -> vector<2x32xf32>
    %c1_401 = arith.constant 1 : index
    %c0_402 = arith.constant 0 : index
    %c0_403 = arith.constant 0 : index
    %617 = vector.load %arg6[%c1_401, %c0_402, %c0_403] : memref<3x32x32xf32, #tpu.memory_space<vmem>>, vector<1x32x32xf32>
    %618 = vector.shape_cast %617 : vector<1x32x32xf32> to vector<32x32xf32>
    %cst_404 = arith.constant dense<0.000000e+00> : vector<2x32xf32>
    %619 = tpu.matmul %556, %618, %cst_404 {dimension_numbers = #tpu.dot_dimension_numbers<[1], [0], [0], [1], [0, 0, 1, 1], [], []>} : vector<2x32xf32>, vector<32x32xf32>, vector<2x32xf32> -> vector<2x32xf32>
    %c2_405 = arith.constant 2 : index
    %c0_406 = arith.constant 0 : index
    %c0_407 = arith.constant 0 : index
    %620 = vector.load %arg6[%c2_405, %c0_406, %c0_407] : memref<3x32x32xf32, #tpu.memory_space<vmem>>, vector<1x32x32xf32>
    %621 = vector.shape_cast %620 : vector<1x32x32xf32> to vector<32x32xf32>
    %cst_408 = arith.constant dense<0.000000e+00> : vector<2x32xf32>
    %622 = tpu.matmul %556, %621, %cst_408 {dimension_numbers = #tpu.dot_dimension_numbers<[1], [0], [0], [1], [0, 0, 1, 1], [], []>} : vector<2x32xf32>, vector<32x32xf32>, vector<2x32xf32> -> vector<2x32xf32>
    %c0_409 = arith.constant 0 : index
    %c0_410 = arith.constant 0 : index
    %623 = vector.load %arg8[%c0_409, %c0_410] : memref<1x32xf32, #tpu.memory_space<vmem>>, vector<1x32xf32>
    %624 = vector.broadcast %623 : vector<1x32xf32> to vector<2x32xf32>
    %625 = arith.addf %622, %624 : vector<2x32xf32>
    %626 = arith.addf %599, %616 : vector<2x32xf32>
    %627 = arith.negf %626 : vector<2x32xf32>
    %628 = math.exp %627 : vector<2x32xf32>
    %cst_411 = arith.constant 1.000000e+00 : f32
    %629 = vector.broadcast %cst_411 : f32 to vector<2x32xf32>
    %630 = arith.addf %629, %628 : vector<2x32xf32>
    %631 = arith.divf %629, %630 : vector<2x32xf32>
    %632 = arith.addf %606, %619 : vector<2x32xf32>
    %633 = arith.negf %632 : vector<2x32xf32>
    %634 = math.exp %633 : vector<2x32xf32>
    %cst_412 = arith.constant 1.000000e+00 : f32
    %635 = vector.broadcast %cst_412 : f32 to vector<2x32xf32>
    %636 = arith.addf %635, %634 : vector<2x32xf32>
    %637 = arith.divf %635, %636 : vector<2x32xf32>
    %638 = arith.mulf %631, %625 : vector<2x32xf32>
    %639 = arith.addf %613, %638 : vector<2x32xf32>
    %640 = math.tanh %639 : vector<2x32xf32>
    %cst_413 = arith.constant 1.000000e+00 : f32
    %641 = vector.broadcast %cst_413 : f32 to vector<2x32xf32>
    %642 = arith.subf %641, %637 : vector<2x32xf32>
    %643 = arith.mulf %642, %640 : vector<2x32xf32>
    %644 = arith.mulf %637, %556 : vector<2x32xf32>
    %645 = arith.addf %643, %644 : vector<2x32xf32>
    %c12 = arith.constant 12 : index
    %c0_414 = arith.constant 0 : index
    %646 = vector.load %arg12[%c12, %c0_414] : memref<16x32xf32, #tpu.memory_space<vmem>>, vector<2x32xf32>
    tpu.vector_store %arg12[%c12, %c0_414], %645 {strides = array<i32>} : memref<16x32xf32, #tpu.memory_space<vmem>>, vector<2x32xf32>,
    %647 = vector.extract_strided_slice %7 {offsets = [14, 0], sizes = [2, 32], strides = [1, 1]} : vector<16x32xf32> to vector<2x32xf32>
    %648 = vector.extract_strided_slice %14 {offsets = [14, 0], sizes = [2, 32], strides = [1, 1]} : vector<16x32xf32> to vector<2x32xf32>
    %649 = vector.extract_strided_slice %21 {offsets = [14, 0], sizes = [2, 32], strides = [1, 1]} : vector<16x32xf32> to vector<2x32xf32>
    %c0_415 = arith.constant 0 : index
    %c0_416 = arith.constant 0 : index
    %c0_417 = arith.constant 0 : index
    %650 = vector.load %arg2[%c0_415, %c0_416, %c0_417] : memref<3x32x32xf32, #tpu.memory_space<vmem>>, vector<1x32x32xf32>
    %651 = vector.shape_cast %650 : vector<1x32x32xf32> to vector<32x32xf32>
    %cst_418 = arith.constant dense<0.000000e+00> : vector<2x32xf32>
    %652 = tpu.matmul %592, %651, %cst_418 {dimension_numbers = #tpu.dot_dimension_numbers<[1], [0], [0], [1], [0, 0, 1, 1], [], []>} : vector<2x32xf32>, vector<32x32xf32>, vector<2x32xf32> -> vector<2x32xf32>
    %c1_419 = arith.constant 1 : index
    %c0_420 = arith.constant 0 : index
    %c0_421 = arith.constant 0 : index
    %653 = vector.load %arg2[%c1_419, %c0_420, %c0_421] : memref<3x32x32xf32, #tpu.memory_space<vmem>>, vector<1x32x32xf32>
    %654 = vector.shape_cast %653 : vector<1x32x32xf32> to vector<32x32xf32>
    %cst_422 = arith.constant dense<0.000000e+00> : vector<2x32xf32>
    %655 = tpu.matmul %592, %654, %cst_422 {dimension_numbers = #tpu.dot_dimension_numbers<[1], [0], [0], [1], [0, 0, 1, 1], [], []>} : vector<2x32xf32>, vector<32x32xf32>, vector<2x32xf32> -> vector<2x32xf32>
    %c2_423 = arith.constant 2 : index
    %c0_424 = arith.constant 0 : index
    %c0_425 = arith.constant 0 : index
    %656 = vector.load %arg2[%c2_423, %c0_424, %c0_425] : memref<3x32x32xf32, #tpu.memory_space<vmem>>, vector<1x32x32xf32>
    %657 = vector.shape_cast %656 : vector<1x32x32xf32> to vector<32x32xf32>
    %cst_426 = arith.constant dense<0.000000e+00> : vector<2x32xf32>
    %658 = tpu.matmul %592, %657, %cst_426 {dimension_numbers = #tpu.dot_dimension_numbers<[1], [0], [0], [1], [0, 0, 1, 1], [], []>} : vector<2x32xf32>, vector<32x32xf32>, vector<2x32xf32> -> vector<2x32xf32>
    %c0_427 = arith.constant 0 : index
    %c0_428 = arith.constant 0 : index
    %659 = vector.load %arg4[%c0_427, %c0_428] : memref<1x32xf32, #tpu.memory_space<vmem>>, vector<1x32xf32>
    %660 = vector.broadcast %659 : vector<1x32xf32> to vector<2x32xf32>
    %661 = arith.addf %658, %660 : vector<2x32xf32>
    %662 = arith.addf %647, %652 : vector<2x32xf32>
    %663 = arith.negf %662 : vector<2x32xf32>
    %664 = math.exp %663 : vector<2x32xf32>
    %cst_429 = arith.constant 1.000000e+00 : f32
    %665 = vector.broadcast %cst_429 : f32 to vector<2x32xf32>
    %666 = arith.addf %665, %664 : vector<2x32xf32>
    %667 = arith.divf %665, %666 : vector<2x32xf32>
    %668 = arith.addf %648, %655 : vector<2x32xf32>
    %669 = arith.negf %668 : vector<2x32xf32>
    %670 = math.exp %669 : vector<2x32xf32>
    %cst_430 = arith.constant 1.000000e+00 : f32
    %671 = vector.broadcast %cst_430 : f32 to vector<2x32xf32>
    %672 = arith.addf %671, %670 : vector<2x32xf32>
    %673 = arith.divf %671, %672 : vector<2x32xf32>
    %674 = arith.mulf %667, %661 : vector<2x32xf32>
    %675 = arith.addf %649, %674 : vector<2x32xf32>
    %676 = math.tanh %675 : vector<2x32xf32>
    %cst_431 = arith.constant 1.000000e+00 : f32
    %677 = vector.broadcast %cst_431 : f32 to vector<2x32xf32>
    %678 = arith.subf %677, %673 : vector<2x32xf32>
    %679 = arith.mulf %678, %676 : vector<2x32xf32>
    %680 = arith.mulf %673, %592 : vector<2x32xf32>
    %681 = arith.addf %679, %680 : vector<2x32xf32>
    %c0_432 = arith.constant 0 : index
    %c0_433 = arith.constant 0 : index
    %c0_434 = arith.constant 0 : index
    %682 = vector.load %arg5[%c0_432, %c0_433, %c0_434] : memref<3x32x32xf32, #tpu.memory_space<vmem>>, vector<1x32x32xf32>
    %683 = vector.shape_cast %682 : vector<1x32x32xf32> to vector<32x32xf32>
    %cst_435 = arith.constant dense<0.000000e+00> : vector<2x32xf32>
    %684 = tpu.matmul %681, %683, %cst_435 {dimension_numbers = #tpu.dot_dimension_numbers<[1], [0], [0], [1], [0, 0, 1, 1], [], []>} : vector<2x32xf32>, vector<32x32xf32>, vector<2x32xf32> -> vector<2x32xf32>
    %c0_436 = arith.constant 0 : index
    %c0_437 = arith.constant 0 : index
    %c0_438 = arith.constant 0 : index
    %685 = vector.load %arg7[%c0_436, %c0_437, %c0_438] : memref<3x1x32xf32, #tpu.memory_space<vmem>>, vector<1x1x32xf32>
    %686 = vector.shape_cast %685 : vector<1x1x32xf32> to vector<1x32xf32>
    %687 = vector.broadcast %686 : vector<1x32xf32> to vector<2x32xf32>
    %688 = arith.addf %684, %687 : vector<2x32xf32>
    %c1_439 = arith.constant 1 : index
    %c0_440 = arith.constant 0 : index
    %c0_441 = arith.constant 0 : index
    %689 = vector.load %arg5[%c1_439, %c0_440, %c0_441] : memref<3x32x32xf32, #tpu.memory_space<vmem>>, vector<1x32x32xf32>
    %690 = vector.shape_cast %689 : vector<1x32x32xf32> to vector<32x32xf32>
    %cst_442 = arith.constant dense<0.000000e+00> : vector<2x32xf32>
    %691 = tpu.matmul %681, %690, %cst_442 {dimension_numbers = #tpu.dot_dimension_numbers<[1], [0], [0], [1], [0, 0, 1, 1], [], []>} : vector<2x32xf32>, vector<32x32xf32>, vector<2x32xf32> -> vector<2x32xf32>
    %c1_443 = arith.constant 1 : index
    %c0_444 = arith.constant 0 : index
    %c0_445 = arith.constant 0 : index
    %692 = vector.load %arg7[%c1_443, %c0_444, %c0_445] : memref<3x1x32xf32, #tpu.memory_space<vmem>>, vector<1x1x32xf32>
    %693 = vector.shape_cast %692 : vector<1x1x32xf32> to vector<1x32xf32>
    %694 = vector.broadcast %693 : vector<1x32xf32> to vector<2x32xf32>
    %695 = arith.addf %691, %694 : vector<2x32xf32>
    %c2_446 = arith.constant 2 : index
    %c0_447 = arith.constant 0 : index
    %c0_448 = arith.constant 0 : index
    %696 = vector.load %arg5[%c2_446, %c0_447, %c0_448] : memref<3x32x32xf32, #tpu.memory_space<vmem>>, vector<1x32x32xf32>
    %697 = vector.shape_cast %696 : vector<1x32x32xf32> to vector<32x32xf32>
    %cst_449 = arith.constant dense<0.000000e+00> : vector<2x32xf32>
    %698 = tpu.matmul %681, %697, %cst_449 {dimension_numbers = #tpu.dot_dimension_numbers<[1], [0], [0], [1], [0, 0, 1, 1], [], []>} : vector<2x32xf32>, vector<32x32xf32>, vector<2x32xf32> -> vector<2x32xf32>
    %c2_450 = arith.constant 2 : index
    %c0_451 = arith.constant 0 : index
    %c0_452 = arith.constant 0 : index
    %699 = vector.load %arg7[%c2_450, %c0_451, %c0_452] : memref<3x1x32xf32, #tpu.memory_space<vmem>>, vector<1x1x32xf32>
    %700 = vector.shape_cast %699 : vector<1x1x32xf32> to vector<1x32xf32>
    %701 = vector.broadcast %700 : vector<1x32xf32> to vector<2x32xf32>
    %702 = arith.addf %698, %701 : vector<2x32xf32>
    %c0_453 = arith.constant 0 : index
    %c0_454 = arith.constant 0 : index
    %c0_455 = arith.constant 0 : index
    %703 = vector.load %arg6[%c0_453, %c0_454, %c0_455] : memref<3x32x32xf32, #tpu.memory_space<vmem>>, vector<1x32x32xf32>
    %704 = vector.shape_cast %703 : vector<1x32x32xf32> to vector<32x32xf32>
    %cst_456 = arith.constant dense<0.000000e+00> : vector<2x32xf32>
    %705 = tpu.matmul %645, %704, %cst_456 {dimension_numbers = #tpu.dot_dimension_numbers<[1], [0], [0], [1], [0, 0, 1, 1], [], []>} : vector<2x32xf32>, vector<32x32xf32>, vector<2x32xf32> -> vector<2x32xf32>
    %c1_457 = arith.constant 1 : index
    %c0_458 = arith.constant 0 : index
    %c0_459 = arith.constant 0 : index
    %706 = vector.load %arg6[%c1_457, %c0_458, %c0_459] : memref<3x32x32xf32, #tpu.memory_space<vmem>>, vector<1x32x32xf32>
    %707 = vector.shape_cast %706 : vector<1x32x32xf32> to vector<32x32xf32>
    %cst_460 = arith.constant dense<0.000000e+00> : vector<2x32xf32>
    %708 = tpu.matmul %645, %707, %cst_460 {dimension_numbers = #tpu.dot_dimension_numbers<[1], [0], [0], [1], [0, 0, 1, 1], [], []>} : vector<2x32xf32>, vector<32x32xf32>, vector<2x32xf32> -> vector<2x32xf32>
    %c2_461 = arith.constant 2 : index
    %c0_462 = arith.constant 0 : index
    %c0_463 = arith.constant 0 : index
    %709 = vector.load %arg6[%c2_461, %c0_462, %c0_463] : memref<3x32x32xf32, #tpu.memory_space<vmem>>, vector<1x32x32xf32>
    %710 = vector.shape_cast %709 : vector<1x32x32xf32> to vector<32x32xf32>
    %cst_464 = arith.constant dense<0.000000e+00> : vector<2x32xf32>
    %711 = tpu.matmul %645, %710, %cst_464 {dimension_numbers = #tpu.dot_dimension_numbers<[1], [0], [0], [1], [0, 0, 1, 1], [], []>} : vector<2x32xf32>, vector<32x32xf32>, vector<2x32xf32> -> vector<2x32xf32>
    %c0_465 = arith.constant 0 : index
    %c0_466 = arith.constant 0 : index
    %712 = vector.load %arg8[%c0_465, %c0_466] : memref<1x32xf32, #tpu.memory_space<vmem>>, vector<1x32xf32>
    %713 = vector.broadcast %712 : vector<1x32xf32> to vector<2x32xf32>
    %714 = arith.addf %711, %713 : vector<2x32xf32>
    %715 = arith.addf %688, %705 : vector<2x32xf32>
    %716 = arith.negf %715 : vector<2x32xf32>
    %717 = math.exp %716 : vector<2x32xf32>
    %cst_467 = arith.constant 1.000000e+00 : f32
    %718 = vector.broadcast %cst_467 : f32 to vector<2x32xf32>
    %719 = arith.addf %718, %717 : vector<2x32xf32>
    %720 = arith.divf %718, %719 : vector<2x32xf32>
    %721 = arith.addf %695, %708 : vector<2x32xf32>
    %722 = arith.negf %721 : vector<2x32xf32>
    %723 = math.exp %722 : vector<2x32xf32>
    %cst_468 = arith.constant 1.000000e+00 : f32
    %724 = vector.broadcast %cst_468 : f32 to vector<2x32xf32>
    %725 = arith.addf %724, %723 : vector<2x32xf32>
    %726 = arith.divf %724, %725 : vector<2x32xf32>
    %727 = arith.mulf %720, %714 : vector<2x32xf32>
    %728 = arith.addf %702, %727 : vector<2x32xf32>
    %729 = math.tanh %728 : vector<2x32xf32>
    %cst_469 = arith.constant 1.000000e+00 : f32
    %730 = vector.broadcast %cst_469 : f32 to vector<2x32xf32>
    %731 = arith.subf %730, %726 : vector<2x32xf32>
    %732 = arith.mulf %731, %729 : vector<2x32xf32>
    %733 = arith.mulf %726, %645 : vector<2x32xf32>
    %734 = arith.addf %732, %733 : vector<2x32xf32>
    %c14 = arith.constant 14 : index
    %c0_470 = arith.constant 0 : index
    %735 = vector.load %arg12[%c14, %c0_470] : memref<16x32xf32, #tpu.memory_space<vmem>>, vector<2x32xf32>
    tpu.vector_store %arg12[%c14, %c0_470], %734 {strides = array<i32>} : memref<16x32xf32, #tpu.memory_space<vmem>>, vector<2x32xf32>,
    %c0_471 = arith.constant 0 : index
    %c0_472 = arith.constant 0 : index
    %736 = vector.load %arg12[%c0_471, %c0_472] : memref<16x32xf32, #tpu.memory_space<vmem>>, vector<16x32xf32>
    %c0_473 = arith.constant 0 : index
    %c0_474 = arith.constant 0 : index
    %737 = vector.load %arg9[%c0_473, %c0_474] : memref<32x3xf32, #tpu.memory_space<vmem>>, vector<32x3xf32>
    %cst_475 = arith.constant dense<0.000000e+00> : vector<16x3xf32>
    %738 = tpu.matmul %736, %737, %cst_475 {dimension_numbers = #tpu.dot_dimension_numbers<[1], [0], [0], [1], [0, 0, 1, 1], [], []>} : vector<16x32xf32>, vector<32x3xf32>, vector<16x3xf32> -> vector<16x3xf32>
    %c0_476 = arith.constant 0 : index
    %c0_477 = arith.constant 0 : index
    %739 = vector.load %arg10[%c0_476, %c0_477] : memref<1x3xf32, #tpu.memory_space<vmem>>, vector<1x3xf32>
    %740 = vector.broadcast %739 : vector<1x3xf32> to vector<16x3xf32>
    %741 = arith.addf %738, %740 : vector<16x3xf32>
    %c0_478 = arith.constant 0 : index
    %c0_479 = arith.constant 0 : index
    %742 = vector.load %arg11[%c0_478, %c0_479] : memref<16x3xf32, #tpu.memory_space<vmem>>, vector<16x3xf32>
    tpu.vector_store %arg11[%c0_478, %c0_479], %741 {strides = array<i32>} : memref<16x3xf32, #tpu.memory_space<vmem>>, vector<16x3xf32>,
    return
  }
}

</mosaic_0001>

<bundles_post_ra>
// kernel: grunet_forward.1
= control target key start
LH: loop header
LB: loop body
LE: loop exit
PB: predicated region body
PF: predicated region fallthrough
CT: control target
= control target key end

     0   :  { %16 = vsyncpa [#allocation4], 0  ;;  %s9610_s0 = inlined_call_operand.vmem [shape: f32[16,4], index: 0, kind: input, shape index: {}]   ;;  %s9611_s1 = inlined_call_operand.vmem [shape: f32[3,4,32], index: 1, kind: input, shape index: {}]   ;;  %s9612_s2 = inlined_call_operand.hbm [shape: f32[3,32,32], index: 2, kind: input, shape index: {}]   ;;  %s9613_s3 = inlined_call_operand.vmem [shape: f32[3,1,32], index: 3, kind: input, shape index: {}]   ;;  %s9614_s4 = inlined_call_operand.vmem [shape: f32[1,32], index: 4, kind: input, shape index: {}]   ;;  %s9615_s5 = inlined_call_operand.hbm [shape: f32[3,32,32], index: 5, kind: input, shape index: {}]   ;;  %s9616_s6 = inlined_call_operand.hbm [shape: f32[3,32,32], index: 6, kind: input, shape index: {}]   ;;  %s9617_s7 = inlined_call_operand.vmem [shape: f32[3,1,32], index: 7, kind: input, shape index: {}]   ;;  %s9618_s8 = inlined_call_operand.vmem [shape: f32[1,32], index: 8, kind: input, shape index: {}]   ;;  %s9619_s9 = inlined_call_operand.vmem [shape: f32[32,3], index: 9, kind: input, shape index: {}]   ;;  %s9620_s10 = inlined_call_operand.vmem [shape: f32[1,3], index: 10, kind: input, shape index: {}]   ;;  %s9621_s11 = inlined_call_operand.vmem [shape: f32[16,3], index: 11, kind: output, shape index: {}]  }
   0x1   :  { %17 = vsyncpa [#allocation6], 0  ;;  %s8629_s17 = smov [#allocation5]   ;;  %s8630_s19 = smov [#allocation3]  }
   0x2   :  { %s43_s18 = sshll.u32 %s8629_s17, 4  ;;  %s27_s20 = sshll.u32 %s8630_s19, 4  ;;  %s44_s18 = int_to_ptr.vmem [resolvable:$true] %s43_s18  ;;  %s8697_s20 = int_to_ptr.vmem [resolvable:$true] %s27_s20 }
   0x3   :  { %s8559_s23 = scalar_lea.hbm %s9615_s5, 1536 }
   0x4   :  { %p8560_p0 = scmp.ne.s32.totalorder %s9615_s5, %s8559_s23  ;;  %p8563_p1 = scmp.lt.u32.totalorder %s8559_s23, %s9615_s5 }
   0x6   :  { %p8565_p2 = pnand %p8563_p1, %p8560_p0 }
   0x8   :  { %8568 = shalt.err (!%p8565_p2)
}
   0x9   :  { %s8569_s28 = scalar_lea.vmem %s44_s18, 1536  ;;  %p8574_p4 = scmp.lt.s32.totalorder %s44_s18, %s44_s18 }
   0xa   :  { %p8570_p3 = scmp.ne.s32.totalorder %s44_s18, %s8569_s28  ;;  %p8575_p5 = scmp.lt.s32.totalorder %s8569_s28, %s8569_s28 }
   0xc   :  { %p8576_p6 = por %p8575_p5, %p8574_p4 }
   0xe   :  { %p8577_p7 = pnand %p8576_p6, %p8570_p3 }
  0x10   :  { %8580 = shalt.err (!%p8577_p7)
}
  0x11   :  { %s8631_s29 = smov 128   ;;  %s8632_s30 = smov 8  }
  0x12   :  { %49 = dma.hbm_to_vmem [thread:$0]  %s9615_s5, 1536, %s44_s18, [#allocation6], %s8631_s29, %s8631_s29, %s8632_s30  }
  0x13   :  { %s8581_s16 = scalar_lea.hbm %s9612_s2, 1536 }
  0x14   :  { %p8582_p8 = scmp.ne.s32.totalorder %s9612_s2, %s8581_s16  ;;  %p8585_p9 = scmp.lt.u32.totalorder %s8581_s16, %s9612_s2 }
  0x16   :  { %p8587_p10 = pnand %p8585_p9, %p8582_p8 }
  0x18   :  { %8590 = shalt.err (!%p8587_p10)
}
  0x19   :  { %s8591_s23 = scalar_lea.vmem %s8697_s20, 1536  ;;  %p8596_p12 = scmp.lt.s32.totalorder %s8697_s20, %s8697_s20 }
  0x1a   :  { %p8592_p11 = scmp.ne.s32.totalorder %s8697_s20, %s8591_s23  ;;  %p8597_p13 = scmp.lt.s32.totalorder %s8591_s23, %s8591_s23 }
  0x1c   :  { %p8598_p0 = por %p8597_p13, %p8596_p12 }
  0x1e   :  { %p8599_p1 = pnand %p8598_p0, %p8592_p11 }
  0x20   :  { %8602 = shalt.err (!%p8599_p1)
}
  0x21   :  { %33 = dma.hbm_to_vmem [thread:$0]  %s9612_s2, 1536, %s8697_s20, [#allocation4], %s8631_s29, %s8631_s29, %s8632_s30  }
  0x22   :  { %s8633_s24 = smov [#allocation7]   ;;  %s8603_s28 = scalar_lea.hbm %s9616_s6, 1536 }
  0x23   :  { %s55_s25 = sshll.u32 %s8633_s24, 4  ;;  %p8604_p2 = scmp.ne.s32.totalorder %s9616_s6, %s8603_s28  ;;  %s56_s25 = int_to_ptr.vmem [resolvable:$true] %s55_s25 }
  0x24   :  { %p8607_p3 = scmp.lt.u32.totalorder %s8603_s28, %s9616_s6 }
  0x26   :  { %p8609_p4 = pnand %p8607_p3, %p8604_p2 }
  0x28   :  { %8612 = shalt.err (!%p8609_p4)
}
  0x29   :  { %s8613_s16 = scalar_lea.vmem %s56_s25, 1536  ;;  %p8618_p6 = scmp.lt.s32.totalorder %s56_s25, %s56_s25 }
  0x2a   :  { %p8614_p5 = scmp.ne.s32.totalorder %s56_s25, %s8613_s16  ;;  %p8619_p7 = scmp.lt.s32.totalorder %s8613_s16, %s8613_s16 }
  0x2c   :  { %p8620_p8 = por %p8619_p7, %p8618_p6 }
  0x2e   :  { %p8621_p9 = pnand %p8620_p8, %p8614_p5 }
  0x30   :  { %8624 = shalt.err (!%p8621_p9)
}
  0x31   :  { %61 = dma.hbm_to_vmem [thread:$0]  %s9616_s6, 1536, %s56_s25, [#allocation6], %s8631_s29, %s8631_s29, %s8632_s30  }
  0x32   :  { %8625 = dma.done.wait [#allocation4], 1536  }
  0x33   :  { %8626 = vsyncadd [#allocation4], 4294965760 }
  0x34   :  { %8627 = dma.done.wait [#allocation6], 3072  }
  0x35   :  { %8628 = vsyncadd [#allocation6], 4294964224  ;;  %vm96_vm0 = vcmask 1043456   ;;  %vm89_vm1 = vcmask 31744   ;;  %v81_v0 = vld [vmem:[%s9611_s1] sm:$0xf] }
  0x36   :  { %v6541_v1 = vld [vmem:[%s9611_s1 + $0x4] sm:$0xf]  ;;  %7085 = vmatprep.subr.msk.mxu0 %vm96_vm0, %v81_v0  ;;  %v80_v3 = vld [vmem:[%s9610_s0 + $0x8] sm:$0xff]  ;;  %v351_v5 = vld [vmem:[#allocation3] sm:$0xff]  ;;  %v8634_v12 = vmov 0.0|0.0   ;;  %vm8635_vm2 = vmmov 0  }
  0x37   :  { %v79_v2 = vld [vmem:[%s9610_s0] sm:$0xff]  ;;  %7090 = vmatprep.subr.msk.mxu1 %vm96_vm0, %v6541_v1  ;;  %v6547_v4 = vld [vmem:[%s9611_s1 + $0x8] sm:$0xf]  ;;  %7086 = vmatpush3.msk.msra.mxu0 %vm96_vm0, %v81_v0  ;;  %v352_v6 = vld [vmem:[#allocation3 + $0x8] sm:$0xff]  ;;  %v8636_v19 = vmov 0.0   ;;  %vm355_vm3 = vcmask 261120  }
  0x38   :  { %7087 = vmatprep.mubr.msk.f32.mxu0 %vm89_vm1, %v79_v2  ;;  %v430_v7 = vld [vmem:[#allocation3 + $0x20] sm:$0xff]  ;;  %v431_v8 = vld [vmem:[#allocation3 + $0x28] sm:$0xff]  ;;  %7091 = vmatpush3.msk.msra.mxu1 %vm96_vm0, %v6541_v1  ;;  %v8770_v9 = vpack.c.bf16 %v352_v6, %v351_v5  ;;  %v353_v10 = vld [vmem:[#allocation3 + $0x10] sm:$0xff]  ;;  %vm1109_vm4 = vcmask 254976   ;;  %vm6528_vm5 = vcmask 23552  }
  0x39   :  { %7092 = vmatprep.mubr.msk.f32.mxu1 %vm89_vm1, %v79_v2  ;;  %v354_v11 = vld [vmem:[#allocation3 + $0x18] sm:$0xff]  ;;  %7088 = vmatmul.mubr.msk.f32.vlgmr.msra.gmra.mrb[0].mxu0 %vm89_vm1, %v80_v3  ;;  %v8776_v13 = vpack.c.bf16 %v431_v8, %v430_v7  ;;  %v432_v15 = vld [vmem:[#allocation3 + $0x30] sm:$0xff]  ;;  %v505_v17 = vld [vmem:[#allocation3 + $0x40] sm:$0xff] }
  0x3a   :  { %7093 = vmatmul.mubr.msk.f32.vlgmr.msra.gmra.mrb[0].mxu1 %vm89_vm1, %v80_v3  ;;  %7903 = vmatprep.subr.bf16.mxu1 %v8634_v12  ;;  %v8780_v14 = vpack.c.bf16 %v354_v11, %v353_v10  ;;  %v433_v16 = vld [vmem:[#allocation3 + $0x38] sm:$0xff]  ;;  %v506_v18 = vld [vmem:[#allocation3 + $0x48] sm:$0xff]  ;;  %v507_v22 = vld [vmem:[#allocation3 + $0x50] sm:$0xff] }
  0x3b   :  { %7095 = vmatprep.subr.msk.mxu0 %vm96_vm0, %v6547_v4  ;;  %7905 = vmatpush3.bf16.msra.mxu1 %v8770_v9  ;;  %v8789_v20 = vpack.c.bf16 %v433_v16, %v432_v15  ;;  %v8793_v21 = vpack.c.bf16 %v506_v18, %v505_v17  ;;  %v508_v23 = vld [vmem:[#allocation3 + $0x58] sm:$0xff]  ;;  %v607_v25 = vld [vmem:[#allocation5] sm:$0xff]  ;;  %v608_v26 = vld [vmem:[#allocation5 + $0x8] sm:$0xff] }
  0x3c   :  { %7096 = vmatpush3.msk.msra.mxu0 %vm96_vm0, %v6547_v4  ;;  %7097 = vmatprep.mubr.msk.f32.mxu0 %vm89_vm1, %v79_v2  ;;  %v8801_v24 = vpack.c.bf16 %v508_v23, %v507_v22  ;;  %v692_v27 = vld [vmem:[#allocation5 + $0x20] sm:$0xff]  ;;  %v8815_v28 = vpack.c.bf16 %v608_v26, %v607_v25  ;;  %v693_v29 = vld [vmem:[#allocation5 + $0x28] sm:$0xff]  ;;  %v609_v31 = vld [vmem:[#allocation5 + $0x10] sm:$0xff] }
  0x3d   :  { %7909 = vmatprep.subr.bf16.mxu0 %v8634_v12  ;;  %7098 = vmatmul.mubr.msk.f32.vlgmr.msra.gmra.mrb[2].mxu0 %vm89_vm1, %v80_v3  ;;  %v8817_v30 = vpack.c.bf16 %v693_v29, %v692_v27  ;;  %v610_v32 = vld [vmem:[#allocation5 + $0x18] sm:$0xff]  ;;  %v694_v33 = vld [vmem:[#allocation5 + $0x30] sm:$0xff]  ;;  %v775_v8 = vld [vmem:[#allocation5 + $0x40] sm:$0xff] }
  0x3e   :  { %7906 = vmatprep.subr.bf16.mxu1 %v8634_v12  ;;  %7911 = vmatpush3.bf16.msra.mxu0 %v8776_v13  ;;  %v8823_v34 = vpack.c.bf16 %v610_v32, %v609_v31  ;;  %v695_v35 = vld [vmem:[#allocation5 + $0x38] sm:$0xff]  ;;  %v6543_v37 = vld [vmem:[%s9613_s3 + $0x1] ss:$0 sm:$0xff]  ;;  %v6537_v38 = vld [vmem:[%s9613_s3] ss:$0 sm:$0xff] }
  0x3f   :  { %7108 = vmatprep.mubr.msk.f32.mxu1 %vm8635_vm2, %v8636_v19  ;;  %7908 = vmatpush3.bf16.msra.mxu1 %v8780_v14  ;;  %v8825_v36 = vpack.c.bf16 %v695_v35, %v694_v33  ;;  %v6549_v45 = vld [vmem:[%s9613_s3 + $0x2] ss:$0 sm:$0xff]  ;;  %v8855_v0 = vld [vmem:[%s9614_s4] ss:$0 sm:$0xff]  ;;  %v776_v11 = vld [vmem:[#allocation5 + $0x48] sm:$0xff] }
  0x40   :  { %7912 = vmatprep.subr.bf16.mxu0 %v8634_v12  ;;  %7119 = vmatprep.mubr.msk.f32.mxu0 %vm8635_vm2, %v8636_v19  ;;  %v932_v15 = vld [vmem:[#allocation7 + $0x20] sm:$0xff]  ;;  %v933_v16 = vld [vmem:[#allocation7 + $0x28] sm:$0xff]  ;;  %v8861_v23 = vpack.c.bf16 %v776_v11, %v775_v8  ;;  %v777_v26 = vld [vmem:[#allocation5 + $0x50] sm:$0xff] }
  0x41   :  { %7915 = vmatprep.subr.bf16.mxu1 %v8634_v12  ;;  %v8863_v25 = vpack.c.bf16 %v933_v16, %v932_v15  ;;  %v778_v29 = vld [vmem:[#allocation5 + $0x58] sm:$0xff]  ;;  %v934_v31 = vld [vmem:[#allocation7 + $0x30] sm:$0xff] }
  0x42   :  { %7109 = vmatmul.mubr.f32.vlgmr.msra.gmra.mrb[2].mxu1 %v8636_v19  ;;  %7914 = vmatpush3.bf16.msra.mxu0 %v8789_v20  ;;  %v935_v32 = vld [vmem:[#allocation7 + $0x38] sm:$0xff]  ;;  %v8873_v33 = vpack.c.bf16 %v778_v29, %v777_v26 }
  0x43   :  { %7917 = vmatpush3.bf16.msra.mxu1 %v8793_v21  ;;  %7130 = vmatprep.mubr.msk.f32.mxu1 %vm8635_vm2, %v8636_v19  ;;  %v8875_v35 = vpack.c.bf16 %v935_v32, %v934_v31 }
  0x44   :  { %7918 = vmatprep.subr.bf16.mxu1 %v8634_v12  ;;  %7921 = vmatprep.subr.bf16.mxu0 %v8634_v12 }
  0x45   :  { %7120 = vmatmul.mubr.f32.vlgmr.msra.gmra.mrb[4].mxu0 %v8636_v19 }
  0x46   :  { %7141 = vmatprep.mubr.msk.f32.mxu0 %vm8635_vm2, %v8636_v19  ;;  %7923 = vmatpush3.bf16.msra.mxu0 %v8815_v28 }
  0x47   :  { %7920 = vmatpush3.bf16.msra.mxu1 %v8801_v24  ;;  %7924 = vmatprep.subr.bf16.mxu0 %v8634_v12 }
  0x48   :  { %7927 = vmatprep.subr.bf16.mxu1 %v8634_v12 }
  0x4a   :  { %7131 = vmatmul.mubr.f32.vlgmr.msra.gmra.mrb[4].mxu1 %v8636_v19  ;;  %7926 = vmatpush3.bf16.msra.mxu0 %v8823_v34 }
  0x4b   :  { %7152 = vmatprep.mubr.msk.f32.mxu1 %vm8635_vm2, %v8636_v19  ;;  %7929 = vmatpush3.bf16.msra.mxu1 %v8817_v30 }
  0x4c   :  { %7930 = vmatprep.subr.bf16.mxu1 %v8634_v12  ;;  %7933 = vmatprep.subr.bf16.mxu0 %v8634_v12 }
  0x4f   :  { %7932 = vmatpush3.bf16.msra.mxu1 %v8825_v36 }
  0x50   :  { %7945 = vmatprep.subr.bf16.mxu1 %v8634_v12 }
 0x10c   :  { %v7089_v40 = vpop.f32.mrb[0].mxu0 }
 0x10d   :  { %v7094_v39 = vpop.f32.mrb[0].mxu1  ;;  %v8839_v43 = vadd.f32 %v7089_v40, %v6537_v38  ;;  %v166_v44 = vpop.f32.mrb[1].mxu0  ;;  %v1008_v40 = vld [vmem:[#allocation7 + $0x48] sm:$0xff] }
 0x10e   :  { %v8837_v41 = vadd.f32 %v7094_v39, %v6543_v37  ;;  %v254_v42 = vpop.f32.mrb[1].mxu1  ;;  %v8846_v49 = vadd.f32 %v6537_v38, %v166_v44  ;;  %v858_v38 = vld [vmem:[#allocation7 + $0x8] sm:$0xff]  ;;  %v1007_v39 = vld [vmem:[#allocation7 + $0x40] sm:$0xff] }
 0x10f   :  { %v8849_v53 = vadd.f32 %v6543_v37, %v254_v42  ;;  %v857_v37 = vld [vmem:[#allocation7] sm:$0xff]  ;;  %v8887_v44 = vpack.c.bf16 %v1008_v40, %v1007_v39  ;;  %v8965_v39 = vld [vmem:[%s9618_s8] ss:$0 sm:$0xff] }
 0x110   :  { %v7099_v46 = vpop.f32.mrb[2].mxu0  ;;  %v8885_v42 = vpack.c.bf16 %v858_v38, %v857_v37 }
 0x111   :  { %v8844_v47 = vadd.f32 %v7099_v46, %v6549_v45  ;;  %v342_v48 = vpop.f32.mrb[3].mxu0  ;;  %v860_v46 = vld [vmem:[#allocation7 + $0x18] sm:$0xff] }
 0x112   :  { %v8858_v4 = vadd.f32 %v6549_v45, %v342_v48  ;;  %v859_v45 = vld [vmem:[#allocation7 + $0x10] sm:$0xff] }
 0x113   :  { %v1009_v48 = vld [vmem:[#allocation7 + $0x50] sm:$0xff] }
 0x115   :  { %v425_v50 = vpop.f32.mrb[2].mxu1 }
 0x116   :  { %v586_v51 = vadd.f32 %v425_v50, %v8846_v49  ;;  %v7110_v52 = vpop.f32.mrb[3].mxu1  ;;  %v1010_v50 = vld [vmem:[#allocation7 + $0x58] sm:$0xff] }
 0x117   :  { %v8898_v52 = vpack.c.bf16 %v1010_v50, %v1009_v48 }
 0x118   :  { %v6554_v54 = vmul.f32 -1.442695, %v586_v51  ;;  %v500_v55 = vpop.f32.mrb[4].mxu0  ;;  %v8896_v51 = vpack.c.bf16 %v860_v46, %v859_v45  ;;  %v8970_v46 = vld [vmem:[%s9617_s7 + $0x2] ss:$0 sm:$0xff] }
 0x119   :  { %v593_v56 = vadd.f32 %v500_v55, %v8849_v53  ;;  %v7121_v57 = vpop.f32.mrb[5].mxu0 }
 0x11a   :  { %8399 = vpow2.f32 %v6554_v54 }
 0x11b   :  { %v6555_v58 = vmul.f32 -1.442695, %v593_v56 }
 0x11d   :  { %v582_v59 = vpop.f32.mrb[4].mxu1  ;;  %8401 = vpow2.f32 %v6555_v58  ;;  %v8951_v58 = vld [vmem:[%s9617_s7] ss:$0 sm:$0xff] }
 0x11e   :  { %v7132_v60 = vpop.f32.mrb[5].mxu1  ;;  %v583_v2 = vadd.f32 %v8855_v0, %v582_v59  ;;  %v8956_v59 = vld [vmem:[%s9617_s7 + $0x1] ss:$0 sm:$0xff] }
 0x124   :  { %v8400_v61 = vpop.eup %8399 }
 0x125   :  { %v590_v62 = vadd.f32 1.0, %v8400_v61 }
 0x127   :  { %8403 = vrcp.f32 %v590_v62  ;;  %v8402_v63 = vpop.eup %8401 }
 0x128   :  { %v597_v1 = vadd.f32 1.0, %v8402_v63 }
 0x12a   :  { %8405 = vrcp.f32 %v597_v1 }
 0x131   :  { %v8404_v3 = vpop.eup %8403 }
 0x132   :  { %v600_v5 = vmul.f32 %v8404_v3, %v583_v2 }
 0x134   :  { %v601_v6 = vadd.f32 %v600_v5, %v8858_v4  ;;  %v8406_v7 = vpop.eup %8405 }
 0x135   :  { %v603_v10 = vsub.f32 1.0, %v8406_v7  ;;  %v605_v18 = vmul.f32 0.0, %v8406_v7 }
 0x136   :  { %8407 = vtanh.f32 %v601_v6 }
 0x140   :  { %v8408_v17 = vpop.eup %8407 }
 0x141   :  { %v604_v22 = vmul.f32 %v8408_v17, %v603_v10 }
 0x143   :  { %v8865_v27 = vadd.f32 %v605_v18, %v604_v22 }
 0x145   :  { %7142 = vmatmul.mubr.msk.f32.vlgmr.msra.gmra.mrb[6].mxu0 %vm355_vm3, %v8865_v27  ;;  %7153 = vmatmul.mubr.msk.f32.vlgmr.msra.gmra.mrb[6].mxu1 %vm355_vm3, %v8865_v27 }
 0x146   :  { %7935 = vmatpush3.bf16.msra.mxu0 %v8861_v23  ;;  %7947 = vmatpush3.bf16.msra.mxu1 %v8863_v25 }
 0x147   :  { %7936 = vmatprep.subr.bf16.mxu0 %v8634_v12  ;;  %7948 = vmatprep.subr.bf16.mxu1 %v8634_v12 }
 0x148   :  { %7163 = vmatprep.mubr.msk.f32.mxu0 %vm8635_vm2, %v8636_v19  ;;  %7185 = vmatprep.mubr.msk.f32.mxu1 %vm8635_vm2, %v8636_v19 }
 0x14a   :  { %7938 = vmatpush3.bf16.msra.mxu0 %v8873_v33  ;;  %7950 = vmatpush3.bf16.msra.mxu1 %v8875_v35 }
 0x14b   :  { %7939 = vmatprep.subr.bf16.mxu0 %v8634_v12  ;;  %7951 = vmatprep.subr.bf16.mxu1 %v8634_v12 }
 0x14d   :  { %7164 = vmatmul.mubr.msk.f32.vlgmr.msra.gmra.mrb[8].mxu0 %vm355_vm3, %v8865_v27  ;;  %7186 = vmatmul.mubr.f32.vlgmr.msra.gmra.mrb[6].mxu1 %v8636_v19 }
 0x14e   :  { %7941 = vmatpush3.bf16.msra.mxu0 %v8885_v42  ;;  %7953 = vmatpush3.bf16.msra.mxu1 %v8887_v44 }
 0x14f   :  { %7942 = vmatprep.subr.bf16.mxu0 %v8634_v12  ;;  %7954 = vmatprep.subr.bf16.mxu1 %v8634_v12 }
 0x150   :  { %7174 = vmatprep.mubr.msk.f32.mxu0 %vm8635_vm2, %v8636_v19  ;;  %7196 = vmatprep.mubr.msk.f32.mxu1 %vm8635_vm2, %v8636_v19 }
 0x152   :  { %7944 = vmatpush3.bf16.msra.mxu0 %v8896_v51  ;;  %7956 = vmatpush3.bf16.msra.mxu1 %v8898_v52 }
 0x153   :  { %7957 = vmatprep.subr.bf16.mxu0 %v8634_v12  ;;  %7963 = vmatprep.subr.bf16.mxu1 %v8634_v12 }
 0x155   :  { %7175 = vmatmul.mubr.f32.vlgmr.msra.gmra.mrb[6].mxu0 %v8636_v19  ;;  %7197 = vmatmul.mubr.f32.vlgmr.msra.gmra.mrb[8].mxu1 %v8636_v19 }
 0x156   :  { %7959 = vmatpush3.bf16.msra.mxu0 %v8770_v9  ;;  %7965 = vmatpush3.bf16.msra.mxu1 %v8776_v13 }
 0x157   :  { %7960 = vmatprep.subr.bf16.mxu0 %v8634_v12  ;;  %7966 = vmatprep.subr.bf16.mxu1 %v8634_v12 }
 0x158   :  { %7207 = vmatprep.mubr.msk.f32.mxu0 %vm8635_vm2, %v8636_v19  ;;  %7218 = vmatprep.mubr.msk.f32.mxu1 %vm8635_vm2, %v8636_v19 }
 0x15a   :  { %7962 = vmatpush3.bf16.msra.mxu0 %v8780_v14  ;;  %7968 = vmatpush3.bf16.msra.mxu1 %v8789_v20 }
 0x15b   :  { %7969 = vmatprep.subr.bf16.mxu0 %v8634_v12  ;;  %7975 = vmatprep.subr.bf16.mxu1 %v8634_v12 }
 0x15d   :  { %7208 = vmatmul.mubr.msk.f32.vlgmr.msra.gmra.mrb[10].mxu0 %vm355_vm3, %v8865_v27  ;;  %7219 = vmatmul.mubr.msk.f32.vlgmr.msra.gmra.mrb[10].mxu1 %vm355_vm3, %v8865_v27 }
 0x15e   :  { %7971 = vmatpush3.bf16.msra.mxu0 %v8793_v21  ;;  %7229 = vmatprep.mubr.msk.f32.mxu0 %vm8635_vm2, %v8636_v19 }
 0x15f   :  { %7972 = vmatprep.subr.bf16.mxu0 %v8634_v12  ;;  %7977 = vmatpush3.bf16.msra.mxu1 %v8815_v28 }
 0x160   :  { %7978 = vmatprep.subr.bf16.mxu1 %v8634_v12  ;;  %7240 = vmatprep.mubr.msk.f32.mxu1 %vm8635_vm2, %v8636_v19 }
 0x162   :  { %7974 = vmatpush3.bf16.msra.mxu0 %v8801_v24 }
 0x163   :  { %7981 = vmatprep.subr.bf16.mxu0 %v8634_v12  ;;  %7980 = vmatpush3.bf16.msra.mxu1 %v8823_v34 }
 0x164   :  { %7987 = vmatprep.subr.bf16.mxu1 %v8634_v12 }
 0x165   :  { %7230 = vmatmul.mubr.msk.f32.vlgmr.msra.gmra.mrb[12].mxu0 %vm355_vm3, %v8865_v27 }
 0x166   :  { %7983 = vmatpush3.bf16.msra.mxu0 %v8817_v30  ;;  %7251 = vmatprep.mubr.msk.f32.mxu0 %vm8635_vm2, %v8636_v19 }
 0x167   :  { %7984 = vmatprep.subr.bf16.mxu0 %v8634_v12 }
 0x16a   :  { %7986 = vmatpush3.bf16.msra.mxu0 %v8825_v36 }
 0x16b   :  { %7999 = vmatprep.subr.bf16.mxu0 %v8634_v12 }
 0x220   :  { %v853_v54 = vpop.f32.mrb[8].mxu0  ;;  %v1002_v55 = vpop.f32.mrb[6].mxu1 }
 0x221   :  { %v7165_v56 = vpop.f32.mrb[9].mxu0  ;;  %v7187_v57 = vpop.f32.mrb[7].mxu1  ;;  %v8344_v2 = vadd.f32 %v8956_v59, %v1002_v55 }
 0x222   :  { %v854_v57 = vadd.f32 %v8970_v46, %v853_v54 }
 0x223   :  { %v6566_v5 = vmul.f32 -1.442695, %v8344_v2 }
 0x228   :  { %v927_v60 = vpop.f32.mrb[6].mxu0  ;;  %v1084_v61 = vpop.f32.mrb[8].mxu1 }
 0x229   :  { %v8343_v62 = vadd.f32 %v8951_v58, %v927_v60  ;;  %v7176_v63 = vpop.f32.mrb[7].mxu0  ;;  %v7198_v1 = vpop.f32.mrb[9].mxu1  ;;  %v1085_v50 = vadd.f32 %v8965_v39, %v1084_v61 }
 0x22b   :  { %v6565_v3 = vmul.f32 -1.442695, %v8343_v62 }
 0x22d   :  { %8409 = vpow2.f32 %v6565_v3 }
 0x22e   :  { %8411 = vpow2.f32 %v6566_v5  ;;  %v1368_v5 = vrot.slane %v8865_v27, 6 }
 0x230   :  { %v1181_v6 = vpop.f32.mrb[10].mxu0  ;;  %v1255_v7 = vpop.f32.mrb[10].mxu1 }
 0x231   :  { %v1341_v8 = vrot.slane %v1181_v6, 6  ;;  %v1351_v10 = vrot.slane %v1255_v7, 6  ;;  %v7209_v11 = vpop.f32.mrb[11].mxu0  ;;  %v7220_v15 = vpop.f32.mrb[11].mxu1 }
 0x233   :  { %v1343_v16 = vadd.f32 %v1341_v8, %v8846_v49  ;;  %v1353_v17 = vadd.f32 %v1351_v10, %v8849_v53 }
 0x235   :  { %v6571_v18 = vmul.f32 -1.442695, %v1343_v16  ;;  %v6572_v22 = vmul.f32 -1.442695, %v1353_v17 }
 0x237   :  { %v8410_v26 = vpop.eup %8409  ;;  %8413 = vpow2.f32 %v6571_v18 }
 0x238   :  { %v1092_v29 = vadd.f32 1.0, %v8410_v26  ;;  %8415 = vpow2.f32 %v6572_v22  ;;  %v1336_v31 = vpop.f32.mrb[12].mxu0  ;;  %v8412_v37 = vpop.eup %8411 }
 0x239   :  { %v7231_v32 = vpop.f32.mrb[13].mxu0  ;;  %v1099_v38 = vadd.f32 1.0, %v8412_v37  ;;  %v1337_v63 = vadd.f32 %v8855_v0, %v1336_v31 }
 0x23a   :  { %8417 = vrcp.f32 %v1092_v29 }
 0x23b   :  { %8419 = vrcp.f32 %v1099_v38  ;;  %v1361_v2 = vrot.slane %v1337_v63, 6 }
 0x241   :  { %v8414_v40 = vpop.eup %8413 }
 0x242   :  { %v8416_v45 = vpop.eup %8415  ;;  %v1347_v48 = vadd.f32 1.0, %v8414_v40 }
 0x243   :  { %v1357_v55 = vadd.f32 1.0, %v8416_v45 }
 0x244   :  { %v8418_v56 = vpop.eup %8417  ;;  %8421 = vrcp.f32 %v1347_v48 }
 0x245   :  { %v1102_v60 = vmul.f32 %v8418_v56, %v1085_v50  ;;  %8423 = vrcp.f32 %v1357_v55  ;;  %v8420_v1 = vpop.eup %8419 }
 0x246   :  { %v1105_v10 = vsub.f32 1.0, %v8420_v1  ;;  %v1107_v15 = vmul.f32 0.0, %v8420_v1 }
 0x247   :  { %v1103_v62 = vadd.f32 %v1102_v60, %v854_v57 }
 0x249   :  { %8425 = vtanh.f32 %v1103_v62 }
 0x24e   :  { %v8422_v3 = vpop.eup %8421 }
 0x24f   :  { %v8424_v6 = vpop.eup %8423  ;;  %v1363_v7 = vmul.f32 %v8422_v3, %v1361_v2 }
 0x250   :  { %v1370_v8 = vmul.f32 %v8424_v6, %v1368_v5  ;;  %v1366_v17 = vsub.f32 1.0, %v8424_v6 }
 0x251   :  { %v1364_v61 = vadd.f32 %v1363_v7, %v8858_v4 }
 0x253   :  { %v8426_v11 = vpop.eup %8425  ;;  %8427 = vtanh.f32 %v1364_v61 }
 0x254   :  { %v1106_v54 = vmul.f32 %v8426_v11, %v1105_v10 }
 0x256   :  { %v8977_v16 = vadd.f32 %v1107_v15, %v1106_v54 }
 0x258   :  { %1110 = vst.msk [vmem:[#allocation2] sm:$0x3] %vm1109_vm4, %v8977_v16 }
 0x25d   :  { %v8428_v18 = vpop.eup %8427 }
 0x25e   :  { %v1367_v22 = vmul.f32 %v8428_v18, %v1366_v17 }
 0x260   :  { %v8981_v27 = vadd.f32 %v1370_v8, %v1367_v22 }
 0x262   :  { %v1384_v26 = vrot.slane %v8981_v27, 2 }
 0x264   :  { %7241 = vmatmul.mubr.msk.f32.vlgmr.msra.gmra.mrb[12].mxu1 %vm355_vm3, %v1384_v26  ;;  %7252 = vmatmul.mubr.msk.f32.vlgmr.msra.gmra.mrb[14].mxu0 %vm355_vm3, %v1384_v26 }
 0x265   :  { %7989 = vmatpush3.bf16.msra.mxu1 %v8861_v23  ;;  %8001 = vmatpush3.bf16.msra.mxu0 %v8863_v25 }
 0x266   :  { %7990 = vmatprep.subr.bf16.mxu1 %v8634_v12  ;;  %8002 = vmatprep.subr.bf16.mxu0 %v8634_v12 }
 0x267   :  { %7262 = vmatprep.mubr.msk.f32.mxu1 %vm8635_vm2, %v8636_v19  ;;  %7284 = vmatprep.mubr.msk.f32.mxu0 %vm8635_vm2, %v8636_v19 }
 0x269   :  { %7992 = vmatpush3.bf16.msra.mxu1 %v8873_v33  ;;  %8004 = vmatpush3.bf16.msra.mxu0 %v8875_v35 }
 0x26a   :  { %7993 = vmatprep.subr.bf16.mxu1 %v8634_v12  ;;  %8005 = vmatprep.subr.bf16.mxu0 %v8634_v12 }
 0x26c   :  { %7263 = vmatmul.mubr.msk.f32.vlgmr.msra.gmra.mrb[14].mxu1 %vm355_vm3, %v1384_v26  ;;  %7285 = vmatmul.mubr.msk.f32.vlgmr.msra.gmra.mrb[14].mxu0 %vm355_vm3, %v8977_v16 }
 0x26d   :  { %7995 = vmatpush3.bf16.msra.mxu1 %v8885_v42  ;;  %8007 = vmatpush3.bf16.msra.mxu0 %v8887_v44 }
 0x26e   :  { %7996 = vmatprep.subr.bf16.mxu1 %v8634_v12  ;;  %8008 = vmatprep.subr.bf16.mxu0 %v8634_v12 }
 0x26f   :  { %7273 = vmatprep.mubr.msk.f32.mxu1 %vm8635_vm2, %v8636_v19  ;;  %7295 = vmatprep.mubr.msk.f32.mxu0 %vm8635_vm2, %v8636_v19 }
 0x271   :  { %7998 = vmatpush3.bf16.msra.mxu1 %v8896_v51  ;;  %8010 = vmatpush3.bf16.msra.mxu0 %v8898_v52 }
 0x272   :  { %8011 = vmatprep.subr.bf16.mxu1 %v8634_v12  ;;  %8017 = vmatprep.subr.bf16.mxu0 %v8634_v12 }
 0x274   :  { %7274 = vmatmul.mubr.msk.f32.vlgmr.msra.gmra.mrb[12].mxu1 %vm355_vm3, %v8977_v16  ;;  %7296 = vmatmul.mubr.msk.f32.vlgmr.msra.gmra.mrb[16].mxu0 %vm355_vm3, %v8977_v16 }
 0x275   :  { %8013 = vmatpush3.bf16.msra.mxu1 %v8770_v9  ;;  %8019 = vmatpush3.bf16.msra.mxu0 %v8776_v13 }
 0x276   :  { %8014 = vmatprep.subr.bf16.mxu1 %v8634_v12  ;;  %8020 = vmatprep.subr.bf16.mxu0 %v8634_v12 }
 0x277   :  { %7306 = vmatprep.mubr.msk.f32.mxu1 %vm8635_vm2, %v8636_v19  ;;  %7317 = vmatprep.mubr.msk.f32.mxu0 %vm8635_vm2, %v8636_v19 }
 0x279   :  { %8016 = vmatpush3.bf16.msra.mxu1 %v8780_v14  ;;  %8022 = vmatpush3.bf16.msra.mxu0 %v8789_v20 }
 0x27a   :  { %8023 = vmatprep.subr.bf16.mxu1 %v8634_v12  ;;  %8029 = vmatprep.subr.bf16.mxu0 %v8634_v12 }
 0x27c   :  { %7307 = vmatmul.mubr.msk.f32.vlgmr.msra.gmra.mrb[16].mxu1 %vm355_vm3, %v1384_v26  ;;  %7318 = vmatmul.mubr.msk.f32.vlgmr.msra.gmra.mrb[18].mxu0 %vm355_vm3, %v1384_v26 }
 0x27d   :  { %8025 = vmatpush3.bf16.msra.mxu1 %v8793_v21  ;;  %7328 = vmatprep.mubr.msk.f32.mxu1 %vm8635_vm2, %v8636_v19 }
 0x27e   :  { %8026 = vmatprep.subr.bf16.mxu1 %v8634_v12  ;;  %8031 = vmatpush3.bf16.msra.mxu0 %v8815_v28 }
 0x27f   :  { %8032 = vmatprep.subr.bf16.mxu0 %v8634_v12  ;;  %7339 = vmatprep.mubr.msk.f32.mxu0 %vm8635_vm2, %v8636_v19 }
 0x281   :  { %8028 = vmatpush3.bf16.msra.mxu1 %v8801_v24 }
 0x282   :  { %8035 = vmatprep.subr.bf16.mxu1 %v8634_v12  ;;  %8034 = vmatpush3.bf16.msra.mxu0 %v8823_v34 }
 0x283   :  { %8041 = vmatprep.subr.bf16.mxu0 %v8634_v12 }
 0x284   :  { %7329 = vmatmul.mubr.msk.f32.vlgmr.msra.gmra.mrb[18].mxu1 %vm355_vm3, %v1384_v26 }
 0x285   :  { %8037 = vmatpush3.bf16.msra.mxu1 %v8817_v30  ;;  %7350 = vmatprep.mubr.msk.f32.mxu1 %vm8635_vm2, %v8636_v19 }
 0x286   :  { %8038 = vmatprep.subr.bf16.mxu1 %v8634_v12 }
 0x289   :  { %8040 = vmatpush3.bf16.msra.mxu1 %v8825_v36 }
 0x28a   :  { %8053 = vmatprep.subr.bf16.mxu1 %v8634_v12 }
 0x33f   :  { %v1615_v29 = vpop.f32.mrb[14].mxu1  ;;  %v1766_v31 = vpop.f32.mrb[14].mxu0 }
 0x340   :  { %v7264_v32 = vpop.f32.mrb[15].mxu1  ;;  %v7286_v37 = vpop.f32.mrb[15].mxu0  ;;  %v8346_v55 = vadd.f32 %v8956_v59, %v1766_v31 }
 0x342   :  { %v6586_v57 = vmul.f32 -1.442695, %v8346_v55 }
 0x347   :  { %v1692_v38 = vpop.f32.mrb[12].mxu1  ;;  %v1847_v40 = vpop.f32.mrb[16].mxu0 }
 0x348   :  { %v8345_v45 = vadd.f32 %v8951_v58, %v1692_v38  ;;  %v7275_v48 = vpop.f32.mrb[13].mxu1  ;;  %v7297_v50 = vpop.f32.mrb[17].mxu0  ;;  %v1848_v31 = vadd.f32 %v8965_v39, %v1847_v40  ;;  %v1616_v38 = vadd.f32 %v8970_v46, %v1615_v29 }
 0x34a   :  { %v6585_v56 = vmul.f32 -1.442695, %v8345_v45 }
 0x34c   :  { %8429 = vpow2.f32 %v6585_v56 }
 0x34d   :  { %8431 = vpow2.f32 %v6586_v57 }
 0x34f   :  { %v1943_v60 = vpop.f32.mrb[16].mxu1  ;;  %v2017_v62 = vpop.f32.mrb[18].mxu0 }
 0x350   :  { %v2103_v63 = vrot.slane %v1943_v60, 4  ;;  %v2113_v1 = vrot.slane %v2017_v62, 4  ;;  %v7308_v2 = vpop.f32.mrb[17].mxu1  ;;  %v7319_v3 = vpop.f32.mrb[19].mxu0  ;;  %v2130_v60 = vrot.slane %v8981_v27, 6 }
 0x352   :  { %v2105_v5 = vadd.f32 %v2103_v63, %v8846_v49  ;;  %v2115_v6 = vadd.f32 %v2113_v1, %v8849_v53 }
 0x354   :  { %v6591_v7 = vmul.f32 -1.442695, %v2105_v5  ;;  %v6592_v8 = vmul.f32 -1.442695, %v2115_v6 }
 0x356   :  { %v8430_v61 = vpop.eup %8429  ;;  %8433 = vpow2.f32 %v6591_v7 }
 0x357   :  { %v1855_v10 = vadd.f32 1.0, %v8430_v61  ;;  %8435 = vpow2.f32 %v6592_v8  ;;  %v2098_v11 = vpop.f32.mrb[18].mxu1  ;;  %v8432_v15 = vpop.eup %8431 }
 0x358   :  { %v7330_v54 = vpop.f32.mrb[19].mxu1  ;;  %v1862_v17 = vadd.f32 1.0, %v8432_v15  ;;  %v2099_v50 = vadd.f32 %v8855_v0, %v2098_v11 }
 0x359   :  { %8437 = vrcp.f32 %v1855_v10 }
 0x35a   :  { %8439 = vrcp.f32 %v1862_v17  ;;  %v2123_v56 = vrot.slane %v2099_v50, 4 }
 0x360   :  { %v8434_v18 = vpop.eup %8433 }
 0x361   :  { %v8436_v22 = vpop.eup %8435  ;;  %v2109_v26 = vadd.f32 1.0, %v8434_v18 }
 0x362   :  { %v2119_v32 = vadd.f32 1.0, %v8436_v22 }
 0x363   :  { %v8438_v37 = vpop.eup %8437  ;;  %8441 = vrcp.f32 %v2109_v26 }
 0x364   :  { %v1865_v45 = vmul.f32 %v8438_v37, %v1848_v31  ;;  %8443 = vrcp.f32 %v2119_v32  ;;  %v8440_v55 = vpop.eup %8439 }
 0x365   :  { %v1868_v2 = vsub.f32 1.0, %v8440_v55  ;;  %v1870_v5 = vmul.f32 %v8440_v55, %v8977_v16 }
 0x366   :  { %v1866_v48 = vadd.f32 %v1865_v45, %v1616_v38 }
 0x368   :  { %8445 = vtanh.f32 %v1866_v48 }
 0x36d   :  { %v8442_v57 = vpop.eup %8441 }
 0x36e   :  { %v8444_v62 = vpop.eup %8443  ;;  %v2125_v63 = vmul.f32 %v8442_v57, %v2123_v56 }
 0x36f   :  { %v2132_v1 = vmul.f32 %v8444_v62, %v2130_v60  ;;  %v2128_v7 = vsub.f32 1.0, %v8444_v62 }
 0x370   :  { %v2126_v40 = vadd.f32 %v2125_v63, %v8858_v4 }
 0x372   :  { %v8446_v3 = vpop.eup %8445  ;;  %8447 = vtanh.f32 %v2126_v40 }
 0x373   :  { %v1869_v29 = vmul.f32 %v8446_v3, %v1868_v2 }
 0x375   :  { %v9060_v6 = vadd.f32 %v1870_v5, %v1869_v29 }
 0x377   :  { %1872 = vst.msk [vmem:[#allocation2 + $0x2] sm:$0x3] %vm1109_vm4, %v9060_v6 }
 0x37c   :  { %v8448_v8 = vpop.eup %8447 }
 0x37d   :  { %v2129_v61 = vmul.f32 %v8448_v8, %v2128_v7 }
 0x37f   :  { %v9064_v27 = vadd.f32 %v2132_v1, %v2129_v61 }
 0x381   :  { %v2146_v10 = vrot.slane %v9064_v27, 4  ;;  %v2892_v61 = vrot.slane %v9064_v27, 6 }
 0x383   :  { %7340 = vmatmul.mubr.msk.f32.vlgmr.msra.gmra.mrb[20].mxu0 %vm355_vm3, %v2146_v10  ;;  %7351 = vmatmul.mubr.msk.f32.vlgmr.msra.gmra.mrb[20].mxu1 %vm355_vm3, %v2146_v10 }
 0x384   :  { %8043 = vmatpush3.bf16.msra.mxu0 %v8861_v23  ;;  %8055 = vmatpush3.bf16.msra.mxu1 %v8863_v25 }
 0x385   :  { %8044 = vmatprep.subr.bf16.mxu0 %v8634_v12  ;;  %8056 = vmatprep.subr.bf16.mxu1 %v8634_v12 }
 0x386   :  { %7361 = vmatprep.mubr.msk.f32.mxu0 %vm8635_vm2, %v8636_v19  ;;  %7383 = vmatprep.mubr.msk.f32.mxu1 %vm8635_vm2, %v8636_v19 }
 0x388   :  { %8046 = vmatpush3.bf16.msra.mxu0 %v8873_v33  ;;  %8058 = vmatpush3.bf16.msra.mxu1 %v8875_v35 }
 0x389   :  { %8047 = vmatprep.subr.bf16.mxu0 %v8634_v12  ;;  %8059 = vmatprep.subr.bf16.mxu1 %v8634_v12 }
 0x38b   :  { %7362 = vmatmul.mubr.msk.f32.vlgmr.msra.gmra.mrb[22].mxu0 %vm355_vm3, %v2146_v10  ;;  %7384 = vmatmul.mubr.msk.f32.vlgmr.msra.gmra.mrb[20].mxu1 %vm355_vm3, %v9060_v6 }
 0x38c   :  { %8049 = vmatpush3.bf16.msra.mxu0 %v8885_v42  ;;  %8061 = vmatpush3.bf16.msra.mxu1 %v8887_v44 }
 0x38d   :  { %8050 = vmatprep.subr.bf16.mxu0 %v8634_v12  ;;  %8062 = vmatprep.subr.bf16.mxu1 %v8634_v12 }
 0x38e   :  { %7372 = vmatprep.mubr.msk.f32.mxu0 %vm8635_vm2, %v8636_v19  ;;  %7394 = vmatprep.mubr.msk.f32.mxu1 %vm8635_vm2, %v8636_v19 }
 0x390   :  { %8052 = vmatpush3.bf16.msra.mxu0 %v8896_v51  ;;  %8064 = vmatpush3.bf16.msra.mxu1 %v8898_v52 }
 0x391   :  { %8065 = vmatprep.subr.bf16.mxu0 %v8634_v12  ;;  %8071 = vmatprep.subr.bf16.mxu1 %v8634_v12 }
 0x393   :  { %7373 = vmatmul.mubr.msk.f32.vlgmr.msra.gmra.mrb[20].mxu0 %vm355_vm3, %v9060_v6  ;;  %7395 = vmatmul.mubr.msk.f32.vlgmr.msra.gmra.mrb[22].mxu1 %vm355_vm3, %v9060_v6 }
 0x394   :  { %8067 = vmatpush3.bf16.msra.mxu0 %v8770_v9  ;;  %8073 = vmatpush3.bf16.msra.mxu1 %v8776_v13 }
 0x395   :  { %8068 = vmatprep.subr.bf16.mxu0 %v8634_v12  ;;  %8074 = vmatprep.subr.bf16.mxu1 %v8634_v12 }
 0x396   :  { %7405 = vmatprep.mubr.msk.f32.mxu0 %vm8635_vm2, %v8636_v19  ;;  %7416 = vmatprep.mubr.msk.f32.mxu1 %vm8635_vm2, %v8636_v19 }
 0x398   :  { %8070 = vmatpush3.bf16.msra.mxu0 %v8780_v14  ;;  %8076 = vmatpush3.bf16.msra.mxu1 %v8789_v20 }
 0x399   :  { %8077 = vmatprep.subr.bf16.mxu0 %v8634_v12  ;;  %8083 = vmatprep.subr.bf16.mxu1 %v8634_v12 }
 0x39b   :  { %7406 = vmatmul.mubr.msk.f32.vlgmr.msra.gmra.mrb[24].mxu0 %vm355_vm3, %v2146_v10  ;;  %7417 = vmatmul.mubr.msk.f32.vlgmr.msra.gmra.mrb[24].mxu1 %vm355_vm3, %v2146_v10 }
 0x39c   :  { %8079 = vmatpush3.bf16.msra.mxu0 %v8793_v21  ;;  %7427 = vmatprep.mubr.msk.f32.mxu0 %vm8635_vm2, %v8636_v19 }
 0x39d   :  { %8080 = vmatprep.subr.bf16.mxu0 %v8634_v12  ;;  %8085 = vmatpush3.bf16.msra.mxu1 %v8815_v28 }
 0x39e   :  { %8086 = vmatprep.subr.bf16.mxu1 %v8634_v12  ;;  %7438 = vmatprep.mubr.msk.f32.mxu1 %vm8635_vm2, %v8636_v19 }
 0x3a0   :  { %8082 = vmatpush3.bf16.msra.mxu0 %v8801_v24 }
 0x3a1   :  { %8089 = vmatprep.subr.bf16.mxu0 %v8634_v12  ;;  %8088 = vmatpush3.bf16.msra.mxu1 %v8823_v34 }
 0x3a2   :  { %8095 = vmatprep.subr.bf16.mxu1 %v8634_v12 }
 0x3a3   :  { %7428 = vmatmul.mubr.msk.f32.vlgmr.msra.gmra.mrb[26].mxu0 %vm355_vm3, %v2146_v10 }
 0x3a4   :  { %8091 = vmatpush3.bf16.msra.mxu0 %v8817_v30  ;;  %7449 = vmatprep.mubr.msk.f32.mxu0 %vm8635_vm2, %v8636_v19 }
 0x3a5   :  { %8092 = vmatprep.subr.bf16.mxu0 %v8634_v12 }
 0x3a8   :  { %8094 = vmatpush3.bf16.msra.mxu0 %v8825_v36 }
 0x3a9   :  { %8107 = vmatprep.subr.bf16.mxu0 %v8634_v12 }
 0x45e   :  { %v2377_v9 = vpop.f32.mrb[22].mxu0  ;;  %v2528_v13 = vpop.f32.mrb[20].mxu1 }
 0x45f   :  { %v7363_v14 = vpop.f32.mrb[23].mxu0  ;;  %v7385_v20 = vpop.f32.mrb[21].mxu1  ;;  %v8348_v30 = vadd.f32 %v8956_v59, %v2528_v13 }
 0x461   :  { %v6606_v54 = vmul.f32 -1.442695, %v8348_v30 }
 0x466   :  { %v2454_v21 = vpop.f32.mrb[20].mxu0  ;;  %v2609_v24 = vpop.f32.mrb[22].mxu1 }
 0x467   :  { %v8347_v28 = vadd.f32 %v8951_v58, %v2454_v21  ;;  %v7374_v34 = vpop.f32.mrb[21].mxu0  ;;  %v7396_v16 = vpop.f32.mrb[23].mxu1  ;;  %v2610_v1 = vadd.f32 %v8965_v39, %v2609_v24 }
 0x469   :  { %v6605_v11 = vmul.f32 -1.442695, %v8347_v28 }
 0x46b   :  { %8449 = vpow2.f32 %v6605_v11 }
 0x46c   :  { %8451 = vpow2.f32 %v6606_v54  ;;  %v3473_v54 = vld [vmem:[#allocation3 + $0x30] sm:$0xff] }
 0x46e   :  { %v2705_v15 = vpop.f32.mrb[24].mxu0  ;;  %v2779_v17 = vpop.f32.mrb[24].mxu1 }
 0x46f   :  { %v2865_v36 = vrot.slane %v2705_v15, 2  ;;  %v2875_v18 = vrot.slane %v2779_v17, 2  ;;  %v7407_v22 = vpop.f32.mrb[25].mxu0  ;;  %v7418_v26 = vpop.f32.mrb[25].mxu1  ;;  %v3474_v15 = vld [vmem:[#allocation3 + $0x38] sm:$0xff]  ;;  %v3545_v17 = vld [vmem:[#allocation3 + $0x40] sm:$0xff] }
 0x470   :  { %v3547_v22 = vld [vmem:[#allocation3 + $0x50] sm:$0xff]  ;;  %v3548_v26 = vld [vmem:[#allocation3 + $0x58] sm:$0xff] }
 0x471   :  { %v2867_v31 = vadd.f32 %v2865_v36, %v8846_v49  ;;  %v2877_v32 = vadd.f32 %v2875_v18, %v8849_v53  ;;  %v2378_v53 = vadd.f32 %v8970_v46, %v2377_v9  ;;  %v3546_v36 = vld [vmem:[#allocation3 + $0x48] sm:$0xff] }
 0x472   :  { %v9203_v18 = vpack.c.bf16 %v3546_v36, %v3545_v17  ;;  %v9250_v36 = vld [vmem:[%s9614_s4] ss:$0 sm:$0xff] }
 0x473   :  { %v6611_v37 = vmul.f32 -1.442695, %v2867_v31  ;;  %v6612_v38 = vmul.f32 -1.442695, %v2877_v32  ;;  %v9212_v31 = vpack.c.bf16 %v3548_v26, %v3547_v22  ;;  %v3648_v32 = vld [vmem:[#allocation5] sm:$0xff] }
 0x475   :  { %v8450_v45 = vpop.eup %8449  ;;  %8453 = vpow2.f32 %v6611_v37  ;;  %v3649_v37 = vld [vmem:[#allocation5 + $0x8] sm:$0xff] }
 0x476   :  { %v2617_v48 = vadd.f32 1.0, %v8450_v45  ;;  %8455 = vpow2.f32 %v6612_v38  ;;  %v2860_v50 = vpop.f32.mrb[26].mxu0  ;;  %v8452_v56 = vpop.eup %8451  ;;  %v3732_v38 = vld [vmem:[#allocation5 + $0x20] sm:$0xff]  ;;  %v9225_v45 = vpack.c.bf16 %v3649_v37, %v3648_v32 }
 0x477   :  { %v7429_v55 = vpop.f32.mrb[27].mxu0  ;;  %v2624_v57 = vadd.f32 1.0, %v8452_v56  ;;  %v2861_v29 = vadd.f32 %v8855_v0, %v2860_v50  ;;  %v3651_v56 = vld [vmem:[#allocation5 + $0x18] sm:$0xff] }
 0x478   :  { %8457 = vrcp.f32 %v2617_v48  ;;  %v3733_v48 = vld [vmem:[#allocation5 + $0x28] sm:$0xff]  ;;  %v3650_v55 = vld [vmem:[#allocation5 + $0x10] sm:$0xff] }
 0x479   :  { %8459 = vrcp.f32 %v2624_v57  ;;  %v2885_v7 = vrot.slane %v2861_v29, 2  ;;  %v9227_v50 = vpack.c.bf16 %v3733_v48, %v3732_v38  ;;  %v3734_v57 = vld [vmem:[#allocation5 + $0x30] sm:$0xff] }
 0x47f   :  { %v8454_v60 = vpop.eup %8453 }
 0x480   :  { %v8456_v62 = vpop.eup %8455  ;;  %v2871_v63 = vadd.f32 1.0, %v8454_v60  ;;  %v9233_v60 = vpack.c.bf16 %v3651_v56, %v3650_v55 }
 0x481   :  { %v2881_v49 = vadd.f32 1.0, %v8456_v62  ;;  %v3735_v62 = vld [vmem:[#allocation5 + $0x38] sm:$0xff] }
 0x482   :  { %v8458_v40 = vpop.eup %8457  ;;  %8461 = vrcp.f32 %v2871_v63  ;;  %v9235_v63 = vpack.c.bf16 %v3735_v62, %v3734_v57 }
 0x483   :  { %v2627_v2 = vmul.f32 %v8458_v40, %v2610_v1  ;;  %8463 = vrcp.f32 %v2881_v49  ;;  %v8460_v5 = vpop.eup %8459 }
 0x484   :  { %v2630_v21 = vsub.f32 1.0, %v8460_v5  ;;  %v2632_v28 = vmul.f32 %v8460_v5, %v9060_v6  ;;  %v3400_v6 = vld [vmem:[#allocation3 + $0x18] sm:$0xff] }
 0x485   :  { %v2628_v3 = vadd.f32 %v2627_v2, %v2378_v53 }
 0x487   :  { %8465 = vtanh.f32 %v2628_v3 }
 0x48c   :  { %v8462_v8 = vpop.eup %8461 }
 0x48d   :  { %v8464_v10 = vpop.eup %8463  ;;  %v2887_v13 = vmul.f32 %v8462_v8, %v2885_v7 }
 0x48e   :  { %v2894_v14 = vmul.f32 %v8464_v10, %v2892_v61  ;;  %v2890_v0 = vsub.f32 1.0, %v8464_v10 }
 0x48f   :  { %v2888_v20 = vadd.f32 %v2887_v13, %v8858_v4  ;;  %v3397_v4 = vld [vmem:[#allocation3] sm:$0xff] }
 0x491   :  { %v8466_v24 = vpop.eup %8465  ;;  %8467 = vtanh.f32 %v2888_v20 }
 0x492   :  { %v2631_v9 = vmul.f32 %v8466_v24, %v2630_v21 }
 0x494   :  { %v9143_v34 = vadd.f32 %v2632_v28, %v2631_v9 }
 0x496   :  { %2634 = vst.msk [vmem:[#allocation2 + $0x4] sm:$0x3] %vm1109_vm4, %v9143_v34 }
 0x49b   :  { %v8468_v16 = vpop.eup %8467 }
 0x49c   :  { %v2891_v30 = vmul.f32 %v8468_v16, %v2890_v0 }
 0x49e   :  { %v2895_v27 = vadd.f32 %v2894_v14, %v2891_v30 }
 0x4a0   :  { %v9147_v11 = vrot.slane %v2895_v27, 6 }
 0x4a2   :  { %7439 = vmatmul.mubr.msk.f32.vlgmr.msra.gmra.mrb[26].mxu1 %vm355_vm3, %v9147_v11  ;;  %7450 = vmatmul.mubr.msk.f32.vlgmr.msra.gmra.mrb[28].mxu0 %vm355_vm3, %v9147_v11 }
 0x4a3   :  { %8097 = vmatpush3.bf16.msra.mxu1 %v8861_v23  ;;  %8109 = vmatpush3.bf16.msra.mxu0 %v8863_v25  ;;  %v3398_v23 = vld [vmem:[#allocation3 + $0x8] sm:$0xff]  ;;  %v3471_v25 = vld [vmem:[#allocation3 + $0x20] sm:$0xff] }
 0x4a4   :  { %8098 = vmatprep.subr.bf16.mxu1 %v8634_v12  ;;  %8110 = vmatprep.subr.bf16.mxu0 %v8634_v12 }
 0x4a5   :  { %7460 = vmatprep.mubr.msk.f32.mxu1 %vm8635_vm2, %v8636_v19  ;;  %7482 = vmatprep.mubr.msk.f32.mxu0 %vm8635_vm2, %v8636_v19 }
 0x4a7   :  { %8100 = vmatpush3.bf16.msra.mxu1 %v8873_v33  ;;  %8112 = vmatpush3.bf16.msra.mxu0 %v8875_v35  ;;  %v3472_v33 = vld [vmem:[#allocation3 + $0x28] sm:$0xff]  ;;  %v9179_v35 = vpack.c.bf16 %v3398_v23, %v3397_v4 }
 0x4a8   :  { %8101 = vmatprep.subr.bf16.mxu1 %v8634_v12  ;;  %8113 = vmatprep.subr.bf16.mxu0 %v8634_v12 }
 0x4aa   :  { %7461 = vmatmul.mubr.msk.f32.vlgmr.msra.gmra.mrb[28].mxu1 %vm355_vm3, %v9147_v11  ;;  %7483 = vmatmul.mubr.msk.f32.vlgmr.msra.gmra.mrb[28].mxu0 %vm355_vm3, %v9143_v34 }
 0x4ab   :  { %8103 = vmatpush3.bf16.msra.mxu1 %v8885_v42  ;;  %8115 = vmatpush3.bf16.msra.mxu0 %v8887_v44  ;;  %v9181_v42 = vpack.c.bf16 %v3472_v33, %v3471_v25  ;;  %v3399_v44 = vld [vmem:[#allocation3 + $0x10] sm:$0xff] }
 0x4ac   :  { %8104 = vmatprep.subr.bf16.mxu1 %v8634_v12  ;;  %8116 = vmatprep.subr.bf16.mxu0 %v8634_v12 }
 0x4ad   :  { %7471 = vmatprep.mubr.msk.f32.mxu1 %vm8635_vm2, %v8636_v19  ;;  %7493 = vmatprep.mubr.msk.f32.mxu0 %vm8635_vm2, %v8636_v19 }
 0x4af   :  { %8106 = vmatpush3.bf16.msra.mxu1 %v8896_v51  ;;  %8118 = vmatpush3.bf16.msra.mxu0 %v8898_v52  ;;  %v9191_v51 = vpack.c.bf16 %v3400_v6, %v3399_v44  ;;  %v9193_v52 = vpack.c.bf16 %v3474_v15, %v3473_v54 }
 0x4b0   :  { %8119 = vmatprep.subr.bf16.mxu1 %v8634_v12  ;;  %8125 = vmatprep.subr.bf16.mxu0 %v8634_v12 }
 0x4b2   :  { %7472 = vmatmul.mubr.msk.f32.vlgmr.msra.gmra.mrb[26].mxu1 %vm355_vm3, %v9143_v34  ;;  %7494 = vmatmul.mubr.msk.f32.vlgmr.msra.gmra.mrb[30].mxu0 %vm355_vm3, %v9143_v34 }
 0x4b3   :  { %8121 = vmatpush3.bf16.msra.mxu1 %v9179_v35  ;;  %8127 = vmatpush3.bf16.msra.mxu0 %v9181_v42 }
 0x4b4   :  { %8122 = vmatprep.subr.bf16.mxu1 %v8634_v12  ;;  %8128 = vmatprep.subr.bf16.mxu0 %v8634_v12 }
 0x4b5   :  { %7504 = vmatprep.mubr.msk.f32.mxu1 %vm8635_vm2, %v8636_v19  ;;  %7515 = vmatprep.mubr.msk.f32.mxu0 %vm8635_vm2, %v8636_v19 }
 0x4b7   :  { %8124 = vmatpush3.bf16.msra.mxu1 %v9191_v51  ;;  %8130 = vmatpush3.bf16.msra.mxu0 %v9193_v52 }
 0x4b8   :  { %8131 = vmatprep.subr.bf16.mxu1 %v8634_v12  ;;  %8137 = vmatprep.subr.bf16.mxu0 %v8634_v12 }
 0x4ba   :  { %7505 = vmatmul.mubr.msk.f32.vlgmr.msra.gmra.mrb[30].mxu1 %vm355_vm3, %v9147_v11  ;;  %7516 = vmatmul.mubr.msk.f32.vlgmr.msra.gmra.mrb[32].mxu0 %vm355_vm3, %v9147_v11 }
 0x4bb   :  { %8133 = vmatpush3.bf16.msra.mxu1 %v9203_v18  ;;  %7526 = vmatprep.mubr.msk.f32.mxu1 %vm8635_vm2, %v8636_v19 }
 0x4bc   :  { %8134 = vmatprep.subr.bf16.mxu1 %v8634_v12  ;;  %7537 = vmatprep.mubr.msk.f32.mxu0 %vm8635_vm2, %v8636_v19 }
 0x4bd   :  { %8139 = vmatpush3.bf16.msra.mxu0 %v9225_v45 }
 0x4be   :  { %8140 = vmatprep.subr.bf16.mxu0 %v8634_v12 }
 0x4bf   :  { %8136 = vmatpush3.bf16.msra.mxu1 %v9212_v31 }
 0x4c0   :  { %8143 = vmatprep.subr.bf16.mxu1 %v8634_v12 }
 0x4c1   :  { %8142 = vmatpush3.bf16.msra.mxu0 %v9233_v60 }
 0x4c2   :  { %7527 = vmatmul.mubr.msk.f32.vlgmr.msra.gmra.mrb[32].mxu1 %vm355_vm3, %v9147_v11  ;;  %8149 = vmatprep.subr.bf16.mxu0 %v8634_v12 }
 0x4c3   :  { %7548 = vmatprep.mubr.msk.f32.mxu1 %vm8635_vm2, %v8636_v19  ;;  %8145 = vmatpush3.bf16.msra.mxu1 %v9227_v50 }
 0x4c4   :  { %8146 = vmatprep.subr.bf16.mxu1 %v8634_v12 }
 0x4c7   :  { %8148 = vmatpush3.bf16.msra.mxu1 %v9235_v63 }
 0x4c8   :  { %8161 = vmatprep.subr.bf16.mxu1 %v8634_v12 }
 0x57d   :  { %v3139_v1 = vpop.f32.mrb[28].mxu1  ;;  %v3290_v49 = vpop.f32.mrb[28].mxu0 }
 0x57e   :  { %v7462_v40 = vpop.f32.mrb[29].mxu1  ;;  %v7484_v53 = vpop.f32.mrb[29].mxu0  ;;  %v8350_v61 = vadd.f32 %v8956_v59, %v3290_v49  ;;  %v3140_v6 = vadd.f32 %v8970_v46, %v3139_v1  ;;  %v3813_v1 = vld [vmem:[#allocation5 + $0x40] sm:$0xff] }
 0x57f   :  { %v3814_v40 = vld [vmem:[#allocation5 + $0x48] sm:$0xff]  ;;  %v3971_v53 = vld [vmem:[#allocation7 + $0x20] sm:$0xff] }
 0x580   :  { %v6626_v10 = vmul.f32 -1.442695, %v8350_v61 }
 0x585   :  { %v3216_v2 = vpop.f32.mrb[26].mxu1  ;;  %v3371_v3 = vpop.f32.mrb[30].mxu0 }
 0x586   :  { %v8349_v29 = vadd.f32 %v8951_v58, %v3216_v2  ;;  %v7473_v5 = vpop.f32.mrb[27].mxu1  ;;  %v7495_v7 = vpop.f32.mrb[31].mxu0  ;;  %v3372_v33 = vadd.f32 %v8965_v39, %v3371_v3  ;;  %v3972_v2 = vld [vmem:[#allocation7 + $0x28] sm:$0xff] }
 0x587   :  { %v9260_v7 = vpack.c.bf16 %v3814_v40, %v3813_v1 }
 0x588   :  { %v6625_v8 = vmul.f32 -1.442695, %v8349_v29 }
 0x58a   :  { %8469 = vpow2.f32 %v6625_v8  ;;  %v9262_v8 = vpack.c.bf16 %v3972_v2, %v3971_v53 }
 0x58b   :  { %8471 = vpow2.f32 %v6626_v10  ;;  %v3816_v10 = vld [vmem:[#allocation5 + $0x58] sm:$0xff] }
 0x58d   :  { %v3467_v13 = vpop.f32.mrb[30].mxu1  ;;  %v3541_v14 = vpop.f32.mrb[32].mxu0 }
 0x58e   :  { %v3626_v20 = vadd.f32 %v3467_v13, %v8839_v43  ;;  %v7506_v21 = vpop.f32.mrb[31].mxu1  ;;  %v7517_v24 = vpop.f32.mrb[33].mxu0  ;;  %v3633_v28 = vadd.f32 %v3541_v14, %v8837_v41  ;;  %v3973_v13 = vld [vmem:[#allocation7 + $0x30] sm:$0xff]  ;;  %v3974_v14 = vld [vmem:[#allocation7 + $0x38] sm:$0xff] }
 0x58f   :  { %v3894_v21 = vld [vmem:[#allocation7] sm:$0xff]  ;;  %v3895_v24 = vld [vmem:[#allocation7 + $0x8] sm:$0xff] }
 0x590   :  { %v6631_v9 = vmul.f32 -1.442695, %v3626_v20  ;;  %v6632_v16 = vmul.f32 -1.442695, %v3633_v28  ;;  %v9274_v20 = vpack.c.bf16 %v3974_v14, %v3973_v13  ;;  %v4046_v28 = vld [vmem:[#allocation7 + $0x48] sm:$0xff] }
 0x592   :  { %8473 = vpow2.f32 %v6631_v9  ;;  %v4045_v9 = vld [vmem:[#allocation7 + $0x40] sm:$0xff] }
 0x594   :  { %v8470_v0 = vpop.eup %8469 }
 0x595   :  { %v3379_v58 = vadd.f32 1.0, %v8470_v0  ;;  %v3622_v30 = vpop.f32.mrb[32].mxu1  ;;  %v8472_v59 = vpop.eup %8471  ;;  %v9284_v0 = vpack.c.bf16 %v3895_v24, %v3894_v21  ;;  %v9367_v21 = vld [vmem:[%s9618_s8] ss:$0 sm:$0xff] }
 0x596   :  { %v7528_v27 = vpop.f32.mrb[33].mxu1  ;;  %v3386_v25 = vadd.f32 1.0, %v8472_v59  ;;  %v3623_v26 = vadd.f32 %v9250_v36, %v3622_v30  ;;  %v3897_v30 = vld [vmem:[#allocation7 + $0x18] sm:$0xff] }
 0x597   :  { %8475 = vrcp.f32 %v3379_v58  ;;  %v9286_v58 = vpack.c.bf16 %v4046_v28, %v4045_v9  ;;  %v4047_v27 = vld [vmem:[#allocation7 + $0x50] sm:$0xff]  ;;  %v4048_v59 = vld [vmem:[#allocation7 + $0x58] sm:$0xff] }
 0x598   :  { %8477 = vpow2.f32 %v6632_v16  ;;  %v3896_v16 = vld [vmem:[#allocation7 + $0x10] sm:$0xff] }
 0x599   :  { %v9372_v28 = vld [vmem:[%s9617_s7 + $0x2] ss:$0 sm:$0xff] }
 0x59c   :  { %v8474_v4 = vpop.eup %8473 }
 0x59d   :  { %v3630_v23 = vadd.f32 1.0, %v8474_v4  ;;  %v9296_v4 = vpack.c.bf16 %v3897_v30, %v3896_v16 }
 0x59f   :  { %8479 = vrcp.f32 %v3630_v23  ;;  %v9298_v23 = vpack.c.bf16 %v4048_v59, %v4047_v27 }
 0x5a0   :  { %8481 = vrcp.f32 %v3386_v25 }
 0x5a1   :  { %v8476_v44 = vpop.eup %8475 }
 0x5a2   :  { %v3389_v54 = vmul.f32 %v8476_v44, %v3372_v33  ;;  %v8478_v15 = vpop.eup %8477 }
 0x5a3   :  { %v3637_v22 = vadd.f32 1.0, %v8478_v15  ;;  %v9358_v15 = vld [vmem:[%s9617_s7 + $0x1] ss:$0 sm:$0xff] }
 0x5a4   :  { %v3390_v17 = vadd.f32 %v3389_v54, %v3140_v6  ;;  %v9353_v54 = vld [vmem:[%s9617_s7] ss:$0 sm:$0xff] }
 0x5a6   :  { %8483 = vtanh.f32 %v3390_v17 }
 0x5a7   :  { %8485 = vrcp.f32 %v3637_v22 }
 0x5a9   :  { %v8480_v32 = vpop.eup %8479 }
 0x5aa   :  { %v3640_v37 = vmul.f32 %v8480_v32, %v3623_v26  ;;  %v8482_v39 = vpop.eup %8481 }
 0x5ab   :  { %v3392_v46 = vsub.f32 1.0, %v8482_v39  ;;  %v3394_v56 = vmul.f32 %v8482_v39, %v9143_v34  ;;  %v3815_v34 = vld [vmem:[#allocation5 + $0x50] sm:$0xff] }
 0x5ac   :  { %v3641_v38 = vadd.f32 %v3640_v37, %v8844_v47 }
 0x5ae   :  { %8487 = vtanh.f32 %v3641_v38 }
 0x5b0   :  { %v8484_v48 = vpop.eup %8483 }
 0x5b1   :  { %v3393_v55 = vmul.f32 %v8484_v48, %v3392_v46  ;;  %v8486_v62 = vpop.eup %8485 }
 0x5b2   :  { %v3643_v49 = vsub.f32 1.0, %v8486_v62  ;;  %v3646_v29 = vmul.f32 %v8486_v62, %v9147_v11  ;;  %v9272_v11 = vpack.c.bf16 %v3816_v10, %v3815_v34 }
 0x5b3   :  { %v9255_v57 = vadd.f32 %v3394_v56, %v3393_v55 }
 0x5b5   :  { %3396 = vst.msk [vmem:[#allocation2 + $0x6] sm:$0x3] %vm1109_vm4, %v9255_v57 }
 0x5b8   :  { %v8488_v3 = vpop.eup %8487 }
 0x5b9   :  { %v3644_v5 = vmul.f32 %v8488_v3, %v3643_v49 }
 0x5bb   :  { %v9264_v61 = vadd.f32 %v3646_v29, %v3644_v5 }
 0x5bd   :  { %7538 = vmatmul.mubr.msk.f32.vlgmr.msra.gmra.mrb[34].mxu0 %vm355_vm3, %v9264_v61  ;;  %7549 = vmatmul.mubr.msk.f32.vlgmr.msra.gmra.mrb[34].mxu1 %vm355_vm3, %v9264_v61 }
 0x5be   :  { %8151 = vmatpush3.bf16.msra.mxu0 %v9260_v7  ;;  %8163 = vmatpush3.bf16.msra.mxu1 %v9262_v8 }
 0x5bf   :  { %8152 = vmatprep.subr.bf16.mxu0 %v8634_v12  ;;  %8164 = vmatprep.subr.bf16.mxu1 %v8634_v12 }
 0x5c0   :  { %7559 = vmatprep.mubr.msk.f32.mxu0 %vm8635_vm2, %v8636_v19  ;;  %7581 = vmatprep.mubr.msk.f32.mxu1 %vm8635_vm2, %v8636_v19 }
 0x5c2   :  { %8154 = vmatpush3.bf16.msra.mxu0 %v9272_v11  ;;  %8166 = vmatpush3.bf16.msra.mxu1 %v9274_v20 }
 0x5c3   :  { %8155 = vmatprep.subr.bf16.mxu0 %v8634_v12  ;;  %8167 = vmatprep.subr.bf16.mxu1 %v8634_v12 }
 0x5c5   :  { %7560 = vmatmul.mubr.msk.f32.vlgmr.msra.gmra.mrb[36].mxu0 %vm355_vm3, %v9264_v61  ;;  %7582 = vmatmul.mubr.msk.f32.vlgmr.msra.gmra.mrb[34].mxu1 %vm355_vm3, %v9255_v57 }
 0x5c6   :  { %8157 = vmatpush3.bf16.msra.mxu0 %v9284_v0  ;;  %8169 = vmatpush3.bf16.msra.mxu1 %v9286_v58 }
 0x5c7   :  { %8158 = vmatprep.subr.bf16.mxu0 %v8634_v12  ;;  %8170 = vmatprep.subr.bf16.mxu1 %v8634_v12 }
 0x5c8   :  { %7570 = vmatprep.mubr.msk.f32.mxu0 %vm8635_vm2, %v8636_v19  ;;  %7592 = vmatprep.mubr.msk.f32.mxu1 %vm8635_vm2, %v8636_v19 }
 0x5ca   :  { %8160 = vmatpush3.bf16.msra.mxu0 %v9296_v4  ;;  %8172 = vmatpush3.bf16.msra.mxu1 %v9298_v23 }
 0x5cb   :  { %8173 = vmatprep.subr.bf16.mxu0 %v8634_v12  ;;  %8179 = vmatprep.subr.bf16.mxu1 %v8634_v12 }
 0x5cd   :  { %7571 = vmatmul.mubr.msk.f32.vlgmr.msra.gmra.mrb[34].mxu0 %vm355_vm3, %v9255_v57  ;;  %7593 = vmatmul.mubr.msk.f32.vlgmr.msra.gmra.mrb[36].mxu1 %vm355_vm3, %v9255_v57 }
 0x5ce   :  { %8175 = vmatpush3.bf16.msra.mxu0 %v9179_v35  ;;  %8181 = vmatpush3.bf16.msra.mxu1 %v9181_v42 }
 0x5cf   :  { %8176 = vmatprep.subr.bf16.mxu0 %v8634_v12  ;;  %8182 = vmatprep.subr.bf16.mxu1 %v8634_v12 }
 0x5d0   :  { %7603 = vmatprep.mubr.msk.f32.mxu0 %vm8635_vm2, %v8636_v19  ;;  %7614 = vmatprep.mubr.msk.f32.mxu1 %vm8635_vm2, %v8636_v19 }
 0x5d2   :  { %8178 = vmatpush3.bf16.msra.mxu0 %v9191_v51  ;;  %8184 = vmatpush3.bf16.msra.mxu1 %v9193_v52 }
 0x5d3   :  { %8185 = vmatprep.subr.bf16.mxu0 %v8634_v12  ;;  %8191 = vmatprep.subr.bf16.mxu1 %v8634_v12 }
 0x5d5   :  { %7604 = vmatmul.mubr.msk.f32.vlgmr.msra.gmra.mrb[38].mxu0 %vm355_vm3, %v9264_v61  ;;  %7615 = vmatmul.mubr.msk.f32.vlgmr.msra.gmra.mrb[38].mxu1 %vm355_vm3, %v9264_v61 }
 0x5d6   :  { %8187 = vmatpush3.bf16.msra.mxu0 %v9203_v18  ;;  %7625 = vmatprep.mubr.msk.f32.mxu0 %vm8635_vm2, %v8636_v19 }
 0x5d7   :  { %8188 = vmatprep.subr.bf16.mxu0 %v8634_v12  ;;  %8193 = vmatpush3.bf16.msra.mxu1 %v9225_v45 }
 0x5d8   :  { %8194 = vmatprep.subr.bf16.mxu1 %v8634_v12  ;;  %7636 = vmatprep.mubr.msk.f32.mxu1 %vm8635_vm2, %v8636_v19 }
 0x5da   :  { %8190 = vmatpush3.bf16.msra.mxu0 %v9212_v31 }
 0x5db   :  { %8197 = vmatprep.subr.bf16.mxu0 %v8634_v12  ;;  %8196 = vmatpush3.bf16.msra.mxu1 %v9233_v60 }
 0x5dc   :  { %8203 = vmatprep.subr.bf16.mxu1 %v8634_v12 }
 0x5dd   :  { %7626 = vmatmul.mubr.msk.f32.vlgmr.msra.gmra.mrb[40].mxu0 %vm355_vm3, %v9264_v61 }
 0x5de   :  { %8199 = vmatpush3.bf16.msra.mxu0 %v9227_v50  ;;  %7647 = vmatprep.mubr.msk.f32.mxu0 %vm8635_vm2, %v8636_v19 }
 0x5df   :  { %8200 = vmatprep.subr.bf16.mxu0 %v8634_v12 }
 0x5e2   :  { %8202 = vmatpush3.bf16.msra.mxu0 %v9235_v63 }
 0x5e3   :  { %8215 = vmatprep.subr.bf16.mxu0 %v8634_v12 }
 0x698   :  { %v3890_v25 = vpop.f32.mrb[36].mxu0  ;;  %v4041_v33 = vpop.f32.mrb[34].mxu1 }
 0x699   :  { %v7561_v44 = vpop.f32.mrb[37].mxu0  ;;  %v7583_v6 = vpop.f32.mrb[35].mxu1  ;;  %v8352_v39 = vadd.f32 %v9358_v15, %v4041_v33  ;;  %v3891_v33 = vadd.f32 %v9372_v28, %v3890_v25 }
 0x69b   :  { %v6646_v46 = vmul.f32 -1.442695, %v8352_v39  ;;  %v4405_v39 = vrot.slane %v9264_v61, 6 }
 0x6a0   :  { %v3967_v17 = vpop.f32.mrb[34].mxu0  ;;  %v4122_v22 = vpop.f32.mrb[36].mxu1 }
 0x6a1   :  { %v8351_v26 = vadd.f32 %v9353_v54, %v3967_v17  ;;  %v7572_v32 = vpop.f32.mrb[35].mxu0  ;;  %v7594_v37 = vpop.f32.mrb[37].mxu1  ;;  %v4123_v30 = vadd.f32 %v9367_v21, %v4122_v22 }
 0x6a3   :  { %v6645_v38 = vmul.f32 -1.442695, %v8351_v26 }
 0x6a5   :  { %8489 = vpow2.f32 %v6645_v38 }
 0x6a6   :  { %8491 = vpow2.f32 %v6646_v46 }
 0x6a8   :  { %v4218_v48 = vpop.f32.mrb[38].mxu0  ;;  %v4292_v55 = vpop.f32.mrb[38].mxu1 }
 0x6a9   :  { %v4378_v56 = vrot.slane %v4218_v48, 6  ;;  %v4388_v62 = vrot.slane %v4292_v55, 6  ;;  %v7605_v1 = vpop.f32.mrb[39].mxu0  ;;  %v7616_v49 = vpop.f32.mrb[39].mxu1 }
 0x6ab   :  { %v4380_v40 = vadd.f32 %v4378_v56, %v8839_v43  ;;  %v4390_v53 = vadd.f32 %v4388_v62, %v8837_v41 }
 0x6ad   :  { %v6651_v2 = vmul.f32 -1.442695, %v4380_v40  ;;  %v6652_v3 = vmul.f32 -1.442695, %v4390_v53 }
 0x6af   :  { %v8490_v29 = vpop.eup %8489  ;;  %8493 = vpow2.f32 %v6651_v2 }
 0x6b0   :  { %v4130_v5 = vadd.f32 1.0, %v8490_v29  ;;  %8495 = vpow2.f32 %v6652_v3  ;;  %v4373_v34 = vpop.f32.mrb[40].mxu0  ;;  %v8492_v13 = vpop.eup %8491 }
 0x6b1   :  { %v7627_v10 = vpop.f32.mrb[41].mxu0  ;;  %v4137_v14 = vadd.f32 1.0, %v8492_v13  ;;  %v4374_v17 = vadd.f32 %v9250_v36, %v4373_v34 }
 0x6b2   :  { %8497 = vrcp.f32 %v4130_v5 }
 0x6b3   :  { %8499 = vrcp.f32 %v4137_v14  ;;  %v4398_v32 = vrot.slane %v4374_v17, 6 }
 0x6b9   :  { %v8494_v24 = vpop.eup %8493 }
 0x6ba   :  { %v8496_v9 = vpop.eup %8495  ;;  %v4384_v16 = vadd.f32 1.0, %v8494_v24 }
 0x6bb   :  { %v4394_v27 = vadd.f32 1.0, %v8496_v9 }
 0x6bc   :  { %v8498_v59 = vpop.eup %8497  ;;  %8501 = vrcp.f32 %v4384_v16 }
 0x6bd   :  { %v4140_v44 = vmul.f32 %v8498_v59, %v4123_v30  ;;  %8503 = vrcp.f32 %v4394_v27  ;;  %v8500_v26 = vpop.eup %8499 }
 0x6be   :  { %v4143_v55 = vsub.f32 1.0, %v8500_v26  ;;  %v4145_v62 = vmul.f32 %v8500_v26, %v9255_v57 }
 0x6bf   :  { %v4141_v6 = vadd.f32 %v4140_v44, %v3891_v33 }
 0x6c1   :  { %8505 = vtanh.f32 %v4141_v6 }
 0x6c6   :  { %v8502_v37 = vpop.eup %8501 }
 0x6c7   :  { %v8504_v38 = vpop.eup %8503  ;;  %v4400_v46 = vmul.f32 %v8502_v37, %v4398_v32 }
 0x6c8   :  { %v4407_v48 = vmul.f32 %v8504_v38, %v4405_v39  ;;  %v4403_v49 = vsub.f32 1.0, %v8504_v38 }
 0x6c9   :  { %v4401_v22 = vadd.f32 %v4400_v46, %v8844_v47 }
 0x6cb   :  { %v8506_v56 = vpop.eup %8505  ;;  %8507 = vtanh.f32 %v4401_v22 }
 0x6cc   :  { %v4144_v25 = vmul.f32 %v8506_v56, %v4143_v55 }
 0x6ce   :  { %v9380_v1 = vadd.f32 %v4145_v62, %v4144_v25 }
 0x6d0   :  { %4147 = vst.msk [vmem:[#allocation2 + $0x8] sm:$0x3] %vm1109_vm4, %v9380_v1 }
 0x6d5   :  { %v8508_v40 = vpop.eup %8507 }
 0x6d6   :  { %v4404_v53 = vmul.f32 %v8508_v40, %v4403_v49 }
 0x6d8   :  { %v9384_v61 = vadd.f32 %v4407_v48, %v4404_v53 }
 0x6da   :  { %v4421_v2 = vrot.slane %v9384_v61, 2 }
 0x6dc   :  { %7637 = vmatmul.mubr.msk.f32.vlgmr.msra.gmra.mrb[40].mxu1 %vm355_vm3, %v4421_v2  ;;  %7648 = vmatmul.mubr.msk.f32.vlgmr.msra.gmra.mrb[42].mxu0 %vm355_vm3, %v4421_v2 }
 0x6dd   :  { %8205 = vmatpush3.bf16.msra.mxu1 %v9260_v7  ;;  %8217 = vmatpush3.bf16.msra.mxu0 %v9262_v8 }
 0x6de   :  { %8206 = vmatprep.subr.bf16.mxu1 %v8634_v12  ;;  %8218 = vmatprep.subr.bf16.mxu0 %v8634_v12 }
 0x6df   :  { %7658 = vmatprep.mubr.msk.f32.mxu1 %vm8635_vm2, %v8636_v19  ;;  %7680 = vmatprep.mubr.msk.f32.mxu0 %vm8635_vm2, %v8636_v19 }
 0x6e1   :  { %8208 = vmatpush3.bf16.msra.mxu1 %v9272_v11  ;;  %8220 = vmatpush3.bf16.msra.mxu0 %v9274_v20 }
 0x6e2   :  { %8209 = vmatprep.subr.bf16.mxu1 %v8634_v12  ;;  %8221 = vmatprep.subr.bf16.mxu0 %v8634_v12 }
 0x6e4   :  { %7659 = vmatmul.mubr.msk.f32.vlgmr.msra.gmra.mrb[42].mxu1 %vm355_vm3, %v4421_v2  ;;  %7681 = vmatmul.mubr.msk.f32.vlgmr.msra.gmra.mrb[42].mxu0 %vm355_vm3, %v9380_v1 }
 0x6e5   :  { %8211 = vmatpush3.bf16.msra.mxu1 %v9284_v0  ;;  %8223 = vmatpush3.bf16.msra.mxu0 %v9286_v58 }
 0x6e6   :  { %8212 = vmatprep.subr.bf16.mxu1 %v8634_v12  ;;  %8224 = vmatprep.subr.bf16.mxu0 %v8634_v12 }
 0x6e7   :  { %7669 = vmatprep.mubr.msk.f32.mxu1 %vm8635_vm2, %v8636_v19  ;;  %7691 = vmatprep.mubr.msk.f32.mxu0 %vm8635_vm2, %v8636_v19 }
 0x6e9   :  { %8214 = vmatpush3.bf16.msra.mxu1 %v9296_v4  ;;  %8226 = vmatpush3.bf16.msra.mxu0 %v9298_v23 }
 0x6ea   :  { %8227 = vmatprep.subr.bf16.mxu1 %v8634_v12  ;;  %8233 = vmatprep.subr.bf16.mxu0 %v8634_v12 }
 0x6ec   :  { %7670 = vmatmul.mubr.msk.f32.vlgmr.msra.gmra.mrb[40].mxu1 %vm355_vm3, %v9380_v1  ;;  %7692 = vmatmul.mubr.msk.f32.vlgmr.msra.gmra.mrb[44].mxu0 %vm355_vm3, %v9380_v1 }
 0x6ed   :  { %8229 = vmatpush3.bf16.msra.mxu1 %v9179_v35  ;;  %8235 = vmatpush3.bf16.msra.mxu0 %v9181_v42 }
 0x6ee   :  { %8230 = vmatprep.subr.bf16.mxu1 %v8634_v12  ;;  %8236 = vmatprep.subr.bf16.mxu0 %v8634_v12 }
 0x6ef   :  { %7702 = vmatprep.mubr.msk.f32.mxu1 %vm8635_vm2, %v8636_v19  ;;  %7713 = vmatprep.mubr.msk.f32.mxu0 %vm8635_vm2, %v8636_v19 }
 0x6f1   :  { %8232 = vmatpush3.bf16.msra.mxu1 %v9191_v51  ;;  %8238 = vmatpush3.bf16.msra.mxu0 %v9193_v52 }
 0x6f2   :  { %8239 = vmatprep.subr.bf16.mxu1 %v8634_v12  ;;  %8245 = vmatprep.subr.bf16.mxu0 %v8634_v12 }
 0x6f4   :  { %7703 = vmatmul.mubr.msk.f32.vlgmr.msra.gmra.mrb[44].mxu1 %vm355_vm3, %v4421_v2  ;;  %7714 = vmatmul.mubr.msk.f32.vlgmr.msra.gmra.mrb[46].mxu0 %vm355_vm3, %v4421_v2 }
 0x6f5   :  { %8241 = vmatpush3.bf16.msra.mxu1 %v9203_v18  ;;  %7724 = vmatprep.mubr.msk.f32.mxu1 %vm8635_vm2, %v8636_v19 }
 0x6f6   :  { %8242 = vmatprep.subr.bf16.mxu1 %v8634_v12  ;;  %8247 = vmatpush3.bf16.msra.mxu0 %v9225_v45 }
 0x6f7   :  { %8248 = vmatprep.subr.bf16.mxu0 %v8634_v12  ;;  %7735 = vmatprep.mubr.msk.f32.mxu0 %vm8635_vm2, %v8636_v19 }
 0x6f9   :  { %8244 = vmatpush3.bf16.msra.mxu1 %v9212_v31 }
 0x6fa   :  { %8251 = vmatprep.subr.bf16.mxu1 %v8634_v12  ;;  %8250 = vmatpush3.bf16.msra.mxu0 %v9233_v60 }
 0x6fb   :  { %8257 = vmatprep.subr.bf16.mxu0 %v8634_v12 }
 0x6fc   :  { %7725 = vmatmul.mubr.msk.f32.vlgmr.msra.gmra.mrb[46].mxu1 %vm355_vm3, %v4421_v2 }
 0x6fd   :  { %8253 = vmatpush3.bf16.msra.mxu1 %v9227_v50  ;;  %7746 = vmatprep.mubr.msk.f32.mxu1 %vm8635_vm2, %v8636_v19 }
 0x6fe   :  { %8254 = vmatprep.subr.bf16.mxu1 %v8634_v12 }
 0x701   :  { %8256 = vmatpush3.bf16.msra.mxu1 %v9235_v63 }
 0x702   :  { %8269 = vmatprep.subr.bf16.mxu1 %v8634_v12 }
 0x7b7   :  { %v4652_v57 = vpop.f32.mrb[42].mxu1  ;;  %v4803_v3 = vpop.f32.mrb[42].mxu0 }
 0x7b8   :  { %v7660_v29 = vpop.f32.mrb[43].mxu1  ;;  %v7682_v5 = vpop.f32.mrb[43].mxu0  ;;  %v8354_v9 = vadd.f32 %v9358_v15, %v4803_v3  ;;  %v4653_v3 = vadd.f32 %v9372_v28, %v4652_v57 }
 0x7ba   :  { %v6666_v30 = vmul.f32 -1.442695, %v8354_v9  ;;  %v5167_v9 = vrot.slane %v9384_v61, 6 }
 0x7bf   :  { %v4729_v34 = vpop.f32.mrb[40].mxu1  ;;  %v4884_v10 = vpop.f32.mrb[44].mxu0 }
 0x7c0   :  { %v8353_v13 = vadd.f32 %v9353_v54, %v4729_v34  ;;  %v7671_v14 = vpop.f32.mrb[41].mxu1  ;;  %v7693_v24 = vpop.f32.mrb[45].mxu0  ;;  %v4885_v40 = vadd.f32 %v9367_v21, %v4884_v10 }
 0x7c2   :  { %v6665_v16 = vmul.f32 -1.442695, %v8353_v13 }
 0x7c4   :  { %8509 = vpow2.f32 %v6665_v16 }
 0x7c5   :  { %8511 = vpow2.f32 %v6666_v30 }
 0x7c7   :  { %v4980_v27 = vpop.f32.mrb[44].mxu1  ;;  %v5054_v59 = vpop.f32.mrb[46].mxu0 }
 0x7c8   :  { %v5140_v33 = vrot.slane %v4980_v27, 4  ;;  %v5150_v44 = vrot.slane %v5054_v59, 4  ;;  %v7704_v6 = vpop.f32.mrb[45].mxu1  ;;  %v7715_v17 = vpop.f32.mrb[47].mxu0 }
 0x7ca   :  { %v5142_v26 = vadd.f32 %v5140_v33, %v8839_v43  ;;  %v5152_v32 = vadd.f32 %v5150_v44, %v8837_v41 }
 0x7cc   :  { %v6671_v37 = vmul.f32 -1.442695, %v5142_v26  ;;  %v6672_v39 = vmul.f32 -1.442695, %v5152_v32 }
 0x7ce   :  { %v8510_v38 = vpop.eup %8509  ;;  %8513 = vpow2.f32 %v6671_v37 }
 0x7cf   :  { %v4892_v46 = vadd.f32 1.0, %v8510_v38  ;;  %8515 = vpow2.f32 %v6672_v39  ;;  %v5135_v48 = vpop.f32.mrb[46].mxu1  ;;  %v8512_v55 = vpop.eup %8511 }
 0x7d0   :  { %v7726_v22 = vpop.f32.mrb[47].mxu1  ;;  %v4899_v56 = vadd.f32 1.0, %v8512_v55  ;;  %v5136_v34 = vadd.f32 %v9250_v36, %v5135_v48 }
 0x7d1   :  { %8517 = vrcp.f32 %v4892_v46 }
 0x7d2   :  { %8519 = vrcp.f32 %v4899_v56  ;;  %v5160_v14 = vrot.slane %v5136_v34, 4 }
 0x7d8   :  { %v8514_v25 = vpop.eup %8513 }
 0x7d9   :  { %v8516_v62 = vpop.eup %8515  ;;  %v5146_v49 = vadd.f32 1.0, %v8514_v25 }
 0x7da   :  { %v5156_v53 = vadd.f32 1.0, %v8516_v62 }
 0x7db   :  { %v8518_v2 = vpop.eup %8517  ;;  %8521 = vrcp.f32 %v5146_v49 }
 0x7dc   :  { %v4902_v29 = vmul.f32 %v8518_v2, %v4885_v40  ;;  %8523 = vrcp.f32 %v5156_v53  ;;  %v8520_v13 = vpop.eup %8519 }
 0x7dd   :  { %v4905_v59 = vsub.f32 1.0, %v8520_v13  ;;  %v4907_v44 = vmul.f32 %v8520_v13, %v9380_v1 }
 0x7de   :  { %v4903_v5 = vadd.f32 %v4902_v29, %v4653_v3 }
 0x7e0   :  { %8525 = vtanh.f32 %v4903_v5 }
 0x7e5   :  { %v8522_v24 = vpop.eup %8521 }
 0x7e6   :  { %v8524_v16 = vpop.eup %8523  ;;  %v5162_v30 = vmul.f32 %v8522_v24, %v5160_v14 }
 0x7e7   :  { %v5169_v27 = vmul.f32 %v8524_v16, %v5167_v9  ;;  %v5165_v17 = vsub.f32 1.0, %v8524_v16 }
 0x7e8   :  { %v5163_v10 = vadd.f32 %v5162_v30, %v8844_v47 }
 0x7ea   :  { %v8526_v33 = vpop.eup %8525  ;;  %8527 = vtanh.f32 %v5163_v10 }
 0x7eb   :  { %v4906_v57 = vmul.f32 %v8526_v33, %v4905_v59 }
 0x7ed   :  { %v9463_v6 = vadd.f32 %v4907_v44, %v4906_v57 }
 0x7ef   :  { %4909 = vst.msk [vmem:[#allocation2 + $0xa] sm:$0x3] %vm1109_vm4, %v9463_v6 }
 0x7f4   :  { %v8528_v26 = vpop.eup %8527 }
 0x7f5   :  { %v5166_v32 = vmul.f32 %v8528_v26, %v5165_v17 }
 0x7f7   :  { %v9467_v61 = vadd.f32 %v5169_v27, %v5166_v32 }
 0x7f9   :  { %v5183_v37 = vrot.slane %v9467_v61, 4  ;;  %v5929_v44 = vrot.slane %v9467_v61, 6 }
 0x7fb   :  { %7736 = vmatmul.mubr.msk.f32.vlgmr.msra.gmra.mrb[48].mxu0 %vm355_vm3, %v5183_v37  ;;  %7747 = vmatmul.mubr.msk.f32.vlgmr.msra.gmra.mrb[48].mxu1 %vm355_vm3, %v5183_v37 }
 0x7fc   :  { %8259 = vmatpush3.bf16.msra.mxu0 %v9260_v7  ;;  %8271 = vmatpush3.bf16.msra.mxu1 %v9262_v8 }
 0x7fd   :  { %8260 = vmatprep.subr.bf16.mxu0 %v8634_v12  ;;  %8272 = vmatprep.subr.bf16.mxu1 %v8634_v12 }
 0x7fe   :  { %7757 = vmatprep.mubr.msk.f32.mxu0 %vm8635_vm2, %v8636_v19  ;;  %7779 = vmatprep.mubr.msk.f32.mxu1 %vm8635_vm2, %v8636_v19 }
 0x800   :  { %8262 = vmatpush3.bf16.msra.mxu0 %v9272_v11  ;;  %8274 = vmatpush3.bf16.msra.mxu1 %v9274_v20 }
 0x801   :  { %8263 = vmatprep.subr.bf16.mxu0 %v8634_v12  ;;  %8275 = vmatprep.subr.bf16.mxu1 %v8634_v12 }
 0x803   :  { %7758 = vmatmul.mubr.msk.f32.vlgmr.msra.gmra.mrb[50].mxu0 %vm355_vm3, %v5183_v37  ;;  %7780 = vmatmul.mubr.msk.f32.vlgmr.msra.gmra.mrb[48].mxu1 %vm355_vm3, %v9463_v6 }
 0x804   :  { %8265 = vmatpush3.bf16.msra.mxu0 %v9284_v0  ;;  %8277 = vmatpush3.bf16.msra.mxu1 %v9286_v58 }
 0x805   :  { %8266 = vmatprep.subr.bf16.mxu0 %v8634_v12  ;;  %8278 = vmatprep.subr.bf16.mxu1 %v8634_v12 }
 0x806   :  { %7768 = vmatprep.mubr.msk.f32.mxu0 %vm8635_vm2, %v8636_v19  ;;  %7790 = vmatprep.mubr.msk.f32.mxu1 %vm8635_vm2, %v8636_v19 }
 0x808   :  { %8268 = vmatpush3.bf16.msra.mxu0 %v9296_v4  ;;  %8280 = vmatpush3.bf16.msra.mxu1 %v9298_v23 }
 0x809   :  { %8281 = vmatprep.subr.bf16.mxu0 %v8634_v12  ;;  %8287 = vmatprep.subr.bf16.mxu1 %v8634_v12 }
 0x80b   :  { %7769 = vmatmul.mubr.msk.f32.vlgmr.msra.gmra.mrb[48].mxu0 %vm355_vm3, %v9463_v6  ;;  %7791 = vmatmul.mubr.msk.f32.vlgmr.msra.gmra.mrb[50].mxu1 %vm355_vm3, %v9463_v6 }
 0x80c   :  { %8283 = vmatpush3.bf16.msra.mxu0 %v9179_v35  ;;  %8289 = vmatpush3.bf16.msra.mxu1 %v9181_v42 }
 0x80d   :  { %8284 = vmatprep.subr.bf16.mxu0 %v8634_v12  ;;  %8290 = vmatprep.subr.bf16.mxu1 %v8634_v12 }
 0x80e   :  { %7801 = vmatprep.mubr.msk.f32.mxu0 %vm8635_vm2, %v8636_v19  ;;  %7812 = vmatprep.mubr.msk.f32.mxu1 %vm8635_vm2, %v8636_v19 }
 0x810   :  { %8286 = vmatpush3.bf16.msra.mxu0 %v9191_v51  ;;  %8292 = vmatpush3.bf16.msra.mxu1 %v9193_v52 }
 0x811   :  { %8293 = vmatprep.subr.bf16.mxu0 %v8634_v12  ;;  %8299 = vmatprep.subr.bf16.mxu1 %v8634_v12 }
 0x813   :  { %7802 = vmatmul.mubr.msk.f32.vlgmr.msra.gmra.mrb[52].mxu0 %vm355_vm3, %v5183_v37  ;;  %7813 = vmatmul.mubr.msk.f32.vlgmr.msra.gmra.mrb[52].mxu1 %vm355_vm3, %v5183_v37 }
 0x814   :  { %8295 = vmatpush3.bf16.msra.mxu0 %v9203_v18  ;;  %7823 = vmatprep.mubr.msk.f32.mxu0 %vm8635_vm2, %v8636_v19 }
 0x815   :  { %8296 = vmatprep.subr.bf16.mxu0 %v8634_v12  ;;  %8301 = vmatpush3.bf16.msra.mxu1 %v9225_v45 }
 0x816   :  { %8302 = vmatprep.subr.bf16.mxu1 %v8634_v12  ;;  %7834 = vmatprep.mubr.msk.f32.mxu1 %vm8635_vm2, %v8636_v19 }
 0x818   :  { %8298 = vmatpush3.bf16.msra.mxu0 %v9212_v31 }
 0x819   :  { %8305 = vmatprep.subr.bf16.mxu0 %v8634_v12  ;;  %8304 = vmatpush3.bf16.msra.mxu1 %v9233_v60 }
 0x81a   :  { %8311 = vmatprep.subr.bf16.mxu1 %v8634_v12 }
 0x81b   :  { %7824 = vmatmul.mubr.msk.f32.vlgmr.msra.gmra.mrb[54].mxu0 %vm355_vm3, %v5183_v37 }
 0x81c   :  { %8307 = vmatpush3.bf16.msra.mxu0 %v9227_v50  ;;  %7845 = vmatprep.mubr.msk.f32.mxu0 %vm8635_vm2, %v8636_v19 }
 0x81d   :  { %8308 = vmatprep.subr.bf16.mxu0 %v8634_v12 }
 0x820   :  { %8310 = vmatpush3.bf16.msra.mxu0 %v9235_v63 }
 0x821   :  { %8323 = vmatprep.subr.bf16.mxu0 %v8634_v12 }
 0x8d6   :  { %v5414_v35 = vpop.f32.mrb[50].mxu0  ;;  %v5565_v42 = vpop.f32.mrb[48].mxu1 }
 0x8d7   :  { %v7759_v51 = vpop.f32.mrb[51].mxu0  ;;  %v7781_v52 = vpop.f32.mrb[49].mxu1  ;;  %v8356_v50 = vadd.f32 %v9358_v15, %v5565_v42 }
 0x8d9   :  { %v6686_v38 = vmul.f32 -1.442695, %v8356_v50 }
 0x8de   :  { %v5491_v18 = vpop.f32.mrb[48].mxu0  ;;  %v5646_v31 = vpop.f32.mrb[50].mxu1 }
 0x8df   :  { %v8355_v45 = vadd.f32 %v9353_v54, %v5491_v18  ;;  %v7770_v60 = vpop.f32.mrb[49].mxu0  ;;  %v7792_v1 = vpop.f32.mrb[51].mxu1  ;;  %v5647_v9 = vadd.f32 %v9367_v21, %v5646_v31 }
 0x8e1   :  { %v6685_v39 = vmul.f32 -1.442695, %v8355_v45 }
 0x8e3   :  { %8529 = vpow2.f32 %v6685_v39 }
 0x8e4   :  { %8531 = vpow2.f32 %v6686_v38 }
 0x8e6   :  { %v5742_v46 = vpop.f32.mrb[52].mxu0  ;;  %v5816_v48 = vpop.f32.mrb[52].mxu1 }
 0x8e7   :  { %v5902_v63 = vrot.slane %v5742_v46, 2  ;;  %v5912_v22 = vrot.slane %v5816_v48, 2  ;;  %v7803_v55 = vpop.f32.mrb[53].mxu0  ;;  %v7814_v56 = vpop.f32.mrb[53].mxu1 }
 0x8e9   :  { %v5904_v25 = vadd.f32 %v5902_v63, %v8839_v43  ;;  %v5914_v62 = vadd.f32 %v5912_v22, %v8837_v41  ;;  %v5415_v41 = vadd.f32 %v9372_v28, %v5414_v35 }
 0x8eb   :  { %v6691_v49 = vmul.f32 -1.442695, %v5904_v25  ;;  %v6692_v40 = vmul.f32 -1.442695, %v5914_v62 }
 0x8ed   :  { %v8530_v53 = vpop.eup %8529  ;;  %8533 = vpow2.f32 %v6691_v49 }
 0x8ee   :  { %v5654_v2 = vadd.f32 1.0, %v8530_v53  ;;  %8535 = vpow2.f32 %v6692_v40  ;;  %v5897_v3 = vpop.f32.mrb[54].mxu0  ;;  %v8532_v5 = vpop.eup %8531 }
 0x8ef   :  { %v7825_v29 = vpop.f32.mrb[55].mxu0  ;;  %v5661_v34 = vadd.f32 1.0, %v8532_v5  ;;  %v5898_v10 = vadd.f32 %v9250_v36, %v5897_v3 }
 0x8f0   :  { %8537 = vrcp.f32 %v5654_v2 }
 0x8f1   :  { %8539 = vrcp.f32 %v5661_v34  ;;  %v5922_v33 = vrot.slane %v5898_v10, 2 }
 0x8f7   :  { %v8534_v13 = vpop.eup %8533 }
 0x8f8   :  { %v8536_v14 = vpop.eup %8535  ;;  %v5908_v24 = vadd.f32 1.0, %v8534_v13 }
 0x8f9   :  { %v5918_v43 = vadd.f32 1.0, %v8536_v14 }
 0x8fa   :  { %v8538_v16 = vpop.eup %8537  ;;  %8541 = vrcp.f32 %v5908_v24 }
 0x8fb   :  { %v5664_v30 = vmul.f32 %v8538_v16, %v5647_v9  ;;  %8543 = vrcp.f32 %v5918_v43  ;;  %v8540_v59 = vpop.eup %8539 }
 0x8fc   :  { %v5667_v42 = vsub.f32 1.0, %v8540_v59  ;;  %v5669_v52 = vmul.f32 %v8540_v59, %v9463_v6 }
 0x8fd   :  { %v5665_v27 = vadd.f32 %v5664_v30, %v5415_v41 }
 0x8ff   :  { %8545 = vtanh.f32 %v5665_v27 }
 0x904   :  { %v8542_v57 = vpop.eup %8541 }
 0x905   :  { %v8544_v17 = vpop.eup %8543  ;;  %v5924_v26 = vmul.f32 %v8542_v57, %v5922_v33 }
 0x906   :  { %v5931_v32 = vmul.f32 %v8544_v17, %v5929_v44  ;;  %v5927_v36 = vsub.f32 1.0, %v8544_v17 }
 0x907   :  { %v5925_v37 = vadd.f32 %v5924_v26, %v8844_v47  ;;  %v6434_v47 = vld [vmem:[#allocation2] sm:$0xff] }
 0x909   :  { %v8546_v51 = vpop.eup %8545  ;;  %8547 = vtanh.f32 %v5925_v37 }
 0x90a   :  { %v5668_v35 = vmul.f32 %v8546_v51, %v5667_v42 }
 0x90c   :  { %v9546_v18 = vadd.f32 %v5669_v52, %v5668_v35 }
 0x90e   :  { %5671 = vst.msk [vmem:[#allocation2 + $0xc] sm:$0x3] %vm1109_vm4, %v9546_v18 }
 0x913   :  { %v8548_v31 = vpop.eup %8547 }
 0x914   :  { %v5928_v45 = vmul.f32 %v8548_v31, %v5927_v36 }
 0x916   :  { %v5932_v61 = vadd.f32 %v5931_v32, %v5928_v45 }
 0x918   :  { %v5945_v60 = vrot.slane %v5932_v61, 6 }
 0x91a   :  { %7835 = vmatmul.mubr.msk.f32.vlgmr.msra.gmra.mrb[54].mxu1 %vm355_vm3, %v5945_v60  ;;  %7846 = vmatmul.mubr.msk.f32.vlgmr.msra.gmra.mrb[56].mxu0 %vm355_vm3, %v5945_v60 }
 0x91b   :  { %8313 = vmatpush3.bf16.msra.mxu1 %v9260_v7  ;;  %8325 = vmatpush3.bf16.msra.mxu0 %v9262_v8  ;;  %v6438_v8 = vld [vmem:[%s9619_s9 + $0x10] sm:$0xff] }
 0x91c   :  { %8314 = vmatprep.subr.bf16.mxu1 %v8634_v12  ;;  %8326 = vmatprep.subr.bf16.mxu0 %v8634_v12 }
 0x91d   :  { %7856 = vmatprep.mubr.msk.f32.mxu1 %vm8635_vm2, %v8636_v19  ;;  %7878 = vmatprep.mubr.msk.f32.mxu0 %vm8635_vm2, %v8636_v19 }
 0x91f   :  { %8316 = vmatpush3.bf16.msra.mxu1 %v9272_v11  ;;  %8328 = vmatpush3.bf16.msra.mxu0 %v9274_v20  ;;  %v6439_v11 = vld [vmem:[%s9619_s9 + $0x18] sm:$0xff] }
 0x920   :  { %8317 = vmatprep.subr.bf16.mxu1 %v8634_v12  ;;  %8329 = vmatprep.subr.bf16.mxu0 %v8634_v12  ;;  %v8339_v20 = vpack.c.bf16 %v6439_v11, %v6438_v8 }
 0x922   :  { %7857 = vmatmul.mubr.msk.f32.vlgmr.msra.gmra.mrb[56].mxu1 %vm355_vm3, %v5945_v60  ;;  %7879 = vmatmul.mubr.msk.f32.vlgmr.msra.gmra.mrb[56].mxu0 %vm355_vm3, %v9546_v18 }
 0x923   :  { %8319 = vmatpush3.bf16.msra.mxu1 %v9284_v0  ;;  %8331 = vmatpush3.bf16.msra.mxu0 %v9286_v58 }
 0x924   :  { %8320 = vmatprep.subr.bf16.mxu1 %v8634_v12  ;;  %8332 = vmatprep.subr.bf16.mxu0 %v8634_v12  ;;  %v6436_v12 = vld [vmem:[%s9619_s9] sm:$0xff] }
 0x925   :  { %7867 = vmatprep.mubr.msk.f32.mxu1 %vm8635_vm2, %v8636_v19  ;;  %7889 = vmatprep.mubr.msk.f32.mxu0 %vm8635_vm2, %v8636_v19  ;;  %v6437_v19 = vld [vmem:[%s9619_s9 + $0x8] sm:$0xff] }
 0x926   :  { %v8335_v7 = vpack.c.bf16 %v6437_v19, %v6436_v12 }
 0x927   :  { %8322 = vmatpush3.bf16.msra.mxu1 %v9296_v4  ;;  %8334 = vmatpush3.bf16.msra.mxu0 %v9298_v23 }
 0x928   :  { %8336 = vmatprep.subr.bf16.mxu1 %v8335_v7 }
 0x92a   :  { %7868 = vmatmul.mubr.msk.f32.vlgmr.msra.gmra.mrb[54].mxu1 %vm355_vm3, %v9546_v18  ;;  %7890 = vmatmul.mubr.msk.f32.vlgmr.msra.gmra.mrb[58].mxu0 %vm355_vm3, %v9546_v18 }
 0x92b   :  { %7900 = vmatprep.mubr.msk.f32.mxu1 %vm355_vm3, %v6434_v47  ;;  %8338 = vmatpush3.bf16.msra.mxu1 %v8335_v7 }
 0x92c   :  { %8340 = vmatprep.subr.bf16.mxu1 %v8339_v20 }
 0x92f   :  { %8342 = vmatpush3.bf16.msra.mxu1 %v8339_v20 }
 0x9f5   :  { %v6176_v0 = vpop.f32.mrb[56].mxu1  ;;  %v6327_v58 = vpop.f32.mrb[56].mxu0 }
 0x9f6   :  { %v7858_v4 = vpop.f32.mrb[57].mxu1  ;;  %v7880_v23 = vpop.f32.mrb[57].mxu0  ;;  %v8358_v48 = vadd.f32 %v9358_v15, %v6327_v58  ;;  %v6177_v40 = vadd.f32 %v9372_v28, %v6176_v0 }
 0x9f8   :  { %v6706_v63 = vmul.f32 -1.442695, %v8358_v48 }
 0x9fd   :  { %v6253_v6 = vpop.f32.mrb[54].mxu1  ;;  %v6408_v1 = vpop.f32.mrb[58].mxu0 }
 0x9fe   :  { %v8357_v50 = vadd.f32 %v9353_v54, %v6253_v6  ;;  %v7869_v39 = vpop.f32.mrb[55].mxu1  ;;  %v7891_v38 = vpop.f32.mrb[59].mxu0  ;;  %v6409_v62 = vadd.f32 %v9367_v21, %v6408_v1  ;;  %v6707_v21 = vld [vmem:[%s9620_s10] ss:$0 sm:$0xff] }
 0xa00   :  { %v6705_v46 = vmul.f32 -1.442695, %v8357_v50 }
 0xa02   :  { %8549 = vpow2.f32 %v6705_v46 }
 0xa03   :  { %8551 = vpow2.f32 %v6706_v63 }
 0xa0c   :  { %v8550_v22 = vpop.eup %8549 }
 0xa0d   :  { %v6416_v55 = vadd.f32 1.0, %v8550_v22  ;;  %v8552_v56 = vpop.eup %8551 }
 0xa0e   :  { %v6423_v25 = vadd.f32 1.0, %v8552_v56 }
 0xa0f   :  { %8553 = vrcp.f32 %v6416_v55 }
 0xa10   :  { %8555 = vrcp.f32 %v6423_v25 }
 0xa19   :  { %v8554_v49 = vpop.eup %8553 }
 0xa1a   :  { %v6426_v54 = vmul.f32 %v8554_v49, %v6409_v62  ;;  %v8556_v2 = vpop.eup %8555 }
 0xa1b   :  { %v6429_v3 = vsub.f32 1.0, %v8556_v2  ;;  %v6431_v29 = vmul.f32 %v8556_v2, %v9546_v18 }
 0xa1c   :  { %v6427_v53 = vadd.f32 %v6426_v54, %v6177_v40 }
 0xa1e   :  { %8557 = vtanh.f32 %v6427_v53 }
 0xa28   :  { %v8558_v15 = vpop.eup %8557 }
 0xa29   :  { %v6430_v5 = vmul.f32 %v8558_v15, %v6429_v3 }
 0xa2b   :  { %v6432_v34 = vadd.f32 %v6431_v29, %v6430_v5 }
 0xa2d   :  { %6433 = vst.msk [vmem:[#allocation2 + $0xe] sm:$0x3] %vm1109_vm4, %v6432_v34 }
 0xa34   :  { %v6435_v13 = vld [vmem:[#allocation2 + $0x8] sm:$0xff] }
 0xa35   :  { %7901 = vmatmul.mubr.msk.f32.vlgmr.msra.gmra.mrb[58].mxu1 %vm355_vm3, %v6435_v13 }
 0xb08   :  { %v7902_v28 = vpop.f32.mrb[58].mxu1 }
 0xb09   :  { %v6525_v14 = vadd.f32 %v7902_v28, %v6707_v21  ;;  %v6519_v24 = vpop.f32.mrb[59].mxu1 }
 0xb0a   :  { %v6520_v9 = vadd.f32 %v6707_v21, %v6519_v24 }
 0xb0b   :  { %6530 = vst.msk [vmem:[%s9621_s11 + $0x8] sm:$0xff] %vm6528_vm5, %v6525_v14 }
 0xb0c   :  { %6529 = vst.msk [vmem:[%s9621_s11] sm:$0xff] %vm6528_vm5, %v6520_v9 }
 0xb0d   :  { %6535 = vsyncpa [#allocation4], 1 }
 0xb0e   :  { %6536 = vsyncpa [#allocation6], 1 }

</bundles_post_ra>
